<compile_context>
chip_gen: v7x
topology: tpu7x:2x2x1
jax: 0.10.0
libtpu: 0.0.40
codegen_flags: <defaults>
</compile_context>

<pallas_src>
import functools

import jax
import jax.numpy as jnp
from jax.experimental import pallas as pl
from jax.experimental.pallas import tpu as pltpu


# ---------------------------------------------------------------------------
# Kernel 1: fused 1x1 convolution (channel projection), one batch element per
# grid step.
#   x_ref : (Cin, H*W)   float32   (cast to bf16 in-register for the MXU)
#   w_ref : (Cout, Cin)  bfloat16  (grid-invariant)
#   b_ref : (Cout, 1)    float32   (grid-invariant)
#   o_ref : (Cout, H*W)  bfloat16  (bf16 intermediate -> half HBM traffic)
# ---------------------------------------------------------------------------
def _conv1x1_kernel(x_ref, w_ref, b_ref, o_ref):
    x_bf16 = x_ref[...].astype(jnp.bfloat16)
    acc = jnp.dot(w_ref[...], x_bf16, preferred_element_type=jnp.float32)
    o_ref[...] = (acc + b_ref[...]).astype(o_ref.dtype)


def conv1x1_nchw(x, weight_bf16, bias):
    """1x1 Conv2d on NCHW input.  Returns [B, Cout, H*W] bfloat16 (NCHW-contiguous)."""
    B, Cin, H, W = x.shape
    Cout = weight_bf16.shape[0]
    HW = H * W
    x2 = x.reshape(B, Cin, HW)
    b2 = bias.reshape(Cout, 1).astype(jnp.float32)
    return pl.pallas_call(
        _conv1x1_kernel,
        out_shape=jax.ShapeDtypeStruct((B, Cout, HW), jnp.bfloat16),
        grid=(B,),
        in_specs=[
            pl.BlockSpec((None, Cin, HW), lambda b: (b, 0, 0)),
            pl.BlockSpec((Cout, Cin), lambda b: (0, 0)),   # grid-invariant weights
            pl.BlockSpec((Cout, 1), lambda b: (0, 0)),     # grid-invariant bias
        ],
        out_specs=pl.BlockSpec((None, Cout, HW), lambda b: (b, 0, 0)),
        compiler_params=pltpu.CompilerParams(dimension_semantics=("parallel",)),
    )(x2, weight_bf16, b2)


# ---------------------------------------------------------------------------
# Bilinear resize as two dense MXU matmuls per plane, all planes of one batch
# element handled in a single grid step.
# ---------------------------------------------------------------------------
def _bilinear_matrix(in_size, out_size, dtype=jnp.float32):
    """Dense (out_size, in_size) 1-D resampling matrix matching PyTorch
    F.interpolate(mode='bilinear', align_corners=False) along one axis."""
    scale = in_size / out_size
    i = jnp.arange(out_size, dtype=jnp.float32)
    src = jnp.maximum((i + 0.5) * scale - 0.5, 0.0)
    i0 = jnp.clip(jnp.floor(src).astype(jnp.int32), 0, in_size - 1)
    i1 = jnp.minimum(i0 + 1, in_size - 1)
    w1 = src - i0.astype(jnp.float32)
    w0 = 1.0 - w1
    cols = jnp.arange(in_size, dtype=jnp.int32)[None, :]
    m = (w0[:, None] * (i0[:, None] == cols)
         + w1[:, None] * (i1[:, None] == cols))
    return m.astype(dtype)


def _bilinear_resize_kernel(img_ref, rrow_ref, rcolT_ref, o_ref):
    # img_ref  : (C, Hin, Win)   bf16
    # rrow_ref : (Hout, Hin)     bf16
    # rcolT_ref: (Win, Wout)     bf16
    # o_ref    : (C, Hout, Wout) fp32
    rrow = rrow_ref[...]
    rcolT = rcolT_ref[...]
    for p in range(img_ref.shape[0]):           # static unroll over colour planes
        tmp = jnp.dot(img_ref[p], rcolT, preferred_element_type=jnp.float32)
        o_ref[p] = jnp.dot(rrow, tmp.astype(jnp.bfloat16),
                           preferred_element_type=jnp.float32).astype(o_ref.dtype)


def bilinear_resize_nchw(img_bf16, out_h, out_w):
    """img: [B, C, H, W] bfloat16 -> [B, C, out_h, out_w] float32; semantics of
    F.interpolate(mode='bilinear', align_corners=False)."""
    B, C, H, W = img_bf16.shape
    # Note: for the default 96 -> 384 resize the taps are exactly
    # bf16-representable; for arbitrary ratios keep these in fp32.
    rrow = _bilinear_matrix(H, out_h).astype(jnp.bfloat16)        # (out_h, H)
    rcolT = _bilinear_matrix(W, out_w).T.astype(jnp.bfloat16)     # (W, out_w)
    return pl.pallas_call(
        _bilinear_resize_kernel,
        out_shape=jax.ShapeDtypeStruct((B, C, out_h, out_w), jnp.float32),
        grid=(B,),
        in_specs=[
            pl.BlockSpec((None, C, H, W), lambda b: (b, 0, 0, 0)),
            pl.BlockSpec((out_h, H), lambda b: (0, 0)),           # grid-invariant
            pl.BlockSpec((W, out_w), lambda b: (0, 0)),           # grid-invariant
        ],
        out_specs=pl.BlockSpec((None, C, out_h, out_w),
                               lambda b: (b, 0, 0, 0)),
        compiler_params=pltpu.CompilerParams(dimension_semantics=("parallel",)),
    )(img_bf16, rrow, rcolT)


# ---------------------------------------------------------------------------
# Full forward pass (mirrors SpatialConcatenation.forward)
# ---------------------------------------------------------------------------
def spatial_concatenation_forward(x, weight, bias, *, row_blocks=6,
                                  column_blocks=6, spatial_dim=384):
    B, Cin, H, W = x.shape
    Cout = weight.shape[0]
    assert Cout == 3 * row_blocks * column_blocks

    # (1) 1x1 channel-conversion conv (Pallas MXU matmul, bf16 intermediate).
    y = conv1x1_nchw(x, weight, bias)                       # [B, Cout, H*W] bf16

    # (2) raw row-major reshape [B, 3*R*C, H, W] -> [B, 3, R*H, C*W]
    #     (free: [B, Cout, H*W] is already NCHW-contiguous).
    big = y.reshape(B, 3, row_blocks * H, column_blocks * W)

    # (3) bilinear resize to (spatial_dim, spatial_dim), align_corners=False.
    return bilinear_resize_nchw(big, spatial_dim, spatial_dim)


# ---------------------------------------------------------------------------
# Pure-JAX reference mirroring the kernel numerics (bf16 operands, fp32 accum,
# bf16 intermediates) used for a cheap in-script correctness check.
# ---------------------------------------------------------------------------
def _reference_forward(x, weight_bf16, bias, *, row_blocks, column_blocks,
                       spatial_dim):
    B, Cin, H, W = x.shape
    y = jnp.einsum("oc,bcp->bop", weight_bf16,
                   x.reshape(B, Cin, H * W).astype(jnp.bfloat16),
                   preferred_element_type=jnp.float32) + bias[None, :, None]
    y = y.astype(jnp.bfloat16)
    big = y.reshape(B, 3, row_blocks * H, column_blocks * W)
    rrow = _bilinear_matrix(row_blocks * H, spatial_dim).astype(jnp.bfloat16)
    rcol = _bilinear_matrix(column_blocks * W, spatial_dim).astype(jnp.bfloat16)
    tmp = jnp.einsum("bchw,jw->bchj", big, rcol,
                     preferred_element_type=jnp.float32).astype(jnp.bfloat16)
    return jnp.einsum("ih,bchj->bcij", rrow, tmp,
                      preferred_element_type=jnp.float32)


# ---------------------------------------------------------------------------
if __name__ == "__main__":
    B = 2
    IN_CHANNELS = 125        # module default
    ROW_BLOCKS = 6
    COLUMN_BLOCKS = 6
    SPATIAL_DIM = 384        # module default (multiple of 128 -> lane-dense stores)
    H = W = 16               # small input spatial block

    OUT_CHANNELS = 3 * ROW_BLOCKS * COLUMN_BLOCKS   # 108

    key = jax.random.PRNGKey(0)
    kx, kw, kb = jax.random.split(key, 3)
    x = jax.random.normal(kx, (B, IN_CHANNELS, H, W), jnp.float32)
    weight = (jax.random.normal(kw, (OUT_CHANNELS, IN_CHANNELS), jnp.float32)
              * (1.0 / IN_CHANNELS ** 0.5)).astype(jnp.bfloat16)
    bias = 0.01 * jax.random.normal(kb, (OUT_CHANNELS,), jnp.float32)

    fwd = jax.jit(functools.partial(
        spatial_concatenation_forward,
        row_blocks=ROW_BLOCKS, column_blocks=COLUMN_BLOCKS,
        spatial_dim=SPATIAL_DIM))
    out = fwd(x, weight, bias)
    jax.block_until_ready(out)

    assert out.shape == (B, 3, SPATIAL_DIM, SPATIAL_DIM)
    assert out.dtype == jnp.float32
    assert bool(jnp.all(jnp.isfinite(out)))

    ref = _reference_forward(x, weight, bias, row_blocks=ROW_BLOCKS,
                             column_blocks=COLUMN_BLOCKS,
                             spatial_dim=SPATIAL_DIM)
    max_err = float(jnp.max(jnp.abs(out - ref)))
    assert max_err < 1e-2, f"max abs err vs reference: {max_err}"

    print("KERNEL_OK")
</pallas_src>

<mosaic_0001>
module attributes {stable_mosaic.version = 11 : i64} {
  func.func @_conv1x1_kernel(%arg0: i32, %arg1: memref<1x125x256xf32, #tpu.memory_space<vmem>>, %arg2: memref<108x125xbf16, #tpu.memory_space<vmem>>, %arg3: memref<108x1xf32, #tpu.memory_space<vmem>>, %arg4: memref<1x108x256xbf16, #tpu.memory_space<vmem>>) attributes {dimension_semantics = [#tpu.dimension_semantics<parallel>], iteration_bounds = array<i64: 2>, scalar_prefetch = 0 : i64, scratch_operands = 0 : i64, tpu.core_type = #tpu.core_type<tc>, window_params = [{transform_indices = @transform_0, window_bounds = array<i64: 1, 125, 256>}, {pipeline_mode = #tpu.pipeline_mode<synchronous>, transform_indices = @transform_1, window_bounds = array<i64: 108, 125>}, {pipeline_mode = #tpu.pipeline_mode<synchronous>, transform_indices = @transform_2, window_bounds = array<i64: 108, 1>}, {transform_indices = @transform_3, window_bounds = array<i64: 1, 108, 256>}]} {
    %c0 = arith.constant 0 : index
    %c0_0 = arith.constant 0 : index
    %c0_1 = arith.constant 0 : index
    %0 = vector.load %arg1[%c0, %c0_0, %c0_1] : memref<1x125x256xf32, #tpu.memory_space<vmem>>, vector<1x125x256xf32>
    %1 = vector.shape_cast %0 : vector<1x125x256xf32> to vector<125x256xf32>
    %2 = arith.truncf %1 : vector<125x256xf32> to vector<125x256xbf16>
    %c0_2 = arith.constant 0 : index
    %c0_3 = arith.constant 0 : index
    %3 = vector.load %arg2[%c0_2, %c0_3] : memref<108x125xbf16, #tpu.memory_space<vmem>>, vector<108x125xbf16>
    %cst = arith.constant dense<0.000000e+00> : vector<108x256xf32>
    %4 = tpu.matmul %3, %2, %cst {dimension_numbers = #tpu.dot_dimension_numbers<[1], [0], [0], [1], [0, 0, 1, 1], [], []>} : vector<108x125xbf16>, vector<125x256xbf16>, vector<108x256xf32> -> vector<108x256xf32>
    %c0_4 = arith.constant 0 : index
    %c0_5 = arith.constant 0 : index
    %5 = vector.load %arg3[%c0_4, %c0_5] : memref<108x1xf32, #tpu.memory_space<vmem>>, vector<108x1xf32>
    %6 = vector.broadcast %5 : vector<108x1xf32> to vector<108x256xf32>
    %7 = arith.addf %4, %6 : vector<108x256xf32>
    %8 = arith.truncf %7 : vector<108x256xf32> to vector<108x256xbf16>
    %c0_6 = arith.constant 0 : index
    %c0_7 = arith.constant 0 : index
    %c0_8 = arith.constant 0 : index
    %9 = vector.load %arg4[%c0_6, %c0_7, %c0_8] : memref<1x108x256xbf16, #tpu.memory_space<vmem>>, vector<1x108x256xbf16>
    %10 = vector.shape_cast %9 : vector<1x108x256xbf16> to vector<108x256xbf16>
    %11 = vector.shape_cast %8 : vector<108x256xbf16> to vector<1x108x256xbf16>
    tpu.vector_store %arg4[%c0_6, %c0_7, %c0_8], %11 {strides = array<i32>} : memref<1x108x256xbf16, #tpu.memory_space<vmem>>, vector<1x108x256xbf16>,
    return
  }
  func.func @transform_0(%arg0: i32) -> (i32, i32, i32) {
    %c0_i32 = arith.constant 0 : i32
    %c0_i32_0 = arith.constant 0 : i32
    %c0_i32_1 = arith.constant 0 : i32
    return %arg0, %c0_i32, %c0_i32_0 : i32, i32, i32
  }
  func.func @transform_1(%arg0: i32) -> (i32, i32) {
    %c0_i32 = arith.constant 0 : i32
    %c0_i32_0 = arith.constant 0 : i32
    %c0_i32_1 = arith.constant 0 : i32
    return %c0_i32, %c0_i32_0 : i32, i32
  }
  func.func @transform_2(%arg0: i32) -> (i32, i32) {
    %c0_i32 = arith.constant 0 : i32
    %c0_i32_0 = arith.constant 0 : i32
    %c0_i32_1 = arith.constant 0 : i32
    return %c0_i32, %c0_i32_0 : i32, i32
  }
  func.func @transform_3(%arg0: i32) -> (i32, i32, i32) {
    %c0_i32 = arith.constant 0 : i32
    %c0_i32_0 = arith.constant 0 : i32
    %c0_i32_1 = arith.constant 0 : i32
    return %arg0, %c0_i32, %c0_i32_0 : i32, i32, i32
  }
}

module attributes {stable_mosaic.version = 11 : i64} {
  func.func @_bilinear_resize_kernel(%arg0: i32, %arg1: memref<1x3x96x96xbf16, #tpu.memory_space<vmem>>, %arg2: memref<384x96xbf16, #tpu.memory_space<vmem>>, %arg3: memref<96x384xbf16, #tpu.memory_space<vmem>>, %arg4: memref<1x3x384x384xf32, #tpu.memory_space<vmem>>) attributes {dimension_semantics = [#tpu.dimension_semantics<parallel>], iteration_bounds = array<i64: 2>, scalar_prefetch = 0 : i64, scratch_operands = 0 : i64, tpu.core_type = #tpu.core_type<tc>, window_params = [{transform_indices = @transform_0, window_bounds = array<i64: 1, 3, 96, 96>}, {pipeline_mode = #tpu.pipeline_mode<synchronous>, transform_indices = @transform_1, window_bounds = array<i64: 384, 96>}, {pipeline_mode = #tpu.pipeline_mode<synchronous>, transform_indices = @transform_2, window_bounds = array<i64: 96, 384>}, {transform_indices = @transform_3, window_bounds = array<i64: 1, 3, 384, 384>}]} {
    %c0 = arith.constant 0 : index
    %c0_0 = arith.constant 0 : index
    %0 = vector.load %arg2[%c0, %c0_0] : memref<384x96xbf16, #tpu.memory_space<vmem>>, vector<384x96xbf16>
    %c0_1 = arith.constant 0 : index
    %c0_2 = arith.constant 0 : index
    %1 = vector.load %arg3[%c0_1, %c0_2] : memref<96x384xbf16, #tpu.memory_space<vmem>>, vector<96x384xbf16>
    %c0_3 = arith.constant 0 : index
    %c0_4 = arith.constant 0 : index
    %c0_5 = arith.constant 0 : index
    %c0_6 = arith.constant 0 : index
    %2 = vector.load %arg1[%c0_3, %c0_4, %c0_5, %c0_6] : memref<1x3x96x96xbf16, #tpu.memory_space<vmem>>, vector<1x1x96x96xbf16>
    %3 = vector.shape_cast %2 : vector<1x1x96x96xbf16> to vector<96x96xbf16>
    %cst = arith.constant dense<0.000000e+00> : vector<96x384xf32>
    %4 = tpu.matmul %3, %1, %cst {dimension_numbers = #tpu.dot_dimension_numbers<[1], [0], [0], [1], [0, 0, 1, 1], [], []>} : vector<96x96xbf16>, vector<96x384xbf16>, vector<96x384xf32> -> vector<96x384xf32>
    %5 = arith.truncf %4 : vector<96x384xf32> to vector<96x384xbf16>
    %cst_7 = arith.constant dense<0.000000e+00> : vector<384x384xf32>
    %6 = tpu.matmul %0, %5, %cst_7 {dimension_numbers = #tpu.dot_dimension_numbers<[1], [0], [0], [1], [0, 0, 1, 1], [], []>} : vector<384x96xbf16>, vector<96x384xbf16>, vector<384x384xf32> -> vector<384x384xf32>
    %c0_8 = arith.constant 0 : index
    %c0_9 = arith.constant 0 : index
    %c0_10 = arith.constant 0 : index
    %c0_11 = arith.constant 0 : index
    %7 = vector.load %arg4[%c0_8, %c0_9, %c0_10, %c0_11] : memref<1x3x384x384xf32, #tpu.memory_space<vmem>>, vector<1x1x384x384xf32>
    %8 = vector.shape_cast %7 : vector<1x1x384x384xf32> to vector<384x384xf32>
    %9 = vector.shape_cast %6 : vector<384x384xf32> to vector<1x1x384x384xf32>
    tpu.vector_store %arg4[%c0_8, %c0_9, %c0_10, %c0_11], %9 {strides = array<i32>} : memref<1x3x384x384xf32, #tpu.memory_space<vmem>>, vector<1x1x384x384xf32>,
    %c0_12 = arith.constant 0 : index
    %c1 = arith.constant 1 : index
    %c0_13 = arith.constant 0 : index
    %c0_14 = arith.constant 0 : index
    %10 = vector.load %arg1[%c0_12, %c1, %c0_13, %c0_14] : memref<1x3x96x96xbf16, #tpu.memory_space<vmem>>, vector<1x1x96x96xbf16>
    %11 = vector.shape_cast %10 : vector<1x1x96x96xbf16> to vector<96x96xbf16>
    %cst_15 = arith.constant dense<0.000000e+00> : vector<96x384xf32>
    %12 = tpu.matmul %11, %1, %cst_15 {dimension_numbers = #tpu.dot_dimension_numbers<[1], [0], [0], [1], [0, 0, 1, 1], [], []>} : vector<96x96xbf16>, vector<96x384xbf16>, vector<96x384xf32> -> vector<96x384xf32>
    %13 = arith.truncf %12 : vector<96x384xf32> to vector<96x384xbf16>
    %cst_16 = arith.constant dense<0.000000e+00> : vector<384x384xf32>
    %14 = tpu.matmul %0, %13, %cst_16 {dimension_numbers = #tpu.dot_dimension_numbers<[1], [0], [0], [1], [0, 0, 1, 1], [], []>} : vector<384x96xbf16>, vector<96x384xbf16>, vector<384x384xf32> -> vector<384x384xf32>
    %c0_17 = arith.constant 0 : index
    %c1_18 = arith.constant 1 : index
    %c0_19 = arith.constant 0 : index
    %c0_20 = arith.constant 0 : index
    %15 = vector.load %arg4[%c0_17, %c1_18, %c0_19, %c0_20] : memref<1x3x384x384xf32, #tpu.memory_space<vmem>>, vector<1x1x384x384xf32>
    %16 = vector.shape_cast %15 : vector<1x1x384x384xf32> to vector<384x384xf32>
    %17 = vector.shape_cast %14 : vector<384x384xf32> to vector<1x1x384x384xf32>
    tpu.vector_store %arg4[%c0_17, %c1_18, %c0_19, %c0_20], %17 {strides = array<i32>} : memref<1x3x384x384xf32, #tpu.memory_space<vmem>>, vector<1x1x384x384xf32>,
    %c0_21 = arith.constant 0 : index
    %c2 = arith.constant 2 : index
    %c0_22 = arith.constant 0 : index
    %c0_23 = arith.constant 0 : index
    %18 = vector.load %arg1[%c0_21, %c2, %c0_22, %c0_23] : memref<1x3x96x96xbf16, #tpu.memory_space<vmem>>, vector<1x1x96x96xbf16>
    %19 = vector.shape_cast %18 : vector<1x1x96x96xbf16> to vector<96x96xbf16>
    %cst_24 = arith.constant dense<0.000000e+00> : vector<96x384xf32>
    %20 = tpu.matmul %19, %1, %cst_24 {dimension_numbers = #tpu.dot_dimension_numbers<[1], [0], [0], [1], [0, 0, 1, 1], [], []>} : vector<96x96xbf16>, vector<96x384xbf16>, vector<96x384xf32> -> vector<96x384xf32>
    %21 = arith.truncf %20 : vector<96x384xf32> to vector<96x384xbf16>
    %cst_25 = arith.constant dense<0.000000e+00> : vector<384x384xf32>
    %22 = tpu.matmul %0, %21, %cst_25 {dimension_numbers = #tpu.dot_dimension_numbers<[1], [0], [0], [1], [0, 0, 1, 1], [], []>} : vector<384x96xbf16>, vector<96x384xbf16>, vector<384x384xf32> -> vector<384x384xf32>
    %c0_26 = arith.constant 0 : index
    %c2_27 = arith.constant 2 : index
    %c0_28 = arith.constant 0 : index
    %c0_29 = arith.constant 0 : index
    %23 = vector.load %arg4[%c0_26, %c2_27, %c0_28, %c0_29] : memref<1x3x384x384xf32, #tpu.memory_space<vmem>>, vector<1x1x384x384xf32>
    %24 = vector.shape_cast %23 : vector<1x1x384x384xf32> to vector<384x384xf32>
    %25 = vector.shape_cast %22 : vector<384x384xf32> to vector<1x1x384x384xf32>
    tpu.vector_store %arg4[%c0_26, %c2_27, %c0_28, %c0_29], %25 {strides = array<i32>} : memref<1x3x384x384xf32, #tpu.memory_space<vmem>>, vector<1x1x384x384xf32>,
    return
  }
  func.func @transform_0(%arg0: i32) -> (i32, i32, i32, i32) {
    %c0_i32 = arith.constant 0 : i32
    %c0_i32_0 = arith.constant 0 : i32
    %c0_i32_1 = arith.constant 0 : i32
    %c0_i32_2 = arith.constant 0 : i32
    return %arg0, %c0_i32, %c0_i32_0, %c0_i32_1 : i32, i32, i32, i32
  }
  func.func @transform_1(%arg0: i32) -> (i32, i32) {
    %c0_i32 = arith.constant 0 : i32
    %c0_i32_0 = arith.constant 0 : i32
    %c0_i32_1 = arith.constant 0 : i32
    return %c0_i32, %c0_i32_0 : i32, i32
  }
  func.func @transform_2(%arg0: i32) -> (i32, i32) {
    %c0_i32 = arith.constant 0 : i32
    %c0_i32_0 = arith.constant 0 : i32
    %c0_i32_1 = arith.constant 0 : i32
    return %c0_i32, %c0_i32_0 : i32, i32
  }
  func.func @transform_3(%arg0: i32) -> (i32, i32, i32, i32) {
    %c0_i32 = arith.constant 0 : i32
    %c0_i32_0 = arith.constant 0 : i32
    %c0_i32_1 = arith.constant 0 : i32
    %c0_i32_2 = arith.constant 0 : i32
    return %arg0, %c0_i32, %c0_i32_0, %c0_i32_1 : i32, i32, i32, i32
  }
}

</mosaic_0001>

<bundles_post_ra>
// kernel: spatial_concatenation_forward.2
= control target key start
LH: loop header
LB: loop body
LE: loop exit
PB: predicated region body
PF: predicated region fallthrough
CT: control target
= control target key end

     0   :  { %8 = vsyncpa [#allocation3], 0  ;;  %s837_s12 = smov 0   ;;  %s1023_s0 = inlined_call_operand.vmem [shape: f32[2,125,256], index: 0, kind: input, shape index: {}]   ;;  %s1024_s1 = inlined_call_operand.hbm [shape: bf16[108,125], index: 1, kind: input, shape index: {}]   ;;  %s1025_s2 = inlined_call_operand.vmem [shape: f32[108,1], index: 2, kind: input, shape index: {}]   ;;  %s1026_s3 = inlined_call_operand.vmem [shape: bf16[2,108,256], index: 3, kind: output, shape index: {}]  }
   0x1 LB: > { %s843_s13 = sadd.s32 4294967295, %s810_s12   ;;  %p670_p0 = scmp.ge.s32.totalorder %s810_s12, 1  ;;  %s810_s12 = sphi %s837_s12, %s14_s12  }
   0x2   : > { %p113_p1 = scmp.lt.s32.totalorder %s810_s12, 3  ;;  %s812_s14 = smov [#allocation2]  }
   0x3   : > { %s125_s15 = sshll.u32 %s812_s14, 4  ;;  %p1027_p3 = scmp.eq.s32.totalorder %s843_s13, 0  ;;  %s126_s15 = int_to_ptr.vmem [resolvable:$true] %s125_s15 }
   0x4   : > { %p847_p2 = pnand %p670_p0, %p113_p1  ;;  %s772_s20 = scalar_lea.hbm %s1024_s1, 896 }
   0x5   : > { %p773_p6 = scmp.ne.s32.totalorder %s1024_s1, %s772_s20  ;;  %p779_p10 = scmp.lt.u32.totalorder %s772_s20, %s1024_s1 }
   0x6   : > { %s1029_s16 = scalar_select %p847_p2, 1, 0 }
   0x7   : > { %p744_p4 = pneg %p847_p2 }
   0x9   : > { %p856_p5 = pnand %p1027_p3, %p744_p4 }
   0xb   : > { %p774_p7 = pneg %p856_p5 }
   0xd   : > { %p775_p8 = pnand %p774_p7, %p773_p6 }
   0xf   : > { %p776_p9 = pneg %p775_p8 }
  0x11   : > { %p781_p11 = pnand %p779_p10, %p776_p9 }
  0x13   : > { %784 = shalt.err (!%p781_p11)
}
  0x14   : > { %s785_s25 = scalar_lea.vmem %s126_s15, 896  ;;  %p793_p1 = scmp.lt.s32.totalorder %s126_s15, %s126_s15 }
  0x15   : > { %p786_p12 = scmp.ne.s32.totalorder %s126_s15, %s785_s25  ;;  %p794_p4 = scmp.lt.s32.totalorder %s785_s25, %s785_s25 }
  0x17   : > { %p788_p13 = pnand %p786_p12, %p774_p7  ;;  %p795_p3 = por %p794_p4, %p793_p1 }
  0x19   : > { %p789_p0 = pneg %p788_p13 }
  0x1b   : > { %p796_p2 = pnand %p795_p3, %p789_p0 }
  0x1d   : > { %799 = shalt.err (!%p796_p2)
}
  0x1e   : > { %s813_s26 = smov 64   ;;  %s814_s27 = smov 4  }
  0x1f   : > { %747 = dma.hbm_to_vmem [thread:$0]  (!%p856_p5), %s1024_s1, 896, %s126_s15, [#allocation3], %s813_s26, %s813_s26, %s814_s27  }
  0x20   : > { %p1031_p6 = scmp.ne.s32.totalorder %s1029_s16, 0 }
  0x21   : > { %p1032_p8 = scmp.eq.s32.totalorder (!%p1031_p6), %s843_s13, 0 }
  0x22   : > { %152 = sbr.rel (%p1031_p6) target bundleno = 326 (0x146), region = 32 }
  0x29   : > { %805 = dma.done.wait (%p1032_p8), [#allocation3], 896   ;;  %p1033_p7 = pmov %p1032_p8 }
  0x2a   : > { %p176_p2 = scmp.lt.s32.totalorder %s843_s13, 1  ;;  %v815_v0 = vmov 0   ;;  %vm390_vm0 = vcmask 1045504   ;;  %v251_v38 = vld [vmem:[%s1025_s2 + $0x10] sm:$0xff]  ;;  %v249_v41 = vld [vmem:[%s1025_s2] sm:$0xff]  ;;  %vm391_vm1 = vcmask 1046528  }
  0x2b   : > { %807 = vsyncadd (%p1033_p7), [#allocation3], 4294966400  ;;  %432 = vmatprep.mubr.bf16.mxu0 %v815_v0  ;;  %472 = vmatprep.mubr.bf16.mxu1 %v815_v0  ;;  %v816_v42 = vmov 65535   ;;  %v252_v44 = vld [vmem:[%s1025_s2 + $0x18] sm:$0xff]  ;;  %v250_v47 = vld [vmem:[%s1025_s2 + $0x8] sm:$0xff]  ;;  %vm368_vm2 = vcmask 1022976  }
  0x2c   : > { %s1035_s13 = smov (!%p176_p2, %s843_s13), 1  ;;  %764 = vset.pattern.permute.xlu1 %v815_v0  ;;  %763 = vset.pattern.permute.xlu0 %v815_v0  ;;  %v392_v43 = vsel %vm390_vm0, 4294967295, %v816_v42  ;;  %v254_v54 = vld [vmem:[%s1025_s2 + $0x28] sm:$0xff]  ;;  %v253_v57 = vld [vmem:[%s1025_s2 + $0x20] sm:$0xff]  ;;  %v256_v59 = vld [vmem:[%s1025_s2 + $0x38] sm:$0xff] }
  0x2d   : > { %s708_s30 = sshll.u32 %s1035_s13, 8  ;;  %275 = vperm.xlu1 %764, %v251_v38   ;;  %265 = vperm.xlu0 %763, %v249_v41   ;;  %v393_v53 = vsel %vm391_vm1, %v392_v43, 0  ;;  %v255_v61 = vld [vmem:[%s1025_s2 + $0x30] sm:$0xff]  ;;  %v765_v62 = vld [vmem:[#allocation2] sm:$0xff]   ;;  %s739_s10 = smul.u32 112, %s1035_s13 }
  0x2e   : > { %s894_s6 = scalar_lea.vmem %s1023_s0, %s708_s30  ;;  %v766_v63 = vld [vmem:[#allocation2 + $0x20] sm:$0xff]  }
  0x2f   : > { %v188_v1 = vld [vmem:[%s894_s6 + $0x8] sm:$0xff]  ;;  %v190_v2 = vld [vmem:[%s894_s6 + $0x18] sm:$0xff]  ;;  %v187_v3 = vld [vmem:[%s894_s6] sm:$0xff]  ;;  %s996_s15 = scalar_lea.vmem %s1026_s3, %s739_s10 }
  0x30   : > { %v220_v4 = vpack.c.bf16 %v190_v2, %v188_v1  ;;  %v189_v5 = vld [vmem:[%s894_s6 + $0x10] sm:$0xff]  ;;  %v192_v6 = vld [vmem:[%s894_s6 + $0x28] sm:$0xff]  ;;  %v194_v7 = vld [vmem:[%s894_s6 + $0x38] sm:$0xff] }
  0x31   : > { %v219_v8 = vpack.c.bf16 %v189_v5, %v187_v3  ;;  %v222_v9 = vpack.c.bf16 %v194_v7, %v192_v6  ;;  %v191_v10 = vld [vmem:[%s894_s6 + $0x20] sm:$0xff]  ;;  %v193_v11 = vld [vmem:[%s894_s6 + $0x30] sm:$0xff]  ;;  %v196_v12 = vld [vmem:[%s894_s6 + $0x48] sm:$0xff]  ;;  %280 = vperm.xlu1 %764, %v252_v44   ;;  %270 = vperm.xlu0 %763, %v250_v47  }
  0x32   : > { %400 = vmatprep.subr.bf16.mxu0 %v220_v4  ;;  %723 = vmatprep.subr.bf16.mxu1 %v220_v4  ;;  %v198_v13 = vld [vmem:[%s894_s6 + $0x58] sm:$0xff]  ;;  %v221_v14 = vpack.c.bf16 %v193_v11, %v191_v10  ;;  %v195_v16 = vld [vmem:[%s894_s6 + $0x40] sm:$0xff]  ;;  %v197_v17 = vld [vmem:[%s894_s6 + $0x50] sm:$0xff] }
  0x33   : > { %401 = vmatpush1.bf16.msra.mxu0 %v219_v8  ;;  %731 = vmatpush1.bf16.msra.mxu1 %v219_v8  ;;  %v224_v15 = vpack.c.bf16 %v198_v13, %v196_v12  ;;  %v200_v18 = vld [vmem:[%s894_s6 + $0x68] sm:$0xff]  ;;  %v202_v19 = vld [vmem:[%s894_s6 + $0x78] sm:$0xff]  ;;  %v223_v20 = vpack.c.bf16 %v197_v17, %v195_v16  ;;  %v199_v22 = vld [vmem:[%s894_s6 + $0x60] sm:$0xff] }
  0x34   : > { %402 = vmatprep.subr.bf16.mxu0 %v222_v9  ;;  %724 = vmatprep.subr.bf16.mxu1 %v222_v9  ;;  %v226_v21 = vpack.c.bf16 %v202_v19, %v200_v18  ;;  %v201_v23 = vld [vmem:[%s894_s6 + $0x70] sm:$0xff]  ;;  %v204_v24 = vld [vmem:[%s894_s6 + $0x88] sm:$0xff]  ;;  %v206_v25 = vld [vmem:[%s894_s6 + $0x98] sm:$0xff] }
  0x35   : > { %v203_v26 = vld [vmem:[%s894_s6 + $0x80] sm:$0xff]  ;;  %v225_v27 = vpack.c.bf16 %v201_v23, %v199_v22  ;;  %v205_v28 = vld [vmem:[%s894_s6 + $0x90] sm:$0xff]  ;;  %v228_v29 = vpack.c.bf16 %v206_v25, %v204_v24  ;;  %v208_v30 = vld [vmem:[%s894_s6 + $0xa8] sm:$0xff]  ;;  %290 = vperm.xlu1 %764, %v254_v54   ;;  %285 = vperm.xlu0 %763, %v253_v57  }
  0x36   : > { %v210_v31 = vld [vmem:[%s894_s6 + $0xb8] sm:$0xff]  ;;  %v207_v32 = vld [vmem:[%s894_s6 + $0xa0] sm:$0xff]  ;;  %v209_v33 = vld [vmem:[%s894_s6 + $0xb0] sm:$0xff]  ;;  %v227_v34 = vpack.c.bf16 %v205_v28, %v203_v26 }
  0x37   : > { %403 = vmatpush1.bf16.msra.mxu0 %v221_v14  ;;  %732 = vmatpush1.bf16.msra.mxu1 %v221_v14  ;;  %v212_v35 = vld [vmem:[%s894_s6 + $0xc8] sm:$0xff]  ;;  %v230_v36 = vpack.c.bf16 %v210_v31, %v208_v30  ;;  %v214_v37 = vld [vmem:[%s894_s6 + $0xd8] sm:$0xff]  ;;  %v229_v45 = vpack.c.bf16 %v209_v33, %v207_v32  ;;  %v211_v46 = vld [vmem:[%s894_s6 + $0xc0] sm:$0xff] }
  0x38   : > { %404 = vmatprep.subr.bf16.mxu0 %v224_v15  ;;  %725 = vmatprep.subr.bf16.mxu1 %v224_v15  ;;  %v216_v39 = vld [vmem:[%s894_s6 + $0xe8] sm:$0xff]  ;;  %v218_v40 = vld [vmem:[%s894_s6 + $0xf8] sm:$0x1f]  ;;  %v232_v48 = vpack.c.bf16 %v214_v37, %v212_v35  ;;  %v213_v49 = vld [vmem:[%s894_s6 + $0xd0] sm:$0xff] }
  0x39   : > { %v234_v50 = vpack.c.bf16 %v218_v40, %v216_v39  ;;  %v215_v51 = vld [vmem:[%s894_s6 + $0xe0] sm:$0xff]  ;;  %v217_v52 = vld [vmem:[%s894_s6 + $0xf0] sm:$0x1f]  ;;  %v231_v55 = vpack.c.bf16 %v213_v49, %v211_v46  ;;  %300 = vperm.xlu1 %764, %v256_v59   ;;  %295 = vperm.xlu0 %763, %v255_v61   ;;  %v258_v1 = vld [vmem:[%s1025_s2 + $0x48] sm:$0xff] }
  0x3a   : > { %v233_v56 = vpack.c.bf16 %v217_v52, %v215_v51  ;;  %v257_v2 = vld [vmem:[%s1025_s2 + $0x40] sm:$0xff]  ;;  %v260_v3 = vld [vmem:[%s1025_s2 + $0x58] sm:$0xff]  ;;  %v259_v4 = vld [vmem:[%s1025_s2 + $0x50] sm:$0xff] }
  0x3b   : > { %405 = vmatpush1.bf16.msra.mxu0 %v223_v20  ;;  %733 = vmatpush1.bf16.msra.mxu1 %v223_v20  ;;  %v398_v58 = vand.u32 %v393_v53, %v234_v50  ;;  %v767_v5 = vld [vmem:[#allocation2 + $0x8] sm:$0xff]   ;;  %v261_v8 = vld [vmem:[%s1025_s2 + $0x60] sm:$0xff]  ;;  %v769_v9 = vld [vmem:[#allocation2 + $0x10] sm:$0xff]  }
  0x3c   : > { %406 = vmatprep.subr.bf16.mxu0 %v226_v21  ;;  %726 = vmatprep.subr.bf16.mxu1 %v226_v21  ;;  %v395_v60 = vand.u32 %v393_v53, %v233_v56  ;;  %v768_v6 = vld [vmem:[#allocation2 + $0x28] sm:$0xff]   ;;  %v770_v10 = vld [vmem:[#allocation2 + $0x30] sm:$0x3f]   ;;  %v771_v11 = vld [vmem:[#allocation2 + $0x18] sm:$0xff]  }
  0x3d   : > { %310 = vperm.xlu1 %764, %v258_v1   ;;  %305 = vperm.xlu0 %763, %v257_v2   ;;  %v262_v7 = vld [vmem:[%s1025_s2 + $0x68] sm:$0xf] }
  0x3f   : > { %407 = vmatpush1.bf16.msra.mxu0 %v225_v27  ;;  %734 = vmatpush1.bf16.msra.mxu1 %v225_v27 }
  0x40   : > { %408 = vmatprep.subr.bf16.mxu0 %v228_v29  ;;  %727 = vmatprep.subr.bf16.mxu1 %v228_v29 }
  0x41   : > { %320 = vperm.xlu1 %764, %v260_v3   ;;  %315 = vperm.xlu0 %763, %v259_v4  }
  0x43   : > { %409 = vmatpush1.bf16.msra.mxu0 %v227_v34  ;;  %735 = vmatpush1.bf16.msra.mxu1 %v227_v34 }
  0x44   : > { %410 = vmatprep.subr.bf16.mxu0 %v230_v36  ;;  %728 = vmatprep.subr.bf16.mxu1 %v230_v36 }
  0x45   : > { %330 = vperm.xlu1 %764, %v262_v7   ;;  %325 = vperm.xlu0 %763, %v261_v8  }
  0x47   : > { %411 = vmatpush1.bf16.msra.mxu0 %v229_v45  ;;  %736 = vmatpush1.bf16.msra.mxu1 %v229_v45 }
  0x48   : > { %412 = vmatprep.subr.bf16.mxu0 %v232_v48  ;;  %729 = vmatprep.subr.bf16.mxu1 %v232_v48 }
  0x4b   : > { %413 = vmatpush1.bf16.msra.mxu0 %v231_v55  ;;  %737 = vmatpush1.bf16.msra.mxu1 %v231_v55 }
  0x4c   : > { %414 = vmatprep.subr.bf16.mxu0 %v398_v58  ;;  %730 = vmatprep.subr.bf16.mxu1 %v398_v58 }
  0x4f   : > { %415 = vmatpush1.bf16.msra.mxu0 %v395_v60  ;;  %738 = vmatpush1.bf16.msra.mxu1 %v395_v60 }
  0x52   : > { %685 = vmatmul.mubr.msk.bf16.vlgmr.msra.gmra.mrb[0].mxu0 %vm368_vm2, %v765_v62  ;;  %689 = vmatmul.mubr.msk.bf16.vlgmr.msra.gmra.mrb[0].mxu1 %vm368_vm2, %v766_v63 }
  0x53   : > { %442 = vmatprep.mubr.bf16.mxu0 %v815_v0  ;;  %482 = vmatprep.mubr.bf16.mxu1 %v815_v0 }
  0x5a   : > { %686 = vmatmul.mubr.msk.bf16.gmra.mrb[4].mxu0 %vm368_vm2, %v767_v5  ;;  %690 = vmatmul.mubr.msk.bf16.gmra.mrb[4].mxu1 %vm368_vm2, %v768_v6 }
  0x5b   : > { %452 = vmatprep.mubr.bf16.mxu0 %v815_v0  ;;  %492 = vmatprep.mubr.bf16.mxu1 %v815_v0 }
  0x62   : > { %687 = vmatmul.mubr.msk.bf16.gmra.mrb[8].mxu0 %vm368_vm2, %v769_v9  ;;  %691 = vmatmul.mubr.msk.bf16.gmra.mrb[8].mxu1 %vm368_vm2, %v770_v10 }
  0x63   : > { %462 = vmatprep.mubr.bf16.mxu0 %v815_v0 }
  0x6a   : > { %688 = vmatmul.mubr.msk.bf16.gmra.mrb[12].mxu0 %vm368_vm2, %v771_v11 }
  0xac   : > { %v276_v12 = vpop.permute.xlu1 %275  ;;  %v266_v13 = vpop.permute.xlu0 %265 }
  0xb0   : > { %v281_v14 = vpop.permute.xlu1 %280  ;;  %v271_v15 = vpop.permute.xlu0 %270 }
  0xb4   : > { %v984_v16 = vpop.permute.xlu1 %290  ;;  %v986_v17 = vpop.permute.xlu0 %285 }
  0xb8   : > { %v988_v18 = vpop.permute.xlu1 %300  ;;  %v990_v19 = vpop.permute.xlu0 %295 }
  0xbc   : > { %v311_v20 = vpop.permute.xlu1 %310  ;;  %v306_v21 = vpop.permute.xlu0 %305 }
  0xc0   : > { %v321_v41 = vpop.permute.xlu1 %320  ;;  %v316_v42 = vpop.permute.xlu0 %315 }
  0xc4   : > { %v331_v63 = vpop.permute.xlu1 %330  ;;  %v326_v1 = vpop.permute.xlu0 %325 }
 0x125   : > { %v434_v22 = vpop.f32.mrb[0].mxu0  ;;  %v474_v0 = vpop.f32.mrb[0].mxu1 }
 0x126   : > { %v435_v23 = vadd.f32 %v434_v22, %v266_v13  ;;  %v475_v24 = vadd.f32 %v474_v0, %v306_v21  ;;  %v436_v25 = vpop.f32.mrb[1].mxu0  ;;  %v476_v26 = vpop.f32.mrb[1].mxu1 }
 0x127   : > { %v437_v27 = vadd.f32 %v436_v25, %v266_v13  ;;  %v477_v28 = vadd.f32 %v476_v26, %v306_v21  ;;  %v438_v29 = vpop.f32.mrb[2].mxu0  ;;  %v478_v30 = vpop.f32.mrb[2].mxu1 }
 0x128   : > { %v439_v31 = vadd.f32 %v438_v29, %v271_v15  ;;  %v479_v32 = vadd.f32 %v478_v30, %v311_v20  ;;  %v440_v33 = vpop.f32.mrb[3].mxu0  ;;  %v480_v34 = vpop.f32.mrb[3].mxu1 }
 0x129   : > { %v709_v35 = vpack.c.bf16 %v437_v27, %v435_v23  ;;  %v717_v36 = vpack.c.bf16 %v477_v28, %v475_v24  ;;  %v441_v37 = vadd.f32 %v440_v33, %v271_v15  ;;  %v481_v38 = vadd.f32 %v480_v34, %v311_v20 }
 0x12b   : > { %587 = vst [vmem:[%s996_s15] sm:$0xff] %v709_v35  ;;  %595 = vst [vmem:[%s996_s15 + $0x40] sm:$0xff] %v717_v36  ;;  %v710_v39 = vpack.c.bf16 %v441_v37, %v439_v31  ;;  %v718_v40 = vpack.c.bf16 %v481_v38, %v479_v32 }
 0x12d   : > { %588 = vst [vmem:[%s996_s15 + $0x8] sm:$0xff] %v710_v39  ;;  %596 = vst [vmem:[%s996_s15 + $0x48] sm:$0xff] %v718_v40  ;;  %v444_v43 = vpop.f32.mrb[4].mxu0  ;;  %v484_v44 = vpop.f32.mrb[4].mxu1 }
 0x12e   : > { %v445_v45 = vadd.f32 %v444_v43, %v276_v12  ;;  %v485_v46 = vadd.f32 %v484_v44, %v316_v42  ;;  %v446_v47 = vpop.f32.mrb[5].mxu0  ;;  %v486_v48 = vpop.f32.mrb[5].mxu1 }
 0x12f   : > { %v447_v49 = vadd.f32 %v446_v47, %v276_v12  ;;  %v487_v50 = vadd.f32 %v486_v48, %v316_v42  ;;  %v448_v51 = vpop.f32.mrb[6].mxu0  ;;  %v488_v52 = vpop.f32.mrb[6].mxu1 }
 0x130   : > { %v449_v53 = vadd.f32 %v448_v51, %v281_v14  ;;  %v489_v54 = vadd.f32 %v488_v52, %v321_v41  ;;  %v450_v55 = vpop.f32.mrb[7].mxu0  ;;  %v490_v56 = vpop.f32.mrb[7].mxu1 }
 0x131   : > { %v711_v57 = vpack.c.bf16 %v447_v49, %v445_v45  ;;  %v719_v58 = vpack.c.bf16 %v487_v50, %v485_v46  ;;  %v451_v59 = vadd.f32 %v450_v55, %v281_v14  ;;  %v491_v60 = vadd.f32 %v490_v56, %v321_v41 }
 0x133   : > { %589 = vst [vmem:[%s996_s15 + $0x10] sm:$0xff] %v711_v57  ;;  %597 = vst [vmem:[%s996_s15 + $0x50] sm:$0xff] %v719_v58  ;;  %v712_v61 = vpack.c.bf16 %v451_v59, %v449_v53  ;;  %v720_v62 = vpack.c.bf16 %v491_v60, %v489_v54 }
 0x135   : > { %590 = vst [vmem:[%s996_s15 + $0x18] sm:$0xff] %v712_v61  ;;  %598 = vst [vmem:[%s996_s15 + $0x58] sm:$0xff] %v720_v62  ;;  %v454_v2 = vpop.f32.mrb[8].mxu0  ;;  %v494_v3 = vpop.f32.mrb[8].mxu1 }
 0x136   : > { %v455_v4 = vadd.f32 %v454_v2, %v986_v17  ;;  %v495_v5 = vadd.f32 %v494_v3, %v326_v1  ;;  %v456_v6 = vpop.f32.mrb[9].mxu0  ;;  %v496_v7 = vpop.f32.mrb[9].mxu1 }
 0x137   : > { %v457_v8 = vadd.f32 %v456_v6, %v986_v17  ;;  %v497_v9 = vadd.f32 %v496_v7, %v326_v1  ;;  %v458_v10 = vpop.f32.mrb[10].mxu0  ;;  %v498_v11 = vpop.f32.mrb[10].mxu1 }
 0x138   : > { %v459_v12 = vadd.f32 %v458_v10, %v984_v16  ;;  %v499_v13 = vadd.f32 %v498_v11, %v331_v63  ;;  %v460_v14 = vpop.f32.mrb[11].mxu0  ;;  %v500_v15 = vpop.f32.mrb[11].mxu1 }
 0x139   : > { %v713_v20 = vpack.c.bf16 %v457_v8, %v455_v4  ;;  %v721_v21 = vpack.c.bf16 %v497_v9, %v495_v5  ;;  %v461_v22 = vadd.f32 %v460_v14, %v984_v16  ;;  %v501_v0 = vadd.f32 %v500_v15, %v331_v63 }
 0x13b   : > { %591 = vst [vmem:[%s996_s15 + $0x20] sm:$0xff] %v713_v20  ;;  %599 = vst [vmem:[%s996_s15 + $0x60] sm:$0xff] %v721_v21  ;;  %v714_v17 = vpack.c.bf16 %v461_v22, %v459_v12  ;;  %v722_v23 = vpack.c.bf16 %v501_v0, %v499_v13 }
 0x13d   : > { %592 = vst [vmem:[%s996_s15 + $0x28] sm:$0xff] %v714_v17  ;;  %600 = vst [vmem:[%s996_s15 + $0x68] sm:$0x33] %v722_v23  ;;  %v464_v24 = vpop.f32.mrb[12].mxu0 }
 0x13e   : > { %v465_v25 = vadd.f32 %v464_v24, %v990_v19  ;;  %v466_v26 = vpop.f32.mrb[13].mxu0 }
 0x13f   : > { %v467_v27 = vadd.f32 %v466_v26, %v990_v19  ;;  %v468_v28 = vpop.f32.mrb[14].mxu0 }
 0x140   : > { %v469_v29 = vadd.f32 %v468_v28, %v988_v18  ;;  %v470_v30 = vpop.f32.mrb[15].mxu0 }
 0x141   : > { %v715_v16 = vpack.c.bf16 %v467_v27, %v465_v25  ;;  %v471_v31 = vadd.f32 %v470_v30, %v988_v18 }
 0x143   : > { %593 = vst [vmem:[%s996_s15 + $0x30] sm:$0xff] %v715_v16  ;;  %v716_v32 = vpack.c.bf16 %v471_v31, %v469_v29 }
 0x145   : > { %594 = vst [vmem:[%s996_s15 + $0x38] sm:$0xff] %v716_v32 }
 0x146 PF: > { %s14_s12 = sadd.s32 1, %s810_s12  }
 0x147   : > { %p11_p3 = scmp.ge.s32.totalorder %s14_s12, 4  }
 0x149   :  { %13 = sbr.rel (!%p11_p3) target bundleno = 1 (0x1), region = 67 }
 0x150   :  { %622 = vsyncpa [#allocation3], 1 }
 0x151   :  { %624 = vsyncpa [#allocation3 + $0x1], 1 }

// kernel: spatial_concatenation_forward.3
= control target key start
LH: loop header
LB: loop body
LE: loop exit
PB: predicated region body
PF: predicated region fallthrough
CT: control target
= control target key end

     0   :  { %8 = vsyncpa [#allocation3], 0  ;;  %s5852_s0 = inlined_call_operand.vmem [shape: bf16[2,3,96,96], index: 0, kind: input, shape index: {}]   ;;  %s5853_s1 = inlined_call_operand.vmem [shape: bf16[384,96], index: 1, kind: input, shape index: {}]   ;;  %s5854_s2 = inlined_call_operand.vmem [shape: bf16[96,384], index: 2, kind: input, shape index: {}]   ;;  %s5855_s3 = inlined_call_operand.hbm [shape: f32[2,3,384,384], index: 3, kind: output, shape index: {}]  }
   0x1   :  { %10 = vsyncpa [#allocation3 + $0x1], 0  ;;  %s4484_s12 = smov 0   ;;  %s4486_s13 = smov 0  }
   0x2   :  { %s4488_s14 = smov 0   ;;  %s4490_s15 = smov 0  }
   0x3 LB: > { %s4505_s16 = sadd.s32 4294967295, %s4458_s15   ;;  %s3293_s17 = sadd.s32 4294967294, %s4458_s15   ;;  %s4458_s15 = sphi %s4490_s15, %s5861_s15   ;;  %s4454_s14 = sphi %s4488_s14, %s5860_s14   ;;  %s4450_s13 = sphi %s4486_s13, %s5859_s13   ;;  %s4446_s12 = sphi %s4484_s12, %s5858_s12  }
   0x4   : > { %s4509_s18 = sadd.s32 1, %s4458_s15   ;;  %s91_s19 = sadd.s32 1, %s4454_s14 }
   0x5   : > { %s88_s20 = ssub.s32 %s4458_s15, %s4509_s18  ;;  %p101_p0 = scmp.ne.s32.totalorder %s4454_s14, %s4450_s13 }
   0x6   : > { %p89_p1 = scmp.eq.s32.totalorder %s88_s20, 0  ;;  %p102_p2 = scmp.eq.s32.totalorder %s4505_s16, 1 }
   0x7   : > { %p107_p3 = scmp.ne.s32.totalorder %s4450_s13, %s4446_s12  ;;  %p108_p4 = scmp.eq.s32.totalorder %s3293_s17, 1 }
   0x8   : > { %s4520_s21 = scalar_select %p89_p1, %s4454_s14, %s91_s19  }
   0x9   : > { %p4522_p5 = por %p102_p2, %p101_p0  ;;  %p4526_p6 = por %p108_p4, %p107_p3 }
   0xa   : > { %p3296_p7 = scmp.ge.s32.totalorder %s4458_s15, 1  ;;  %p140_p8 = scmp.lt.s32.totalorder %s4458_s15, 3 }
   0xc   : > { %p141_p9 = pnand %p3296_p7, %p140_p8 }
   0xd   : > { %v4535_v0 = vld [vmem:[%s5854_s2 + $0x4] ss:$12 sps:$4 sm:$0xff] (!%p141_p9)   ;;  %p164_p10 = scmp.lt.s32.totalorder (!%p141_p9), %s4505_s16, 1  ;;  %v4541_v1 = vld [vmem:[%s5854_s2] ss:$12 sps:$4 sm:$0xff] (!%p141_p9)   ;;  %v4460_v2 = vmov (!%p141_p9), 0  }
   0xe   : > { %144 = sbr.rel (%p141_p9) target bundleno = 1487 (0x5cf), region = 32  ;;  %431 = vmatprep.mubr.bf16.mxu0 (!%p141_p9), %v4460_v2  ;;  %399 = vmatprep.subr.bf16.mxu0 (!%p141_p9), %v4535_v0  ;;  %v4548_v3 = vld [vmem:[%s5854_s2 + $0x1c] ss:$12 sps:$4 sm:$0xff] (!%p141_p9)   ;;  %v4555_v4 = vld [vmem:[%s5854_s2 + $0x18] ss:$12 sps:$4 sm:$0xff] (!%p141_p9)   ;;  %vm380_vm0 = vcmask (!%p141_p9), 785408  }
   0xf   : > { %400 = vmatpush1.bf16.msra.mxu0 (!%p141_p9), %v4541_v1  ;;  %v4561_v5 = vld [vmem:[%s5854_s2 + $0x34] ss:$12 sps:$4 sm:$0xff] (!%p141_p9)   ;;  %v4572_v6 = vld [vmem:[%s5854_s2 + $0x30] ss:$12 sps:$4 sm:$0xff] (!%p141_p9)   ;;  %v4577_v7 = vld [vmem:[%s5854_s2 + $0x4c] ss:$12 sps:$4 sm:$0xff] (!%p141_p9)  }
  0x10   : > { %401 = vmatprep.subr.bf16.mxu0 (!%p141_p9), %v4548_v3  ;;  %v4584_v9 = vld [vmem:[%s5854_s2 + $0x48] ss:$12 sps:$4 sm:$0xff] (!%p141_p9)   ;;  %v4597_v11 = vld [vmem:[%s5854_s2 + $0x64] ss:$12 sps:$4 sm:$0xff] (!%p141_p9)   ;;  %v4603_v12 = vld [vmem:[%s5854_s2 + $0x20] ss:$12 sps:$4 sm:$0xff] (!%p141_p9)  }
  0x11   : > { %v4591_v10 = vld [vmem:[%s5854_s2 + $0x8] ss:$12 sps:$4 sm:$0xff] (!%p141_p9)   ;;  %v4608_v13 = vld [vmem:[%s5854_s2 + $0x60] ss:$12 sps:$4 sm:$0xff] (!%p141_p9)   ;;  %v4616_v14 = vld [vmem:[%s5854_s2 + $0x38] ss:$12 sps:$4 sm:$0xff] (!%p141_p9)  }
  0x12   : > { %3979 = vmatprep.subr.bf16.mxu1 (!%p141_p9), %v4591_v10  ;;  %v4622_v15 = vld [vmem:[%s5854_s2 + $0x7c] ss:$12 sps:$4 sm:$0xff] (!%p141_p9)   ;;  %v4627_v16 = vld [vmem:[%s5854_s2 + $0x78] ss:$12 sps:$4 sm:$0xff] (!%p141_p9)   ;;  %v4649_v19 = vld [vmem:[%s5854_s2 + $0x80] ss:$12 sps:$4 sm:$0xff] (!%p141_p9)  }
  0x13   : > { %402 = vmatpush1.bf16.msra.mxu0 (!%p141_p9), %v4555_v4  ;;  %3980 = vmatpush3.bf16.msra.mxu1 (!%p141_p9), %v4591_v10  ;;  %v4635_v17 = vld [vmem:[%s5854_s2 + $0x50] ss:$12 sps:$4 sm:$0xff] (!%p141_p9)   ;;  %v4641_v18 = vld [vmem:[%s5854_s2 + $0x68] ss:$12 sps:$4 sm:$0xff] (!%p141_p9)   ;;  %s161_s27 = sand.u32 (!%p141_p9), 1, %s4450_s13   ;;  %s4245_s10 = smul.u32 (!%p141_p9), 55296, %s4505_s16 }
  0x14   : > { %403 = vmatprep.subr.bf16.mxu0 (!%p141_p9), %v4561_v5  ;;  %3981 = vmatprep.subr.bf16.mxu1 (!%p141_p9), %v4603_v12  ;;  %s4243_s28 = smul.u32 (!%p141_p9), 3456, %s161_s27  ;;  %s4461_s25 = smov (!%p141_p9), [#allocation2]  }
  0x15   : > { %s165_s30 = scalar_select %p164_p10, %s4505_s16, 1 }
  0x16   : > { %s4975_s29 = scalar_lea.vmem [#allocation2], %s4243_s28  ;;  %s5802_s20 = scalar_lea.hbm %s5855_s3, %s4245_s10 }
  0x17   : > { %s4244_s8 = smul.u32 144, %s165_s30  ;;  %404 = vmatpush1.bf16.msra.mxu0 %v4572_v6  ;;  %3982 = vmatpush3.bf16.msra.mxu1 %v4603_v12  ;;  %s3231_s17 = sshll.u32 %s4975_s29, 4  ;;  %s5804_s17 = int_to_ptr.vmem [resolvable:$true] %s3231_s17 }
  0x18   : > { %405 = vmatprep.subr.bf16.mxu0 %v4577_v7  ;;  %3983 = vmatprep.subr.bf16.mxu1 %v4616_v14  ;;  %s5811_s16 = scalar_lea.sflag [#allocation3], %s161_s27  ;;  %s4396_s24 = scalar_lea.vmem %s5804_s17, 55296 }
  0x19   : > { %s4566_s11 = scalar_lea.vmem %s5852_s0, %s4244_s8  ;;  %p4397_p11 = scmp.ne.s32.totalorder %s5804_s17, %s4396_s24 }
  0x1a   : > { %v4306_v8 = vld [vmem:[%s4566_s11] sm:$0xff]   ;;  %v4307_v20 = vld [vmem:[%s4566_s11 + $0x8] sm:$0xff]   ;;  %v4308_v21 = vld [vmem:[%s4566_s11 + $0x10] sm:$0xff]   ;;  %s4400_s26 = sshll.u32 %s4461_s25, 4  ;;  %s4401_s26 = int_to_ptr.vmem [resolvable:$false] %s4400_s26 }
  0x1b   : > { %3991 = vmatprep.mubr.msk.bf16.mxu1 %vm380_vm0, %v4306_v8  ;;  %406 = vmatpush1.bf16.msra.mxu0 %v4584_v9  ;;  %v4310_v22 = vld [vmem:[%s4566_s11 + $0x18] sm:$0xff]   ;;  %v4313_v23 = vld [vmem:[%s4566_s11 + $0x20] sm:$0xff]   ;;  %v4316_v24 = vld [vmem:[%s4566_s11 + $0x28] sm:$0xff]   ;;  %p4398_p12 = pnand %p4397_p11, %p4522_p5  ;;  %s4402_s28 = scalar_lea.vmem %s4401_s26, 110592 }
  0x1c   : > { %407 = vmatprep.subr.bf16.mxu0 %v4597_v11  ;;  %3984 = vmatpush3.bf16.msra.mxu1 %v4616_v14  ;;  %p4403_p0 = scmp.lt.s32.totalorder %s5804_s17, %s4401_s26  ;;  %p4404_p1 = scmp.lt.s32.totalorder %s4402_s28, %s4396_s24 }
  0x1d   : > { %3985 = vmatprep.subr.bf16.mxu1 %v4635_v17  ;;  %p4399_p13 = pneg %p4398_p12 }
  0x1e   : > { %p4405_p2 = por %p4404_p1, %p4403_p0 }
  0x1f   : > { %408 = vmatpush1.bf16.msra.mxu0 %v4608_v13 }
  0x20   : > { %409 = vmatprep.subr.bf16.mxu0 %v4622_v15  ;;  %3986 = vmatpush3.bf16.msra.mxu1 %v4635_v17  ;;  %p4406_p3 = pnand %p4405_p2, %p4399_p13 }
  0x21   : > { %3987 = vmatprep.subr.bf16.mxu1 %v4641_v18 }
  0x23   : > { %410 = vmatpush1.bf16.msra.mxu0 %v4627_v16 }
  0x24   : > { %3988 = vmatpush3.bf16.msra.mxu1 %v4641_v18 }
  0x25   : > { %3989 = vmatprep.subr.bf16.mxu1 %v4649_v19 }
  0x26   : > { %3322 = vmatmul.mubr.msk.bf16.vlgmr.msra.gmra.mrb[0].mxu0 %vm380_vm0, %v4306_v8 }
  0x27   : > { %441 = vmatprep.mubr.bf16.mxu0 %v4460_v2 }
  0x28   : > { %3990 = vmatpush3.bf16.msra.mxu1 %v4649_v19 }
  0x2b   : > { %3992 = vmatmul.mubr.msk.bf16.vlgmr.msra.gmra.mrb[0].mxu1 %vm380_vm0, %v4307_v20 }
  0x2c   : > { %3995 = vmatprep.mubr.msk.bf16.mxu1 %vm380_vm0, %v4308_v21 }
  0x2e   : > { %3323 = vmatmul.mubr.msk.bf16.gmra.mrb[4].mxu0 %vm380_vm0, %v4307_v20 }
  0x2f   : > { %451 = vmatprep.mubr.bf16.mxu0 %v4460_v2 }
  0x33   : > { %3996 = vmatmul.mubr.msk.bf16.gmra.mrb[4].mxu1 %vm380_vm0, %v4310_v22 }
  0x34   : > { %3999 = vmatprep.mubr.msk.bf16.mxu1 %vm380_vm0, %v4313_v23 }
  0x36   : > { %3324 = vmatmul.mubr.msk.bf16.gmra.mrb[8].mxu0 %vm380_vm0, %v4308_v21 }
  0x37   : > { %461 = vmatprep.mubr.bf16.mxu0 %v4460_v2 }
  0x3b   : > { %4000 = vmatmul.mubr.msk.bf16.gmra.mrb[8].mxu1 %vm380_vm0, %v4316_v24 }
  0x3c   : > { %855 = vmatprep.mubr.bf16.mxu1 %v4460_v2 }
  0x3e   : > { %3325 = vmatmul.mubr.msk.bf16.gmra.mrb[12].mxu0 %vm380_vm0, %v4310_v22 }
  0x3f   : > { %471 = vmatprep.mubr.bf16.mxu0 %v4460_v2 }
  0x46   : > { %3326 = vmatmul.mubr.msk.bf16.gmra.mrb[16].mxu0 %vm380_vm0, %v4313_v23 }
  0x47   : > { %481 = vmatprep.mubr.bf16.mxu0 %v4460_v2 }
  0x4e   : > { %3327 = vmatmul.mubr.msk.bf16.gmra.mrb[20].mxu0 %vm380_vm0, %v4316_v24 }
  0x4f   : > { %815 = vmatprep.mubr.bf16.mxu0 %v4460_v2 }
  0xf9   : > { %v433_v25 = vpop.f32.mrb[0].mxu0 }
  0xfa   : > { %v435_v26 = vpop.f32.mrb[1].mxu0 }
  0xfb   : > { %v437_v27 = vpop.f32.mrb[2].mxu0 }
  0xfc   : > { %v573_v28 = vpack.c.bf16 %v437_v27, %v433_v25  ;;  %v439_v29 = vpop.f32.mrb[3].mxu0 }
  0xfd   : > { %v574_v30 = vpack.c.bf16 %v439_v29, %v435_v26 }
  0xfe   : > { %v3993_v36 = vpop.f32.mrb[0].mxu1 }
  0xff   : > { %783 = vmatprep.subr.bf16.mxu0 %v574_v30  ;;  %4231 = vmatprep.subr.bf16.mxu1 %v574_v30  ;;  %v526_v38 = vpop.f32.mrb[1].mxu1 }
 0x100   : > { %784 = vmatpush1.bf16.msra.mxu0 %v573_v28  ;;  %4237 = vmatpush1.bf16.msra.mxu1 %v573_v28  ;;  %v3994_v39 = vpop.f32.mrb[2].mxu1 }
 0x101   : > { %v443_v31 = vpop.f32.mrb[4].mxu0  ;;  %v4679_v40 = vpack.c.bf16 %v3994_v39, %v3993_v36  ;;  %v529_v41 = vpop.f32.mrb[3].mxu1  ;;  %v4701_v36 = vld [vmem:[%s5853_s1 + $0x8] sm:$0xff]   ;;  %v4723_v39 = vld [vmem:[%s5853_s1 + $0x30] sm:$0xff]  }
 0x102   : > { %v445_v32 = vpop.f32.mrb[5].mxu0  ;;  %v575_v42 = vpack.c.bf16 %v529_v41, %v526_v38  ;;  %v4718_v38 = vld [vmem:[%s5853_s1 + $0x10] sm:$0xff]   ;;  %v4739_v41 = vld [vmem:[%s5853_s1 + $0x38] sm:$0xff]  }
 0x103   : > { %v447_v33 = vpop.f32.mrb[6].mxu0 }
 0x104   : > { %v576_v34 = vpack.c.bf16 %v447_v33, %v443_v31  ;;  %v449_v35 = vpop.f32.mrb[7].mxu0 }
 0x105   : > { %v577_v37 = vpack.c.bf16 %v449_v35, %v445_v32  ;;  %v4689_v35 = vld [vmem:[%s5853_s1 + $0x20] sm:$0xff]  }
 0x106   : > { %v3997_v48 = vpop.f32.mrb[4].mxu1 }
 0x107   : > { %785 = vmatprep.subr.bf16.mxu0 %v577_v37  ;;  %4232 = vmatprep.subr.bf16.mxu1 %v577_v37  ;;  %v542_v50 = vpop.f32.mrb[5].mxu1  ;;  %v4707_v37 = vld [vmem:[%s5853_s1 + $0x28] sm:$0xff]  }
 0x108   : > { %786 = vmatpush1.bf16.msra.mxu0 %v576_v34  ;;  %4238 = vmatpush1.bf16.msra.mxu1 %v576_v34  ;;  %v3998_v51 = vpop.f32.mrb[6].mxu1  ;;  %v4684_v34 = vld [vmem:[%s5853_s1] sm:$0xff]  }
 0x109   : > { %v453_v43 = vpop.f32.mrb[8].mxu0  ;;  %v584_v52 = vpack.c.bf16 %v3998_v51, %v3997_v48  ;;  %v545_v53 = vpop.f32.mrb[7].mxu1 }
 0x10a   : > { %v455_v44 = vpop.f32.mrb[9].mxu0  ;;  %v581_v54 = vpack.c.bf16 %v545_v53, %v542_v50 }
 0x10b   : > { %v457_v45 = vpop.f32.mrb[10].mxu0 }
 0x10c   : > { %v579_v46 = vpack.c.bf16 %v457_v45, %v453_v43  ;;  %v459_v47 = vpop.f32.mrb[11].mxu0  ;;  %v4899_v43 = vld [vmem:[%s5853_s1 + $0xa8] sm:$0xff]   ;;  %v4916_v45 = vld [vmem:[%s5853_s1 + $0xb8] sm:$0xff]  }
 0x10d   : > { %v580_v49 = vpack.c.bf16 %v459_v47, %v455_v44  ;;  %v4904_v44 = vld [vmem:[%s5853_s1 + $0xb0] sm:$0xff]   ;;  %v4343_v47 = vld [vmem:[%s4566_s11 + $0x38] sm:$0xff]  }
 0x10e   : > { %v4001_v60 = vpop.f32.mrb[8].mxu1 }
 0x10f   : > { %787 = vmatprep.subr.bf16.mxu0 %v580_v49  ;;  %4233 = vmatprep.subr.bf16.mxu1 %v580_v49  ;;  %v558_v62 = vpop.f32.mrb[9].mxu1 }
 0x110   : > { %788 = vmatpush1.bf16.msra.mxu0 %v579_v46  ;;  %4239 = vmatpush1.bf16.msra.mxu1 %v579_v46  ;;  %v4002_v63 = vpop.f32.mrb[10].mxu1  ;;  %v4342_v46 = vld [vmem:[%s4566_s11 + $0x30] sm:$0xff]  }
 0x111   : > { %v463_v55 = vpop.f32.mrb[12].mxu0  ;;  %v590_v8 = vpack.c.bf16 %v4002_v63, %v4001_v60  ;;  %v561_v20 = vpop.f32.mrb[11].mxu1 }
 0x112   : > { %v465_v56 = vpop.f32.mrb[13].mxu0  ;;  %v587_v21 = vpack.c.bf16 %v561_v20, %v558_v62 }
 0x113   : > { %v467_v57 = vpop.f32.mrb[14].mxu0 }
 0x114   : > { %v582_v58 = vpack.c.bf16 %v467_v57, %v463_v55  ;;  %v469_v59 = vpop.f32.mrb[15].mxu0 }
 0x115   : > { %v583_v61 = vpack.c.bf16 %v469_v59, %v465_v56 }
 0x117   : > { %789 = vmatprep.subr.bf16.mxu0 %v583_v61  ;;  %4234 = vmatprep.subr.bf16.mxu1 %v583_v61 }
 0x118   : > { %790 = vmatpush1.bf16.msra.mxu0 %v582_v58  ;;  %4240 = vmatpush1.bf16.msra.mxu1 %v582_v58 }
 0x119   : > { %v473_v22 = vpop.f32.mrb[16].mxu0 }
 0x11a   : > { %v475_v23 = vpop.f32.mrb[17].mxu0 }
 0x11b   : > { %v477_v24 = vpop.f32.mrb[18].mxu0 }
 0x11c   : > { %v585_v25 = vpack.c.bf16 %v477_v24, %v473_v22  ;;  %v479_v26 = vpop.f32.mrb[19].mxu0 }
 0x11d   : > { %v586_v27 = vpack.c.bf16 %v479_v26, %v475_v23 }
 0x11f   : > { %791 = vmatprep.subr.bf16.mxu0 %v586_v27  ;;  %4235 = vmatprep.subr.bf16.mxu1 %v586_v27 }
 0x120   : > { %792 = vmatpush1.bf16.msra.mxu0 %v585_v25  ;;  %4241 = vmatpush1.bf16.msra.mxu1 %v585_v25 }
 0x121   : > { %v483_v28 = vpop.f32.mrb[20].mxu0 }
 0x122   : > { %v485_v29 = vpop.f32.mrb[21].mxu0 }
 0x123   : > { %v487_v30 = vpop.f32.mrb[22].mxu0 }
 0x124   : > { %v588_v31 = vpack.c.bf16 %v487_v30, %v483_v28  ;;  %v489_v32 = vpop.f32.mrb[23].mxu0 }
 0x125   : > { %v589_v33 = vpack.c.bf16 %v489_v32, %v485_v29 }
 0x127   : > { %793 = vmatprep.subr.bf16.mxu0 %v589_v33  ;;  %4236 = vmatprep.subr.bf16.mxu1 %v589_v33 }
 0x128   : > { %794 = vmatpush1.bf16.msra.mxu0 %v588_v31  ;;  %4242 = vmatpush1.bf16.msra.mxu1 %v588_v31 }
 0x129   : > { %4003 = vmatprep.subr.bf16.mxu0 %v575_v42 }
 0x12b   : > { %3358 = vmatmul.mubr.msk.bf16.vlgmr.msra.gmra.mrb[24].mxu0 %vm380_vm0, %v4684_v34  ;;  %3362 = vmatmul.mubr.msk.bf16.vlgmr.msra.gmra.mrb[12].mxu1 %vm380_vm0, %v4689_v35 }
 0x12c   : > { %4004 = vmatpush3.bf16.msra.mxu0 %v575_v42  ;;  %825 = vmatprep.mubr.bf16.mxu0 %v4460_v2  ;;  %v4752_v42 = vld [vmem:[%s5853_s1 + $0x40] sm:$0xff]  }
 0x12d   : > { %4005 = vmatprep.subr.bf16.mxu0 %v4679_v40  ;;  %865 = vmatprep.mubr.bf16.mxu1 %v4460_v2 }
 0x130   : > { %4006 = vmatpush3.bf16.msra.mxu0 %v4679_v40  ;;  %v4734_v40 = vld [vmem:[%s5853_s1 + $0x18] sm:$0xff]  }
 0x131   : > { %4007 = vmatprep.subr.bf16.mxu0 %v581_v54 }
 0x133   : > { %3359 = vmatmul.mubr.msk.bf16.gmra.mrb[28].mxu0 %vm380_vm0, %v4701_v36  ;;  %3363 = vmatmul.mubr.msk.bf16.gmra.mrb[16].mxu1 %vm380_vm0, %v4707_v37 }
 0x134   : > { %4008 = vmatpush3.bf16.msra.mxu0 %v581_v54  ;;  %835 = vmatprep.mubr.bf16.mxu0 %v4460_v2 }
 0x135   : > { %4009 = vmatprep.subr.bf16.mxu0 %v584_v52  ;;  %875 = vmatprep.mubr.bf16.mxu1 %v4460_v2 }
 0x138   : > { %4010 = vmatpush3.bf16.msra.mxu0 %v584_v52 }
 0x139   : > { %4011 = vmatprep.subr.bf16.mxu0 %v587_v21 }
 0x13b   : > { %3360 = vmatmul.mubr.msk.bf16.gmra.mrb[32].mxu0 %vm380_vm0, %v4718_v38  ;;  %3364 = vmatmul.mubr.msk.bf16.gmra.mrb[20].mxu1 %vm380_vm0, %v4723_v39 }
 0x13c   : > { %4012 = vmatpush3.bf16.msra.mxu0 %v587_v21  ;;  %845 = vmatprep.mubr.bf16.mxu0 %v4460_v2 }
 0x13d   : > { %4013 = vmatprep.subr.bf16.mxu0 %v590_v8  ;;  %885 = vmatprep.mubr.bf16.mxu1 %v4460_v2 }
 0x140   : > { %4014 = vmatpush3.bf16.msra.mxu0 %v590_v8 }
 0x141   : > { %1486 = vmatprep.subr.bf16.mxu0 %v4535_v0  ;;  %v4767_v0 = vld [vmem:[%s5853_s1 + $0x48] sm:$0xff]  }
 0x143   : > { %3361 = vmatmul.mubr.msk.bf16.gmra.mrb[36].mxu0 %vm380_vm0, %v4734_v40  ;;  %3365 = vmatmul.mubr.msk.bf16.gmra.mrb[24].mxu1 %vm380_vm0, %v4739_v41 }
 0x144   : > { %4015 = vmatprep.mubr.msk.bf16.mxu0 %vm380_vm0, %v4684_v34  ;;  %895 = vmatprep.mubr.bf16.mxu1 %v4460_v2 }
 0x14b   : > { %4016 = vmatmul.mubr.msk.bf16.vlgmr.msra.gmra.mrb[40].mxu0 %vm380_vm0, %v4701_v36  ;;  %3366 = vmatmul.mubr.msk.bf16.gmra.mrb[28].mxu1 %vm380_vm0, %v4752_v42 }
 0x14c   : > { %4019 = vmatprep.mubr.msk.bf16.mxu0 %vm380_vm0, %v4718_v38  ;;  %1487 = vmatpush1.bf16.msra.mxu0 %v4541_v1  ;;  %v4783_v1 = vld [vmem:[%s5853_s1 + $0x50] sm:$0xff]  }
 0x14d   : > { %1488 = vmatprep.subr.bf16.mxu0 %v4548_v3  ;;  %905 = vmatprep.mubr.bf16.mxu1 %v4460_v2  ;;  %v4799_v3 = vld [vmem:[%s5853_s1 + $0x58] sm:$0xff]  }
 0x150   : > { %1489 = vmatpush1.bf16.msra.mxu0 %v4555_v4  ;;  %v4812_v4 = vld [vmem:[%s5853_s1 + $0x60] sm:$0xff]  }
 0x151   : > { %1490 = vmatprep.subr.bf16.mxu0 %v4561_v5  ;;  %v4824_v5 = vld [vmem:[%s5853_s1 + $0x68] sm:$0xff]  }
 0x153   : > { %4020 = vmatmul.mubr.msk.bf16.gmra.mrb[44].mxu0 %vm380_vm0, %v4734_v40  ;;  %3367 = vmatmul.mubr.msk.bf16.gmra.mrb[32].mxu1 %vm380_vm0, %v4767_v0 }
 0x154   : > { %4023 = vmatprep.mubr.msk.bf16.mxu0 %vm380_vm0, %v4689_v35  ;;  %1491 = vmatpush1.bf16.msra.mxu0 %v4572_v6  ;;  %v4836_v6 = vld [vmem:[%s5853_s1 + $0x70] sm:$0xff]  }
 0x155   : > { %1492 = vmatprep.subr.bf16.mxu0 %v4577_v7  ;;  %915 = vmatprep.mubr.bf16.mxu1 %v4460_v2  ;;  %v4848_v7 = vld [vmem:[%s5853_s1 + $0x78] sm:$0xff]  }
 0x158   : > { %1493 = vmatpush1.bf16.msra.mxu0 %v4584_v9  ;;  %v4853_v9 = vld [vmem:[%s5853_s1 + $0x80] sm:$0xff]  }
 0x159   : > { %1494 = vmatprep.subr.bf16.mxu0 %v4597_v11  ;;  %v4865_v11 = vld [vmem:[%s5853_s1 + $0x88] sm:$0xff]  }
 0x15b   : > { %4024 = vmatmul.mubr.msk.bf16.gmra.mrb[48].mxu0 %vm380_vm0, %v4707_v37  ;;  %3368 = vmatmul.mubr.msk.bf16.gmra.mrb[36].mxu1 %vm380_vm0, %v4783_v1 }
 0x15c   : > { %4027 = vmatprep.mubr.msk.bf16.mxu0 %vm380_vm0, %v4723_v39  ;;  %1495 = vmatpush1.bf16.msra.mxu0 %v4608_v13  ;;  %v4870_v13 = vld [vmem:[%s5853_s1 + $0x90] sm:$0xff]  }
 0x15d   : > { %1496 = vmatprep.subr.bf16.mxu0 %v4622_v15  ;;  %925 = vmatprep.mubr.bf16.mxu1 %v4460_v2  ;;  %v4882_v15 = vld [vmem:[%s5853_s1 + $0x98] sm:$0xff]  }
 0x160   : > { %1497 = vmatpush1.bf16.msra.mxu0 %v4627_v16  ;;  %v4887_v16 = vld [vmem:[%s5853_s1 + $0xa0] sm:$0xff]  }
 0x161   : > { %4063 = vmatprep.subr.bf16.mxu0 %v4591_v10 }
 0x163   : > { %4028 = vmatmul.mubr.msk.bf16.gmra.mrb[52].mxu0 %vm380_vm0, %v4739_v41  ;;  %3369 = vmatmul.mubr.msk.bf16.gmra.mrb[40].mxu1 %vm380_vm0, %v4799_v3 }
 0x164   : > { %4031 = vmatprep.mubr.msk.bf16.mxu0 %vm380_vm0, %v4752_v42  ;;  %935 = vmatprep.mubr.bf16.mxu1 %v4460_v2 }
 0x16b   : > { %4032 = vmatmul.mubr.msk.bf16.gmra.mrb[56].mxu0 %vm380_vm0, %v4767_v0  ;;  %3370 = vmatmul.mubr.msk.bf16.gmra.mrb[44].mxu1 %vm380_vm0, %v4812_v4 }
 0x16c   : > { %4035 = vmatprep.mubr.msk.bf16.mxu0 %vm380_vm0, %v4783_v1  ;;  %945 = vmatprep.mubr.bf16.mxu1 %v4460_v2 }
 0x173   : > { %4036 = vmatmul.mubr.msk.bf16.gmra.mrb[60].mxu0 %vm380_vm0, %v4799_v3  ;;  %3371 = vmatmul.mubr.msk.bf16.gmra.mrb[48].mxu1 %vm380_vm0, %v4824_v5 }
 0x174   : > { %4039 = vmatprep.mubr.msk.bf16.mxu0 %vm380_vm0, %v4812_v4  ;;  %955 = vmatprep.mubr.bf16.mxu1 %v4460_v2 }
 0x17b   : > { %4040 = vmatmul.mubr.msk.bf16.gmra.mrb[64].mxu0 %vm380_vm0, %v4824_v5  ;;  %3372 = vmatmul.mubr.msk.bf16.gmra.mrb[52].mxu1 %vm380_vm0, %v4836_v6 }
 0x17c   : > { %4043 = vmatprep.mubr.msk.bf16.mxu0 %vm380_vm0, %v4836_v6  ;;  %965 = vmatprep.mubr.bf16.mxu1 %v4460_v2 }
 0x183   : > { %4044 = vmatmul.mubr.msk.bf16.gmra.mrb[68].mxu0 %vm380_vm0, %v4848_v7  ;;  %3373 = vmatmul.mubr.msk.bf16.gmra.mrb[56].mxu1 %vm380_vm0, %v4848_v7 }
 0x184   : > { %4047 = vmatprep.mubr.msk.bf16.mxu0 %vm380_vm0, %v4853_v9  ;;  %975 = vmatprep.mubr.bf16.mxu1 %v4460_v2 }
 0x18b   : > { %4048 = vmatmul.mubr.msk.bf16.gmra.mrb[72].mxu0 %vm380_vm0, %v4865_v11  ;;  %3374 = vmatmul.mubr.msk.bf16.gmra.mrb[60].mxu1 %vm380_vm0, %v4853_v9 }
 0x18c   : > { %4051 = vmatprep.mubr.msk.bf16.mxu0 %vm380_vm0, %v4870_v13  ;;  %985 = vmatprep.mubr.bf16.mxu1 %v4460_v2 }
 0x193   : > { %4052 = vmatmul.mubr.msk.bf16.gmra.mrb[76].mxu0 %vm380_vm0, %v4882_v15  ;;  %3375 = vmatmul.mubr.msk.bf16.gmra.mrb[64].mxu1 %vm380_vm0, %v4865_v11 }
 0x194   : > { %4055 = vmatprep.mubr.msk.bf16.mxu0 %vm380_vm0, %v4887_v16  ;;  %995 = vmatprep.mubr.bf16.mxu1 %v4460_v2 }
 0x19b   : > { %4056 = vmatmul.mubr.msk.bf16.gmra.mrb[80].mxu0 %vm380_vm0, %v4899_v43  ;;  %3376 = vmatmul.mubr.msk.bf16.gmra.mrb[68].mxu1 %vm380_vm0, %v4870_v13 }
 0x19c   : > { %4059 = vmatprep.mubr.msk.bf16.mxu0 %vm380_vm0, %v4904_v44  ;;  %1005 = vmatprep.mubr.bf16.mxu1 %v4460_v2 }
 0x1a3   : > { %4060 = vmatmul.mubr.msk.bf16.gmra.mrb[84].mxu0 %vm380_vm0, %v4916_v45  ;;  %3377 = vmatmul.mubr.msk.bf16.gmra.mrb[72].mxu1 %vm380_vm0, %v4882_v15 }
 0x1a4   : > { %1518 = vmatprep.mubr.bf16.mxu0 %v4460_v2  ;;  %1015 = vmatprep.mubr.bf16.mxu1 %v4460_v2 }
 0x1ab   : > { %3424 = vmatmul.mubr.msk.bf16.vlgmr.msra.gmra.mrb[88].mxu0 %vm380_vm0, %v4342_v46  ;;  %3378 = vmatmul.mubr.msk.bf16.gmra.mrb[76].mxu1 %vm380_vm0, %v4887_v16 }
 0x1ac   : > { %1528 = vmatprep.mubr.bf16.mxu0 %v4460_v2  ;;  %4064 = vmatpush3.bf16.msra.mxu0 %v4591_v10  ;;  %v4344_v10 = vld [vmem:[%s4566_s11 + $0x40] sm:$0xff]  }
 0x1ad   : > { %4065 = vmatprep.subr.bf16.mxu0 %v4603_v12  ;;  %1025 = vmatprep.mubr.bf16.mxu1 %v4460_v2 }
 0x1b0   : > { %4066 = vmatpush3.bf16.msra.mxu0 %v4603_v12  ;;  %v4345_v12 = vld [vmem:[%s4566_s11 + $0x48] sm:$0xff]  }
 0x1b1   : > { %4067 = vmatprep.subr.bf16.mxu0 %v4616_v14 }
 0x1b3   : > { %3425 = vmatmul.mubr.msk.bf16.gmra.mrb[92].mxu0 %vm380_vm0, %v4343_v47  ;;  %3379 = vmatmul.mubr.msk.bf16.gmra.mrb[80].mxu1 %vm380_vm0, %v4899_v43 }
 0x1b4   : > { %1538 = vmatprep.mubr.bf16.mxu0 %v4460_v2  ;;  %4068 = vmatpush3.bf16.msra.mxu0 %v4616_v14  ;;  %v4346_v14 = vld [vmem:[%s4566_s11 + $0x50] sm:$0xff]  }
 0x1b5   : > { %4069 = vmatprep.subr.bf16.mxu0 %v4635_v17  ;;  %1035 = vmatprep.mubr.bf16.mxu1 %v4460_v2 }
 0x1b8   : > { %4070 = vmatpush3.bf16.msra.mxu0 %v4635_v17  ;;  %v4347_v17 = vld [vmem:[%s4566_s11 + $0x58] sm:$0xff]  }
 0x1b9   : > { %4071 = vmatprep.subr.bf16.mxu0 %v4641_v18 }
 0x1bb   : > { %3426 = vmatmul.mubr.msk.bf16.gmra.mrb[96].mxu0 %vm380_vm0, %v4344_v10  ;;  %3380 = vmatmul.mubr.msk.bf16.gmra.mrb[84].mxu1 %vm380_vm0, %v4904_v44 }
 0x1bc   : > { %1548 = vmatprep.mubr.bf16.mxu0 %v4460_v2  ;;  %4072 = vmatpush3.bf16.msra.mxu0 %v4641_v18 }
 0x1bd   : > { %4073 = vmatprep.subr.bf16.mxu0 %v4649_v19  ;;  %1045 = vmatprep.mubr.bf16.mxu1 %v4460_v2 }
 0x1c0   : > { %4074 = vmatpush3.bf16.msra.mxu0 %v4649_v19 }
 0x1c3   : > { %3427 = vmatmul.mubr.msk.bf16.gmra.mrb[100].mxu0 %vm380_vm0, %v4345_v12  ;;  %3381 = vmatmul.mubr.msk.bf16.gmra.mrb[88].mxu1 %vm380_vm0, %v4916_v45 }
 0x1c4   : > { %1558 = vmatprep.mubr.bf16.mxu0 %v4460_v2  ;;  %4099 = vmatprep.mubr.msk.bf16.mxu1 %vm380_vm0, %v4684_v34 }
 0x1cb   : > { %3428 = vmatmul.mubr.msk.bf16.gmra.mrb[104].mxu0 %vm380_vm0, %v4346_v14 }
 0x1cc   : > { %1568 = vmatprep.mubr.bf16.mxu0 %v4460_v2 }
 0x1d3   : > { %3429 = vmatmul.mubr.msk.bf16.gmra.mrb[108].mxu0 %vm380_vm0, %v4347_v17 }
 0x1d4   : > { %4075 = vmatprep.mubr.msk.bf16.mxu0 %vm380_vm0, %v4342_v46 }
 0x1db   : > { %4076 = vmatmul.mubr.msk.bf16.vlgmr.msra.gmra.mrb[112].mxu0 %vm380_vm0, %v4343_v47 }
 0x1dc   : > { %4079 = vmatprep.mubr.msk.bf16.mxu0 %vm380_vm0, %v4344_v10 }
 0x1e3   : > { %4080 = vmatmul.mubr.msk.bf16.gmra.mrb[116].mxu0 %vm380_vm0, %v4345_v12 }
 0x1e4   : > { %4083 = vmatprep.mubr.msk.bf16.mxu0 %vm380_vm0, %v4346_v14 }
 0x1eb   : > { %4084 = vmatmul.mubr.msk.bf16.gmra.mrb[120].mxu0 %vm380_vm0, %v4347_v17 }
 0x1ec   : > { %1710 = vmatprep.mubr.bf16.mxu0 %v4460_v2 }
 0x1fe   : > { %v817_v18 = vpop.f32.mrb[24].mxu0 }
 0x1ff   : > { %1281 = vst [vmem:[%s4975_s29] sm:$0xff] %v817_v18  ;;  %v819_v19 = vpop.f32.mrb[25].mxu0 }
 0x200   : > { %1282 = vst [vmem:[%s4975_s29 + $0x8] sm:$0xff] %v819_v19  ;;  %v821_v48 = vpop.f32.mrb[26].mxu0 }
 0x201   : > { %1284 = vst [vmem:[%s4975_s29 + $0x18] sm:$0xff] %v821_v48  ;;  %v823_v49 = vpop.f32.mrb[27].mxu0 }
 0x202   : > { %1285 = vst [vmem:[%s4975_s29 + $0x20] sm:$0xff] %v823_v49 }
 0x206   : > { %v827_v50 = vpop.f32.mrb[28].mxu0 }
 0x207   : > { %1287 = vst [vmem:[%s4975_s29 + $0x30] sm:$0xff] %v827_v50  ;;  %v829_v51 = vpop.f32.mrb[29].mxu0 }
 0x208   : > { %1288 = vst [vmem:[%s4975_s29 + $0x38] sm:$0xff] %v829_v51  ;;  %v831_v52 = vpop.f32.mrb[30].mxu0 }
 0x209   : > { %1290 = vst [vmem:[%s4975_s29 + $0x48] sm:$0xff] %v831_v52  ;;  %v833_v53 = vpop.f32.mrb[31].mxu0 }
 0x20a   : > { %1291 = vst [vmem:[%s4975_s29 + $0x50] sm:$0xff] %v833_v53 }
 0x20e   : > { %v837_v54 = vpop.f32.mrb[32].mxu0 }
 0x20f   : > { %1293 = vst [vmem:[%s4975_s29 + $0x60] sm:$0xff] %v837_v54  ;;  %v839_v55 = vpop.f32.mrb[33].mxu0 }
 0x210   : > { %1294 = vst [vmem:[%s4975_s29 + $0x68] sm:$0xff] %v839_v55  ;;  %v841_v56 = vpop.f32.mrb[34].mxu0 }
 0x211   : > { %1296 = vst [vmem:[%s4975_s29 + $0x78] sm:$0xff] %v841_v56  ;;  %v843_v57 = vpop.f32.mrb[35].mxu0 }
 0x212   : > { %1297 = vst [vmem:[%s4975_s29 + $0x80] sm:$0xff] %v843_v57 }
 0x216   : > { %v847_v58 = vpop.f32.mrb[36].mxu0 }
 0x217   : > { %1299 = vst [vmem:[%s4975_s29 + $0x90] sm:$0xff] %v847_v58  ;;  %v849_v59 = vpop.f32.mrb[37].mxu0 }
 0x218   : > { %1300 = vst [vmem:[%s4975_s29 + $0x98] sm:$0xff] %v849_v59  ;;  %v851_v60 = vpop.f32.mrb[38].mxu0 }
 0x219   : > { %1302 = vst [vmem:[%s4975_s29 + $0xa8] sm:$0xff] %v851_v60  ;;  %v853_v61 = vpop.f32.mrb[39].mxu0 }
 0x21a   : > { %1303 = vst [vmem:[%s4975_s29 + $0xb0] sm:$0xff] %v853_v61 }
 0x21e   : > { %v4017_v62 = vpop.f32.mrb[40].mxu0 }
 0x21f   : > { %1289 = vst [vmem:[%s4975_s29 + $0x40] sm:$0xff] %v4017_v62  ;;  %v1090_v63 = vpop.f32.mrb[41].mxu0 }
 0x220   : > { %1283 = vst [vmem:[%s4975_s29 + $0x10] sm:$0xff] %v1090_v63  ;;  %v4018_v8 = vpop.f32.mrb[42].mxu0 }
 0x221   : > { %1292 = vst [vmem:[%s4975_s29 + $0x58] sm:$0xff] %v4018_v8  ;;  %v1093_v20 = vpop.f32.mrb[43].mxu0 }
 0x222   : > { %1286 = vst [vmem:[%s4975_s29 + $0x28] sm:$0xff] %v1093_v20 }
 0x226   : > { %v4021_v21 = vpop.f32.mrb[44].mxu0 }
 0x227   : > { %1301 = vst [vmem:[%s4975_s29 + $0xa0] sm:$0xff] %v4021_v21  ;;  %v1106_v22 = vpop.f32.mrb[45].mxu0 }
 0x228   : > { %1295 = vst [vmem:[%s4975_s29 + $0x70] sm:$0xff] %v1106_v22  ;;  %v4022_v23 = vpop.f32.mrb[46].mxu0 }
 0x229   : > { %1304 = vst [vmem:[%s4975_s29 + $0xb8] sm:$0xff] %v4022_v23  ;;  %v1109_v24 = vpop.f32.mrb[47].mxu0 }
 0x22a   : > { %1298 = vst [vmem:[%s4975_s29 + $0x88] sm:$0xff] %v1109_v24 }
 0x22e   : > { %v4025_v25 = vpop.f32.mrb[48].mxu0 }
 0x22f   : > { %1313 = vst [vmem:[%s4975_s29 + $0x100] sm:$0xff] %v4025_v25  ;;  %v1122_v26 = vpop.f32.mrb[49].mxu0 }
 0x230   : > { %1307 = vst [vmem:[%s4975_s29 + $0xd0] sm:$0xff] %v1122_v26  ;;  %v4026_v27 = vpop.f32.mrb[50].mxu0  ;;  %v857_v26 = vpop.f32.mrb[12].mxu1 }
 0x231   : > { %1316 = vst [vmem:[%s4975_s29 + $0x118] sm:$0xff] %v4026_v27  ;;  %v1125_v28 = vpop.f32.mrb[51].mxu0  ;;  %1305 = vst [vmem:[%s4975_s29 + $0xc0] sm:$0xff] %v857_v26  ;;  %v859_v27 = vpop.f32.mrb[13].mxu1 }
 0x232   : > { %1310 = vst [vmem:[%s4975_s29 + $0xe8] sm:$0xff] %v1125_v28  ;;  %1306 = vst [vmem:[%s4975_s29 + $0xc8] sm:$0xff] %v859_v27 }
 0x236   : > { %v4029_v29 = vpop.f32.mrb[52].mxu0 }
 0x237   : > { %1325 = vst [vmem:[%s4975_s29 + $0x160] sm:$0xff] %v4029_v29  ;;  %v1138_v30 = vpop.f32.mrb[53].mxu0  ;;  %v861_v29 = vpop.f32.mrb[14].mxu1 }
 0x238   : > { %1319 = vst [vmem:[%s4975_s29 + $0x130] sm:$0xff] %v1138_v30  ;;  %v4030_v31 = vpop.f32.mrb[54].mxu0  ;;  %1308 = vst [vmem:[%s4975_s29 + $0xd8] sm:$0xff] %v861_v29 }
 0x239   : > { %1328 = vst [vmem:[%s4975_s29 + $0x178] sm:$0xff] %v4030_v31  ;;  %v1141_v32 = vpop.f32.mrb[55].mxu0  ;;  %v863_v31 = vpop.f32.mrb[15].mxu1 }
 0x23a   : > { %1322 = vst [vmem:[%s4975_s29 + $0x148] sm:$0xff] %v1141_v32  ;;  %1309 = vst [vmem:[%s4975_s29 + $0xe0] sm:$0xff] %v863_v31 }
 0x23e   : > { %v4033_v33 = vpop.f32.mrb[56].mxu0 }
 0x23f   : > { %1337 = vst [vmem:[%s4975_s29 + $0x1c0] sm:$0xff] %v4033_v33  ;;  %v1154_v46 = vpop.f32.mrb[57].mxu0 }
 0x240   : > { %1331 = vst [vmem:[%s4975_s29 + $0x190] sm:$0xff] %v1154_v46  ;;  %v4034_v47 = vpop.f32.mrb[58].mxu0 }
 0x241   : > { %1340 = vst [vmem:[%s4975_s29 + $0x1d8] sm:$0xff] %v4034_v47  ;;  %v1157_v10 = vpop.f32.mrb[59].mxu0 }
 0x242   : > { %1334 = vst [vmem:[%s4975_s29 + $0x1a8] sm:$0xff] %v1157_v10  ;;  %v867_v10 = vpop.f32.mrb[16].mxu1 }
 0x243   : > { %1311 = vst [vmem:[%s4975_s29 + $0xf0] sm:$0xff] %v867_v10 }
 0x246   : > { %v4037_v12 = vpop.f32.mrb[60].mxu0 }
 0x247   : > { %1349 = vst [vmem:[%s4975_s29 + $0x220] sm:$0xff] %v4037_v12  ;;  %v1170_v14 = vpop.f32.mrb[61].mxu0  ;;  %v869_v12 = vpop.f32.mrb[17].mxu1 }
 0x248   : > { %1343 = vst [vmem:[%s4975_s29 + $0x1f0] sm:$0xff] %v1170_v14  ;;  %v4038_v17 = vpop.f32.mrb[62].mxu0  ;;  %1312 = vst [vmem:[%s4975_s29 + $0xf8] sm:$0xff] %v869_v12 }
 0x249   : > { %1352 = vst [vmem:[%s4975_s29 + $0x238] sm:$0xff] %v4038_v17  ;;  %v1173_v18 = vpop.f32.mrb[63].mxu0  ;;  %v871_v17 = vpop.f32.mrb[18].mxu1 }
 0x24a   : > { %1346 = vst [vmem:[%s4975_s29 + $0x208] sm:$0xff] %v1173_v18  ;;  %1314 = vst [vmem:[%s4975_s29 + $0x108] sm:$0xff] %v871_v17 }
 0x24e   : > { %v4041_v19 = vpop.f32.mrb[64].mxu0 }
 0x24f   : > { %1361 = vst [vmem:[%s4975_s29 + $0x280] sm:$0xff] %v4041_v19  ;;  %v1186_v48 = vpop.f32.mrb[65].mxu0  ;;  %v873_v19 = vpop.f32.mrb[19].mxu1 }
 0x250   : > { %1355 = vst [vmem:[%s4975_s29 + $0x250] sm:$0xff] %v1186_v48  ;;  %v4042_v49 = vpop.f32.mrb[66].mxu0  ;;  %1315 = vst [vmem:[%s4975_s29 + $0x110] sm:$0xff] %v873_v19 }
 0x251   : > { %1364 = vst [vmem:[%s4975_s29 + $0x298] sm:$0xff] %v4042_v49  ;;  %v1189_v50 = vpop.f32.mrb[67].mxu0 }
 0x252   : > { %1358 = vst [vmem:[%s4975_s29 + $0x268] sm:$0xff] %v1189_v50 }
 0x256   : > { %v4045_v51 = vpop.f32.mrb[68].mxu0 }
 0x257   : > { %1373 = vst [vmem:[%s4975_s29 + $0x2e0] sm:$0xff] %v4045_v51  ;;  %v1202_v52 = vpop.f32.mrb[69].mxu0 }
 0x258   : > { %1367 = vst [vmem:[%s4975_s29 + $0x2b0] sm:$0xff] %v1202_v52  ;;  %v4046_v53 = vpop.f32.mrb[70].mxu0  ;;  %v877_v52 = vpop.f32.mrb[20].mxu1 }
 0x259   : > { %1376 = vst [vmem:[%s4975_s29 + $0x2f8] sm:$0xff] %v4046_v53  ;;  %v1205_v54 = vpop.f32.mrb[71].mxu0  ;;  %1317 = vst [vmem:[%s4975_s29 + $0x120] sm:$0xff] %v877_v52  ;;  %v879_v53 = vpop.f32.mrb[21].mxu1 }
 0x25a   : > { %1370 = vst [vmem:[%s4975_s29 + $0x2c8] sm:$0xff] %v1205_v54  ;;  %1318 = vst [vmem:[%s4975_s29 + $0x128] sm:$0xff] %v879_v53 }
 0x25e   : > { %v4049_v55 = vpop.f32.mrb[72].mxu0 }
 0x25f   : > { %1385 = vst [vmem:[%s4975_s29 + $0x340] sm:$0xff] %v4049_v55  ;;  %v1218_v56 = vpop.f32.mrb[73].mxu0  ;;  %v881_v55 = vpop.f32.mrb[22].mxu1 }
 0x260   : > { %1379 = vst [vmem:[%s4975_s29 + $0x310] sm:$0xff] %v1218_v56  ;;  %v4050_v57 = vpop.f32.mrb[74].mxu0  ;;  %1320 = vst [vmem:[%s4975_s29 + $0x138] sm:$0xff] %v881_v55 }
 0x261   : > { %1388 = vst [vmem:[%s4975_s29 + $0x358] sm:$0xff] %v4050_v57  ;;  %v1221_v58 = vpop.f32.mrb[75].mxu0  ;;  %v883_v57 = vpop.f32.mrb[23].mxu1 }
 0x262   : > { %1382 = vst [vmem:[%s4975_s29 + $0x328] sm:$0xff] %v1221_v58  ;;  %1321 = vst [vmem:[%s4975_s29 + $0x140] sm:$0xff] %v883_v57 }
 0x266   : > { %v4053_v59 = vpop.f32.mrb[76].mxu0 }
 0x267   : > { %1397 = vst [vmem:[%s4975_s29 + $0x3a0] sm:$0xff] %v4053_v59  ;;  %v1234_v60 = vpop.f32.mrb[77].mxu0 }
 0x268   : > { %1391 = vst [vmem:[%s4975_s29 + $0x370] sm:$0xff] %v1234_v60  ;;  %v4054_v61 = vpop.f32.mrb[78].mxu0 }
 0x269   : > { %1400 = vst [vmem:[%s4975_s29 + $0x3b8] sm:$0xff] %v4054_v61  ;;  %v1237_v62 = vpop.f32.mrb[79].mxu0 }
 0x26a   : > { %1394 = vst [vmem:[%s4975_s29 + $0x388] sm:$0xff] %v1237_v62  ;;  %v887_v62 = vpop.f32.mrb[24].mxu1 }
 0x26b   : > { %1323 = vst [vmem:[%s4975_s29 + $0x150] sm:$0xff] %v887_v62 }
 0x26e   : > { %v4057_v63 = vpop.f32.mrb[80].mxu0 }
 0x26f   : > { %1409 = vst [vmem:[%s4975_s29 + $0x400] sm:$0xff] %v4057_v63  ;;  %v1250_v8 = vpop.f32.mrb[81].mxu0  ;;  %v889_v63 = vpop.f32.mrb[25].mxu1 }
 0x270   : > { %1403 = vst [vmem:[%s4975_s29 + $0x3d0] sm:$0xff] %v1250_v8  ;;  %v4058_v20 = vpop.f32.mrb[82].mxu0  ;;  %1324 = vst [vmem:[%s4975_s29 + $0x158] sm:$0xff] %v889_v63 }
 0x271   : > { %1412 = vst [vmem:[%s4975_s29 + $0x418] sm:$0xff] %v4058_v20  ;;  %v1253_v21 = vpop.f32.mrb[83].mxu0  ;;  %v891_v20 = vpop.f32.mrb[26].mxu1 }
 0x272   : > { %1406 = vst [vmem:[%s4975_s29 + $0x3e8] sm:$0xff] %v1253_v21  ;;  %1326 = vst [vmem:[%s4975_s29 + $0x168] sm:$0xff] %v891_v20 }
 0x276   : > { %v4061_v22 = vpop.f32.mrb[84].mxu0 }
 0x277   : > { %1421 = vst [vmem:[%s4975_s29 + $0x460] sm:$0xff] %v4061_v22  ;;  %v1266_v23 = vpop.f32.mrb[85].mxu0  ;;  %v893_v22 = vpop.f32.mrb[27].mxu1 }
 0x278   : > { %1415 = vst [vmem:[%s4975_s29 + $0x430] sm:$0xff] %v1266_v23  ;;  %v4062_v24 = vpop.f32.mrb[86].mxu0  ;;  %1327 = vst [vmem:[%s4975_s29 + $0x170] sm:$0xff] %v893_v22  ;;  %v897_v27 = vpop.f32.mrb[28].mxu1 }
 0x279   : > { %1424 = vst [vmem:[%s4975_s29 + $0x478] sm:$0xff] %v4062_v24  ;;  %v1269_v25 = vpop.f32.mrb[87].mxu0  ;;  %1329 = vst [vmem:[%s4975_s29 + $0x180] sm:$0xff] %v897_v27 }
 0x27a   : > { %1418 = vst [vmem:[%s4975_s29 + $0x448] sm:$0xff] %v1269_v25 }
 0x27e   : > { %v1520_v28 = vpop.f32.mrb[88].mxu0 }
 0x27f   : > { %v1522_v30 = vpop.f32.mrb[89].mxu0 }
 0x280   : > { %v1524_v32 = vpop.f32.mrb[90].mxu0 }
 0x281   : > { %v1660_v33 = vpack.c.bf16 %v1524_v32, %v1520_v28  ;;  %v1526_v46 = vpop.f32.mrb[91].mxu0  ;;  %v899_v28 = vpop.f32.mrb[29].mxu1 }
 0x282   : > { %v1661_v47 = vpack.c.bf16 %v1526_v46, %v1522_v30  ;;  %1330 = vst [vmem:[%s4975_s29 + $0x188] sm:$0xff] %v899_v28  ;;  %v901_v30 = vpop.f32.mrb[30].mxu1 }
 0x283   : > { %1332 = vst [vmem:[%s4975_s29 + $0x198] sm:$0xff] %v901_v30  ;;  %v903_v32 = vpop.f32.mrb[31].mxu1 }
 0x284   : > { %1678 = vmatprep.subr.bf16.mxu0 %v1661_v47  ;;  %1333 = vst [vmem:[%s4975_s29 + $0x1a0] sm:$0xff] %v903_v32  ;;  %v907_v12 = vpop.f32.mrb[32].mxu1 }
 0x285   : > { %1679 = vmatpush1.bf16.msra.mxu0 %v1660_v33  ;;  %1335 = vst [vmem:[%s4975_s29 + $0x1b0] sm:$0xff] %v907_v12 }
 0x286   : > { %v1530_v14 = vpop.f32.mrb[92].mxu0 }
 0x287   : > { %v1532_v18 = vpop.f32.mrb[93].mxu0 }
 0x288   : > { %v1534_v48 = vpop.f32.mrb[94].mxu0 }
 0x289   : > { %v1663_v49 = vpack.c.bf16 %v1534_v48, %v1530_v14  ;;  %v1536_v50 = vpop.f32.mrb[95].mxu0  ;;  %v909_v14 = vpop.f32.mrb[33].mxu1 }
 0x28a   : > { %v1664_v51 = vpack.c.bf16 %v1536_v50, %v1532_v18  ;;  %1336 = vst [vmem:[%s4975_s29 + $0x1b8] sm:$0xff] %v909_v14  ;;  %v911_v18 = vpop.f32.mrb[34].mxu1 }
 0x28b   : > { %1338 = vst [vmem:[%s4975_s29 + $0x1c8] sm:$0xff] %v911_v18  ;;  %v913_v48 = vpop.f32.mrb[35].mxu1 }
 0x28c   : > { %1680 = vmatprep.subr.bf16.mxu0 %v1664_v51  ;;  %1339 = vst [vmem:[%s4975_s29 + $0x1d0] sm:$0xff] %v913_v48  ;;  %v917_v53 = vpop.f32.mrb[36].mxu1 }
 0x28d   : > { %1681 = vmatpush1.bf16.msra.mxu0 %v1663_v49  ;;  %1341 = vst [vmem:[%s4975_s29 + $0x1e0] sm:$0xff] %v917_v53  ;;  %v4358_v53 = vld [vmem:[%s5854_s2 + $0x34] ss:$12 sps:$4 sm:$0xff]  }
 0x28e   : > { %v1540_v54 = vpop.f32.mrb[96].mxu0 }
 0x28f   : > { %v1542_v56 = vpop.f32.mrb[97].mxu0 }
 0x290   : > { %v1544_v58 = vpop.f32.mrb[98].mxu0 }
 0x291   : > { %v1666_v59 = vpack.c.bf16 %v1544_v58, %v1540_v54  ;;  %v1546_v60 = vpop.f32.mrb[99].mxu0  ;;  %v919_v54 = vpop.f32.mrb[37].mxu1 }
 0x292   : > { %v1667_v61 = vpack.c.bf16 %v1546_v60, %v1542_v56  ;;  %1342 = vst [vmem:[%s4975_s29 + $0x1e8] sm:$0xff] %v919_v54  ;;  %v921_v56 = vpop.f32.mrb[38].mxu1 }
 0x293   : > { %1344 = vst [vmem:[%s4975_s29 + $0x1f8] sm:$0xff] %v921_v56  ;;  %v923_v58 = vpop.f32.mrb[39].mxu1 }
 0x294   : > { %1682 = vmatprep.subr.bf16.mxu0 %v1667_v61  ;;  %1345 = vst [vmem:[%s4975_s29 + $0x200] sm:$0xff] %v923_v58  ;;  %v927_v63 = vpop.f32.mrb[40].mxu1 }
 0x295   : > { %1683 = vmatpush1.bf16.msra.mxu0 %v1666_v59  ;;  %1347 = vst [vmem:[%s4975_s29 + $0x210] sm:$0xff] %v927_v63  ;;  %v4364_v63 = vld [vmem:[%s5854_s2 + $0x7c] ss:$12 sps:$4 sm:$0xff]  }
 0x296   : > { %v1550_v8 = vpop.f32.mrb[100].mxu0 }
 0x297   : > { %v1552_v21 = vpop.f32.mrb[101].mxu0 }
 0x298   : > { %v1554_v23 = vpop.f32.mrb[102].mxu0 }
 0x299   : > { %v1669_v24 = vpack.c.bf16 %v1554_v23, %v1550_v8  ;;  %v1556_v25 = vpop.f32.mrb[103].mxu0  ;;  %v929_v8 = vpop.f32.mrb[41].mxu1 }
 0x29a   : > { %v1670_v26 = vpack.c.bf16 %v1556_v25, %v1552_v21  ;;  %1348 = vst [vmem:[%s4975_s29 + $0x218] sm:$0xff] %v929_v8  ;;  %v931_v21 = vpop.f32.mrb[42].mxu1 }
 0x29b   : > { %1350 = vst [vmem:[%s4975_s29 + $0x228] sm:$0xff] %v931_v21  ;;  %v933_v23 = vpop.f32.mrb[43].mxu1  ;;  %v4365_v21 = vld [vmem:[%s5854_s2 + $0x78] ss:$12 sps:$4 sm:$0xff]  }
 0x29c   : > { %1684 = vmatprep.subr.bf16.mxu0 %v1670_v26  ;;  %1351 = vst [vmem:[%s4975_s29 + $0x230] sm:$0xff] %v933_v23  ;;  %v937_v27 = vpop.f32.mrb[44].mxu1  ;;  %v5166_v23 = vld [vmem:[%s5854_s2 + $0x8] ss:$12 sps:$4 sm:$0xff]  }
 0x29d   : > { %1685 = vmatpush1.bf16.msra.mxu0 %v1669_v24  ;;  %1353 = vst [vmem:[%s4975_s29 + $0x240] sm:$0xff] %v937_v27  ;;  %v939_v28 = vpop.f32.mrb[45].mxu1 }
 0x29e   : > { %v1560_v29 = vpop.f32.mrb[104].mxu0  ;;  %1354 = vst [vmem:[%s4975_s29 + $0x248] sm:$0xff] %v939_v28  ;;  %v941_v30 = vpop.f32.mrb[46].mxu1 }
 0x29f   : > { %v1562_v31 = vpop.f32.mrb[105].mxu0  ;;  %1356 = vst [vmem:[%s4975_s29 + $0x258] sm:$0xff] %v941_v30  ;;  %v943_v32 = vpop.f32.mrb[47].mxu1 }
 0x2a0   : > { %v1564_v33 = vpop.f32.mrb[106].mxu0  ;;  %1357 = vst [vmem:[%s4975_s29 + $0x260] sm:$0xff] %v943_v32  ;;  %v947_v12 = vpop.f32.mrb[48].mxu1 }
 0x2a1   : > { %v1672_v46 = vpack.c.bf16 %v1564_v33, %v1560_v29  ;;  %v1566_v47 = vpop.f32.mrb[107].mxu0  ;;  %1359 = vst [vmem:[%s4975_s29 + $0x270] sm:$0xff] %v947_v12  ;;  %v949_v14 = vpop.f32.mrb[49].mxu1 }
 0x2a2   : > { %v1673_v10 = vpack.c.bf16 %v1566_v47, %v1562_v31  ;;  %1360 = vst [vmem:[%s4975_s29 + $0x278] sm:$0xff] %v949_v14 }
 0x2a4   : > { %1686 = vmatprep.subr.bf16.mxu0 %v1673_v10 }
 0x2a5   : > { %1687 = vmatpush1.bf16.msra.mxu0 %v1672_v46 }
 0x2a6   : > { %v1570_v17 = vpop.f32.mrb[108].mxu0 }
 0x2a7   : > { %v1572_v19 = vpop.f32.mrb[109].mxu0 }
 0x2a8   : > { %v1574_v49 = vpop.f32.mrb[110].mxu0 }
 0x2a9   : > { %v1675_v50 = vpack.c.bf16 %v1574_v49, %v1570_v17  ;;  %v1576_v51 = vpop.f32.mrb[111].mxu0  ;;  %v951_v17 = vpop.f32.mrb[50].mxu1  ;;  %v4355_v49 = vld [vmem:[%s5854_s2] ss:$12 sps:$4 sm:$0xff]  }
 0x2aa   : > { %v1676_v52 = vpack.c.bf16 %v1576_v51, %v1572_v19  ;;  %1362 = vst [vmem:[%s4975_s29 + $0x288] sm:$0xff] %v951_v17  ;;  %v953_v18 = vpop.f32.mrb[51].mxu1  ;;  %v4354_v19 = vld [vmem:[%s5854_s2 + $0x4] ss:$12 sps:$4 sm:$0xff]   ;;  %v4356_v51 = vld [vmem:[%s5854_s2 + $0x1c] ss:$12 sps:$4 sm:$0xff]  }
 0x2ab   : > { %1363 = vst [vmem:[%s4975_s29 + $0x290] sm:$0xff] %v953_v18  ;;  %v957_v48 = vpop.f32.mrb[52].mxu1 }
 0x2ac   : > { %1688 = vmatprep.subr.bf16.mxu0 %v1676_v52  ;;  %1365 = vst [vmem:[%s4975_s29 + $0x2a0] sm:$0xff] %v957_v48 }
 0x2ad   : > { %1689 = vmatpush1.bf16.msra.mxu0 %v1675_v50  ;;  %v959_v50 = vpop.f32.mrb[53].mxu1 }
 0x2ae   : > { %v4077_v55 = vpop.f32.mrb[112].mxu0  ;;  %1366 = vst [vmem:[%s4975_s29 + $0x2a8] sm:$0xff] %v959_v50  ;;  %v961_v52 = vpop.f32.mrb[54].mxu1  ;;  %v5229_v50 = vld [vmem:[%s5853_s1 + $0x50] sm:$0xff]  }
 0x2af   : > { %v1613_v57 = vpop.f32.mrb[113].mxu0  ;;  %1368 = vst [vmem:[%s4975_s29 + $0x2b8] sm:$0xff] %v961_v52  ;;  %v4352_v52 = vld [vmem:[%s4566_s11 + $0x80] sm:$0xff]  }
 0x2b0   : > { %v4078_v59 = vpop.f32.mrb[114].mxu0  ;;  %3436 = vmatmul.mubr.msk.bf16.vlgmr.msra.gmra.mrb[124].mxu0 %vm380_vm0, %v4684_v34 }
 0x2b1   : > { %v1665_v60 = vpack.c.bf16 %v4078_v59, %v4077_v55  ;;  %v1616_v61 = vpop.f32.mrb[115].mxu0  ;;  %1720 = vmatprep.mubr.bf16.mxu0 %v4460_v2  ;;  %v4359_v55 = vld [vmem:[%s5854_s2 + $0x30] ss:$12 sps:$4 sm:$0xff]  }
 0x2b2   : > { %v1662_v62 = vpack.c.bf16 %v1616_v61, %v1613_v57  ;;  %v4360_v57 = vld [vmem:[%s5854_s2 + $0x4c] ss:$12 sps:$4 sm:$0xff]   ;;  %v4362_v59 = vld [vmem:[%s5854_s2 + $0x64] ss:$12 sps:$4 sm:$0xff]  }
 0x2b3   : > { %v4363_v61 = vld [vmem:[%s5854_s2 + $0x60] ss:$12 sps:$4 sm:$0xff]  }
 0x2b4   : > { %4087 = vmatprep.subr.bf16.mxu1 %v1662_v62 }
 0x2b5   : > { %4088 = vmatpush3.bf16.msra.mxu1 %v1662_v62 }
 0x2b6   : > { %4089 = vmatprep.subr.bf16.mxu1 %v1665_v60  ;;  %v4081_v20 = vpop.f32.mrb[116].mxu0 }
 0x2b7   : > { %v1629_v22 = vpop.f32.mrb[117].mxu0 }
 0x2b8   : > { %v4082_v34 = vpop.f32.mrb[118].mxu0  ;;  %3437 = vmatmul.mubr.msk.bf16.gmra.mrb[128].mxu0 %vm380_vm0, %v4701_v36 }
 0x2b9   : > { %4090 = vmatpush3.bf16.msra.mxu1 %v1665_v60  ;;  %v1671_v24 = vpack.c.bf16 %v4082_v34, %v4081_v20  ;;  %v1632_v25 = vpop.f32.mrb[119].mxu0  ;;  %1730 = vmatprep.mubr.bf16.mxu0 %v4460_v2 }
 0x2ba   : > { %v1668_v26 = vpack.c.bf16 %v1632_v25, %v1629_v22 }
 0x2bc   : > { %4091 = vmatprep.subr.bf16.mxu1 %v1668_v26 }
 0x2bd   : > { %4092 = vmatpush3.bf16.msra.mxu1 %v1668_v26 }
 0x2be   : > { %v4085_v29 = vpop.f32.mrb[120].mxu0  ;;  %4093 = vmatprep.subr.bf16.mxu1 %v1671_v24 }
 0x2bf   : > { %v1645_v31 = vpop.f32.mrb[121].mxu0 }
 0x2c0   : > { %v4086_v33 = vpop.f32.mrb[122].mxu0  ;;  %3438 = vmatmul.mubr.msk.bf16.gmra.mrb[132].mxu0 %vm380_vm0, %v4718_v38 }
 0x2c1   : > { %v1677_v46 = vpack.c.bf16 %v4086_v33, %v4085_v29  ;;  %v1648_v47 = vpop.f32.mrb[123].mxu0  ;;  %4094 = vmatpush3.bf16.msra.mxu1 %v1671_v24  ;;  %1740 = vmatprep.mubr.bf16.mxu0 %v4460_v2 }
 0x2c2   : > { %v1674_v10 = vpack.c.bf16 %v1648_v47, %v1645_v31 }
 0x2c4   : > { %4095 = vmatprep.subr.bf16.mxu1 %v1674_v10 }
 0x2c5   : > { %4096 = vmatpush3.bf16.msra.mxu1 %v1674_v10 }
 0x2c6   : > { %4097 = vmatprep.subr.bf16.mxu1 %v1677_v46 }
 0x2c8   : > { %3439 = vmatmul.mubr.msk.bf16.gmra.mrb[136].mxu0 %vm380_vm0, %v4734_v40 }
 0x2c9   : > { %4098 = vmatpush3.bf16.msra.mxu1 %v1677_v46  ;;  %1750 = vmatprep.mubr.bf16.mxu0 %v4460_v2 }
 0x2ca   : > { %2382 = vmatprep.subr.bf16.mxu1 %v4354_v19 }
 0x2cc   : > { %4100 = vmatmul.mubr.msk.bf16.vlgmr.msra.gmra.mrb[92].mxu1 %vm380_vm0, %v4701_v36  ;;  %v963_v36 = vpop.f32.mrb[55].mxu1 }
 0x2cd   : > { %4103 = vmatprep.mubr.msk.bf16.mxu1 %vm380_vm0, %v4718_v38  ;;  %2383 = vmatpush1.bf16.msra.mxu1 %v4355_v49  ;;  %1369 = vst [vmem:[%s4975_s29 + $0x2c0] sm:$0xff] %v963_v36  ;;  %v4357_v38 = vld [vmem:[%s5854_s2 + $0x18] ss:$12 sps:$4 sm:$0xff]   ;;  %v967_v54 = vpop.f32.mrb[56].mxu1 }
 0x2ce   : > { %2384 = vmatprep.subr.bf16.mxu1 %v4356_v51  ;;  %1371 = vst [vmem:[%s4975_s29 + $0x2d0] sm:$0xff] %v967_v54  ;;  %v969_v56 = vpop.f32.mrb[57].mxu1  ;;  %v5241_v51 = vld [vmem:[%s5853_s1 + $0x58] sm:$0xff]   ;;  %v5350_v54 = vld [vmem:[%s5853_s1 + $0xa8] sm:$0xff]  }
 0x2cf   : > { %1372 = vst [vmem:[%s4975_s29 + $0x2d8] sm:$0xff] %v969_v56  ;;  %v971_v58 = vpop.f32.mrb[58].mxu1  ;;  %v5329_v36 = vld [vmem:[%s5853_s1 + $0x98] sm:$0xff]  }
 0x2d0   : > { %3440 = vmatmul.mubr.msk.bf16.gmra.mrb[140].mxu0 %vm380_vm0, %v4689_v35  ;;  %1374 = vst [vmem:[%s4975_s29 + $0x2e8] sm:$0xff] %v971_v58  ;;  %v5370_v56 = vld [vmem:[%s5853_s1 + $0xb8] sm:$0xff]  }
 0x2d1   : > { %2385 = vmatpush1.bf16.msra.mxu1 %v4357_v38  ;;  %1760 = vmatprep.mubr.bf16.mxu0 %v4460_v2  ;;  %v4353_v38 = vld [vmem:[%s4566_s11 + $0x88] sm:$0xff]  }
 0x2d2   : > { %2386 = vmatprep.subr.bf16.mxu1 %v4358_v53  ;;  %v5340_v53 = vld [vmem:[%s5853_s1 + $0xa0] sm:$0xff]  }
 0x2d4   : > { %4104 = vmatmul.mubr.msk.bf16.gmra.mrb[96].mxu1 %vm380_vm0, %v4734_v40  ;;  %v973_v40 = vpop.f32.mrb[59].mxu1 }
 0x2d5   : > { %4107 = vmatprep.mubr.msk.bf16.mxu1 %vm380_vm0, %v4689_v35  ;;  %2387 = vmatpush1.bf16.msra.mxu1 %v4359_v55  ;;  %1375 = vst [vmem:[%s4975_s29 + $0x2f0] sm:$0xff] %v973_v40  ;;  %v4361_v35 = vld [vmem:[%s5854_s2 + $0x48] ss:$12 sps:$4 sm:$0xff]   ;;  %v977_v60 = vpop.f32.mrb[60].mxu1 }
 0x2d6   : > { %2388 = vmatprep.subr.bf16.mxu1 %v4360_v57  ;;  %1377 = vst [vmem:[%s4975_s29 + $0x300] sm:$0xff] %v977_v60  ;;  %v979_v62 = vpop.f32.mrb[61].mxu1  ;;  %v5360_v55 = vld [vmem:[%s5853_s1 + $0xb0] sm:$0xff]   ;;  %v5377_v57 = vld [vmem:[%s5853_s1] sm:$0xff]  }
 0x2d7   : > { %1378 = vst [vmem:[%s4975_s29 + $0x308] sm:$0xff] %v979_v62 }
 0x2d8   : > { %3441 = vmatmul.mubr.msk.bf16.gmra.mrb[144].mxu0 %vm380_vm0, %v4707_v37 }
 0x2d9   : > { %2389 = vmatpush1.bf16.msra.mxu1 %v4361_v35  ;;  %1770 = vmatprep.mubr.bf16.mxu0 %v4460_v2 }
 0x2da   : > { %2390 = vmatprep.subr.bf16.mxu1 %v4362_v59 }
 0x2dc   : > { %4108 = vmatmul.mubr.msk.bf16.gmra.mrb[100].mxu1 %vm380_vm0, %v4707_v37  ;;  %v981_v37 = vpop.f32.mrb[62].mxu1 }
 0x2dd   : > { %4111 = vmatprep.mubr.msk.bf16.mxu1 %vm380_vm0, %v4723_v39  ;;  %2391 = vmatpush1.bf16.msra.mxu1 %v4363_v61  ;;  %1380 = vst [vmem:[%s4975_s29 + $0x318] sm:$0xff] %v981_v37  ;;  %v983_v8 = vpop.f32.mrb[63].mxu1 }
 0x2de   : > { %2392 = vmatprep.subr.bf16.mxu1 %v4364_v63  ;;  %1381 = vst [vmem:[%s4975_s29 + $0x320] sm:$0xff] %v983_v8  ;;  %v987_v20 = vpop.f32.mrb[64].mxu1 }
 0x2df   : > { %1383 = vst [vmem:[%s4975_s29 + $0x330] sm:$0xff] %v987_v20  ;;  %v989_v22 = vpop.f32.mrb[65].mxu1 }
 0x2e0   : > { %3442 = vmatmul.mubr.msk.bf16.gmra.mrb[148].mxu0 %vm380_vm0, %v4723_v39  ;;  %1384 = vst [vmem:[%s4975_s29 + $0x338] sm:$0xff] %v989_v22  ;;  %v991_v39 = vpop.f32.mrb[66].mxu1 }
 0x2e1   : > { %2393 = vmatpush1.bf16.msra.mxu1 %v4365_v21  ;;  %1780 = vmatprep.mubr.bf16.mxu0 %v4460_v2  ;;  %1386 = vst [vmem:[%s4975_s29 + $0x348] sm:$0xff] %v991_v39  ;;  %v993_v34 = vpop.f32.mrb[67].mxu1 }
 0x2e2   : > { %4147 = vmatprep.subr.bf16.mxu1 %v5166_v23  ;;  %1387 = vst [vmem:[%s4975_s29 + $0x350] sm:$0xff] %v993_v34  ;;  %v997_v24 = vpop.f32.mrb[68].mxu1 }
 0x2e3   : > { %1389 = vst [vmem:[%s4975_s29 + $0x360] sm:$0xff] %v997_v24  ;;  %v999_v25 = vpop.f32.mrb[69].mxu1 }
 0x2e4   : > { %4112 = vmatmul.mubr.msk.bf16.gmra.mrb[104].mxu1 %vm380_vm0, %v4739_v41  ;;  %1390 = vst [vmem:[%s4975_s29 + $0x368] sm:$0xff] %v999_v25  ;;  %v1001_v26 = vpop.f32.mrb[70].mxu1 }
 0x2e5   : > { %4115 = vmatprep.mubr.msk.bf16.mxu1 %vm380_vm0, %v4752_v42  ;;  %1392 = vst [vmem:[%s4975_s29 + $0x378] sm:$0xff] %v1001_v26  ;;  %v1003_v27 = vpop.f32.mrb[71].mxu1 }
 0x2e6   : > { %1393 = vst [vmem:[%s4975_s29 + $0x380] sm:$0xff] %v1003_v27  ;;  %v1007_v28 = vpop.f32.mrb[72].mxu1 }
 0x2e7   : > { %1395 = vst [vmem:[%s4975_s29 + $0x390] sm:$0xff] %v1007_v28  ;;  %v1009_v29 = vpop.f32.mrb[73].mxu1 }
 0x2e8   : > { %3443 = vmatmul.mubr.msk.bf16.gmra.mrb[152].mxu0 %vm380_vm0, %v4739_v41  ;;  %1396 = vst [vmem:[%s4975_s29 + $0x398] sm:$0xff] %v1009_v29  ;;  %v1011_v30 = vpop.f32.mrb[74].mxu1 }
 0x2e9   : > { %1790 = vmatprep.mubr.bf16.mxu0 %v4460_v2  ;;  %1398 = vst [vmem:[%s4975_s29 + $0x3a8] sm:$0xff] %v1011_v30  ;;  %v1013_v31 = vpop.f32.mrb[75].mxu1 }
 0x2ea   : > { %1399 = vst [vmem:[%s4975_s29 + $0x3b0] sm:$0xff] %v1013_v31  ;;  %v1017_v32 = vpop.f32.mrb[76].mxu1 }
 0x2eb   : > { %1401 = vst [vmem:[%s4975_s29 + $0x3c0] sm:$0xff] %v1017_v32  ;;  %v1019_v41 = vpop.f32.mrb[77].mxu1 }
 0x2ec   : > { %4116 = vmatmul.mubr.msk.bf16.gmra.mrb[108].mxu1 %vm380_vm0, %v4767_v0  ;;  %1402 = vst [vmem:[%s4975_s29 + $0x3c8] sm:$0xff] %v1019_v41  ;;  %v1021_v33 = vpop.f32.mrb[78].mxu1 }
 0x2ed   : > { %4119 = vmatprep.mubr.msk.bf16.mxu1 %vm380_vm0, %v4783_v1  ;;  %1404 = vst [vmem:[%s4975_s29 + $0x3d8] sm:$0xff] %v1021_v33  ;;  %v1023_v46 = vpop.f32.mrb[79].mxu1 }
 0x2ee   : > { %1405 = vst [vmem:[%s4975_s29 + $0x3e0] sm:$0xff] %v1023_v46  ;;  %v1027_v47 = vpop.f32.mrb[80].mxu1 }
 0x2ef   : > { %1407 = vst [vmem:[%s4975_s29 + $0x3f0] sm:$0xff] %v1027_v47  ;;  %v1029_v0 = vpop.f32.mrb[81].mxu1 }
 0x2f0   : > { %3444 = vmatmul.mubr.msk.bf16.gmra.mrb[156].mxu0 %vm380_vm0, %v4752_v42  ;;  %1408 = vst [vmem:[%s4975_s29 + $0x3f8] sm:$0xff] %v1029_v0  ;;  %v1031_v1 = vpop.f32.mrb[82].mxu1 }
 0x2f1   : > { %1800 = vmatprep.mubr.bf16.mxu0 %v4460_v2  ;;  %1410 = vst [vmem:[%s4975_s29 + $0x408] sm:$0xff] %v1031_v1  ;;  %v1033_v10 = vpop.f32.mrb[83].mxu1 }
 0x2f2   : > { %1411 = vst [vmem:[%s4975_s29 + $0x410] sm:$0xff] %v1033_v10  ;;  %v1037_v12 = vpop.f32.mrb[84].mxu1 }
 0x2f3   : > { %1413 = vst [vmem:[%s4975_s29 + $0x420] sm:$0xff] %v1037_v12  ;;  %v1039_v42 = vpop.f32.mrb[85].mxu1 }
 0x2f4   : > { %4120 = vmatmul.mubr.msk.bf16.gmra.mrb[112].mxu1 %vm380_vm0, %v4799_v3  ;;  %1414 = vst [vmem:[%s4975_s29 + $0x428] sm:$0xff] %v1039_v42  ;;  %v1041_v14 = vpop.f32.mrb[86].mxu1  ;;  %v5213_v3 = vld [vmem:[%s5853_s1 + $0x48] sm:$0xff]  }
 0x2f5   : > { %4123 = vmatprep.mubr.msk.bf16.mxu1 %vm380_vm0, %v4812_v4  ;;  %1416 = vst [vmem:[%s4975_s29 + $0x438] sm:$0xff] %v1041_v14  ;;  %v1043_v17 = vpop.f32.mrb[87].mxu1 }
 0x2f6   : > { %1417 = vst [vmem:[%s4975_s29 + $0x440] sm:$0xff] %v1043_v17  ;;  %v1047_v18 = vpop.f32.mrb[88].mxu1 }
 0x2f7   : > { %1419 = vst [vmem:[%s4975_s29 + $0x450] sm:$0xff] %v1047_v18  ;;  %v1049_v19 = vpop.f32.mrb[89].mxu1 }
 0x2f8   : > { %3445 = vmatmul.mubr.msk.bf16.gmra.mrb[160].mxu0 %vm380_vm0, %v5213_v3  ;;  %1420 = vst [vmem:[%s4975_s29 + $0x458] sm:$0xff] %v1049_v19  ;;  %v1051_v48 = vpop.f32.mrb[90].mxu1 }
 0x2f9   : > { %1810 = vmatprep.mubr.bf16.mxu0 %v4460_v2  ;;  %1422 = vst [vmem:[%s4975_s29 + $0x468] sm:$0xff] %v1051_v48  ;;  %v1053_v49 = vpop.f32.mrb[91].mxu1 }
 0x2fa   : > { %1423 = vst [vmem:[%s4975_s29 + $0x470] sm:$0xff] %v1053_v49 }
 0x2fc   : > { %4124 = vmatmul.mubr.msk.bf16.gmra.mrb[116].mxu1 %vm380_vm0, %v4824_v5 }
 0x2fd   : > { %4127 = vmatprep.mubr.msk.bf16.mxu1 %vm380_vm0, %v4836_v6 }
 0x300   : > { %3446 = vmatmul.mubr.msk.bf16.gmra.mrb[164].mxu0 %vm380_vm0, %v5229_v50 }
 0x301   : > { %1820 = vmatprep.mubr.bf16.mxu0 %v4460_v2 }
 0x304   : > { %4128 = vmatmul.mubr.msk.bf16.gmra.mrb[120].mxu1 %vm380_vm0, %v4848_v7 }
 0x305   : > { %4131 = vmatprep.mubr.msk.bf16.mxu1 %vm380_vm0, %v4853_v9  ;;  %v5284_v9 = vld [vmem:[%s5853_s1 + $0x80] sm:$0xff]  }
 0x308   : > { %3447 = vmatmul.mubr.msk.bf16.gmra.mrb[168].mxu0 %vm380_vm0, %v5241_v51 }
 0x309   : > { %1830 = vmatprep.mubr.bf16.mxu0 %v4460_v2 }
 0x30c   : > { %4132 = vmatmul.mubr.msk.bf16.gmra.mrb[124].mxu1 %vm380_vm0, %v4865_v11  ;;  %v4373_v11 = vld [vmem:[%s5854_s2 + $0x50] ss:$12 sps:$4 sm:$0xff]  }
 0x30d   : > { %4135 = vmatprep.mubr.msk.bf16.mxu1 %vm380_vm0, %v4870_v13  ;;  %v4350_v13 = vld [vmem:[%s4566_s11 + $0x70] sm:$0xff]  }
 0x310   : > { %3448 = vmatmul.mubr.msk.bf16.gmra.mrb[172].mxu0 %vm380_vm0, %v4812_v4  ;;  %v4348_v4 = vld [vmem:[%s4566_s11 + $0x60] sm:$0xff]  }
 0x311   : > { %1840 = vmatprep.mubr.bf16.mxu0 %v4460_v2 }
 0x314   : > { %4136 = vmatmul.mubr.msk.bf16.gmra.mrb[128].mxu1 %vm380_vm0, %v4882_v15  ;;  %v5301_v15 = vld [vmem:[%s5853_s1 + $0x88] sm:$0xff]  }
 0x315   : > { %4139 = vmatprep.mubr.msk.bf16.mxu1 %vm380_vm0, %v4887_v16  ;;  %v4375_v16 = vld [vmem:[%s5854_s2 + $0x68] ss:$12 sps:$4 sm:$0xff]  }
 0x318   : > { %3449 = vmatmul.mubr.msk.bf16.gmra.mrb[176].mxu0 %vm380_vm0, %v4824_v5  ;;  %v4370_v5 = vld [vmem:[%s5854_s2 + $0x20] ss:$12 sps:$4 sm:$0xff]  }
 0x319   : > { %1850 = vmatprep.mubr.bf16.mxu0 %v4460_v2 }
 0x31c   : > { %4140 = vmatmul.mubr.msk.bf16.gmra.mrb[132].mxu1 %vm380_vm0, %v4899_v43  ;;  %v4376_v43 = vld [vmem:[%s5854_s2 + $0x80] ss:$12 sps:$4 sm:$0xff]  }
 0x31d   : > { %4143 = vmatprep.mubr.msk.bf16.mxu1 %vm380_vm0, %v4904_v44  ;;  %v4351_v44 = vld [vmem:[%s4566_s11 + $0x78] sm:$0xff]  }
 0x320   : > { %3450 = vmatmul.mubr.msk.bf16.gmra.mrb[180].mxu0 %vm380_vm0, %v4836_v6  ;;  %v4349_v6 = vld [vmem:[%s4566_s11 + $0x68] sm:$0xff]  }
 0x321   : > { %1860 = vmatprep.mubr.bf16.mxu0 %v4460_v2 }
 0x324   : > { %4144 = vmatmul.mubr.msk.bf16.gmra.mrb[136].mxu1 %vm380_vm0, %v4916_v45  ;;  %v5318_v45 = vld [vmem:[%s5853_s1 + $0x90] sm:$0xff]  }
 0x325   : > { %2414 = vmatprep.mubr.bf16.mxu1 %v4460_v2 }
 0x328   : > { %3451 = vmatmul.mubr.msk.bf16.gmra.mrb[184].mxu0 %vm380_vm0, %v4848_v7  ;;  %v4372_v7 = vld [vmem:[%s5854_s2 + $0x38] ss:$12 sps:$4 sm:$0xff]  }
 0x329   : > { %1870 = vmatprep.mubr.bf16.mxu0 %v4460_v2 }
 0x32c   : > { %3646 = vmatmul.mubr.msk.bf16.vlgmr.msra.gmra.mrb[140].mxu1 %vm380_vm0, %v4348_v4 }
 0x32d   : > { %2424 = vmatprep.mubr.bf16.mxu1 %v4460_v2  ;;  %4148 = vmatpush3.bf16.msra.mxu1 %v5166_v23 }
 0x32e   : > { %4149 = vmatprep.subr.bf16.mxu1 %v4370_v5 }
 0x330   : > { %3452 = vmatmul.mubr.msk.bf16.gmra.mrb[188].mxu0 %vm380_vm0, %v5284_v9 }
 0x331   : > { %4150 = vmatpush3.bf16.msra.mxu1 %v4370_v5  ;;  %1880 = vmatprep.mubr.bf16.mxu0 %v4460_v2 }
 0x332   : > { %4151 = vmatprep.subr.bf16.mxu1 %v4372_v7 }
 0x334   : > { %3647 = vmatmul.mubr.msk.bf16.gmra.mrb[144].mxu1 %vm380_vm0, %v4349_v6 }
 0x335   : > { %2434 = vmatprep.mubr.bf16.mxu1 %v4460_v2  ;;  %4152 = vmatpush3.bf16.msra.mxu1 %v4372_v7 }
 0x336   : > { %4153 = vmatprep.subr.bf16.mxu1 %v4373_v11 }
 0x338   : > { %3453 = vmatmul.mubr.msk.bf16.gmra.mrb[192].mxu0 %vm380_vm0, %v5301_v15 }
 0x339   : > { %4154 = vmatpush3.bf16.msra.mxu1 %v4373_v11  ;;  %1890 = vmatprep.mubr.bf16.mxu0 %v4460_v2 }
 0x33a   : > { %4155 = vmatprep.subr.bf16.mxu1 %v4375_v16 }
 0x33c   : > { %3648 = vmatmul.mubr.msk.bf16.gmra.mrb[148].mxu1 %vm380_vm0, %v4350_v13 }
 0x33d   : > { %2444 = vmatprep.mubr.bf16.mxu1 %v4460_v2  ;;  %4156 = vmatpush3.bf16.msra.mxu1 %v4375_v16 }
 0x33e   : > { %4157 = vmatprep.subr.bf16.mxu1 %v4376_v43 }
 0x340   : > { %3454 = vmatmul.mubr.msk.bf16.gmra.mrb[196].mxu0 %vm380_vm0, %v5318_v45 }
 0x341   : > { %4158 = vmatpush3.bf16.msra.mxu1 %v4376_v43  ;;  %1900 = vmatprep.mubr.bf16.mxu0 %v4460_v2 }
 0x344   : > { %3649 = vmatmul.mubr.msk.bf16.gmra.mrb[152].mxu1 %vm380_vm0, %v4351_v44 }
 0x345   : > { %2454 = vmatprep.mubr.bf16.mxu1 %v4460_v2 }
 0x348   : > { %3455 = vmatmul.mubr.msk.bf16.gmra.mrb[200].mxu0 %vm380_vm0, %v5329_v36 }
 0x349   : > { %1910 = vmatprep.mubr.bf16.mxu0 %v4460_v2 }
 0x34c   : > { %3650 = vmatmul.mubr.msk.bf16.gmra.mrb[156].mxu1 %vm380_vm0, %v4352_v52 }
 0x34d   : > { %2464 = vmatprep.mubr.bf16.mxu1 %v4460_v2 }
 0x350   : > { %3456 = vmatmul.mubr.msk.bf16.gmra.mrb[204].mxu0 %vm380_vm0, %v5340_v53 }
 0x351   : > { %1920 = vmatprep.mubr.bf16.mxu0 %v4460_v2 }
 0x354   : > { %3651 = vmatmul.mubr.msk.bf16.gmra.mrb[160].mxu1 %vm380_vm0, %v4353_v38 }
 0x355   : > { %4159 = vmatprep.mubr.msk.bf16.mxu1 %vm380_vm0, %v4348_v4 }
 0x358   : > { %3457 = vmatmul.mubr.msk.bf16.gmra.mrb[208].mxu0 %vm380_vm0, %v5350_v54 }
 0x359   : > { %1930 = vmatprep.mubr.bf16.mxu0 %v4460_v2 }
 0x35c   : > { %4160 = vmatmul.mubr.msk.bf16.vlgmr.msra.gmra.mrb[164].mxu1 %vm380_vm0, %v4349_v6 }
 0x35d   : > { %4163 = vmatprep.mubr.msk.bf16.mxu1 %vm380_vm0, %v4350_v13 }
 0x360   : > { %3458 = vmatmul.mubr.msk.bf16.gmra.mrb[212].mxu0 %vm380_vm0, %v5360_v55 }
 0x361   : > { %1940 = vmatprep.mubr.bf16.mxu0 %v4460_v2 }
 0x364   : > { %4164 = vmatmul.mubr.msk.bf16.gmra.mrb[168].mxu1 %vm380_vm0, %v4351_v44 }
 0x365   : > { %4167 = vmatprep.mubr.msk.bf16.mxu1 %vm380_vm0, %v4352_v52 }
 0x368   : > { %3459 = vmatmul.mubr.msk.bf16.gmra.mrb[216].mxu0 %vm380_vm0, %v5370_v56 }
 0x369   : > { %4183 = vmatprep.mubr.msk.bf16.mxu0 %vm380_vm0, %v5377_v57 }
 0x36c   : > { %4168 = vmatmul.mubr.msk.bf16.gmra.mrb[172].mxu1 %vm380_vm0, %v4353_v38 }
 0x36d   : > { %2606 = vmatprep.mubr.bf16.mxu1 %v4460_v2 }
 0x39f   : > { %v4101_v58 = vpop.f32.mrb[92].mxu1 }
 0x3a0   : > { %3492 = vst [vmem:[%s4975_s29 + $0x4c0] sm:$0xff] %v4101_v58  ;;  %v1985_v40 = vpop.f32.mrb[93].mxu1 }
 0x3a1   : > { %3486 = vst [vmem:[%s4975_s29 + $0x490] sm:$0xff] %v1985_v40  ;;  %v4102_v35 = vpop.f32.mrb[94].mxu1 }
 0x3a2   : > { %3495 = vst [vmem:[%s4975_s29 + $0x4d8] sm:$0xff] %v4102_v35  ;;  %v1988_v59 = vpop.f32.mrb[95].mxu1 }
 0x3a3   : > { %3489 = vst [vmem:[%s4975_s29 + $0x4a8] sm:$0xff] %v1988_v59 }
 0x3a7   : > { %v4105_v60 = vpop.f32.mrb[96].mxu1 }
 0x3a8   : > { %3504 = vst [vmem:[%s4975_s29 + $0x520] sm:$0xff] %v4105_v60  ;;  %v2001_v61 = vpop.f32.mrb[97].mxu1 }
 0x3a9   : > { %3498 = vst [vmem:[%s4975_s29 + $0x4f0] sm:$0xff] %v2001_v61  ;;  %v4106_v62 = vpop.f32.mrb[98].mxu1 }
 0x3aa   : > { %3507 = vst [vmem:[%s4975_s29 + $0x538] sm:$0xff] %v4106_v62  ;;  %v2004_v63 = vpop.f32.mrb[99].mxu1 }
 0x3ab   : > { %3501 = vst [vmem:[%s4975_s29 + $0x508] sm:$0xff] %v2004_v63 }
 0x3af   : > { %v4109_v37 = vpop.f32.mrb[100].mxu1 }
 0x3b0   : > { %3516 = vst [vmem:[%s4975_s29 + $0x580] sm:$0xff] %v4109_v37  ;;  %v2017_v8 = vpop.f32.mrb[101].mxu1 }
 0x3b1   : > { %3510 = vst [vmem:[%s4975_s29 + $0x550] sm:$0xff] %v2017_v8  ;;  %v4110_v20 = vpop.f32.mrb[102].mxu1 }
 0x3b2   : > { %3519 = vst [vmem:[%s4975_s29 + $0x598] sm:$0xff] %v4110_v20  ;;  %v2020_v21 = vpop.f32.mrb[103].mxu1 }
 0x3b3   : > { %3513 = vst [vmem:[%s4975_s29 + $0x568] sm:$0xff] %v2020_v21 }
 0x3b7   : > { %v4113_v22 = vpop.f32.mrb[104].mxu1 }
 0x3b8   : > { %3528 = vst [vmem:[%s4975_s29 + $0x5e0] sm:$0xff] %v4113_v22  ;;  %v2033_v23 = vpop.f32.mrb[105].mxu1 }
 0x3b9   : > { %3522 = vst [vmem:[%s4975_s29 + $0x5b0] sm:$0xff] %v2033_v23  ;;  %v4114_v39 = vpop.f32.mrb[106].mxu1 }
 0x3ba   : > { %3531 = vst [vmem:[%s4975_s29 + $0x5f8] sm:$0xff] %v4114_v39  ;;  %v2036_v34 = vpop.f32.mrb[107].mxu1 }
 0x3bb   : > { %3525 = vst [vmem:[%s4975_s29 + $0x5c8] sm:$0xff] %v2036_v34 }
 0x3bf   : > { %v4117_v24 = vpop.f32.mrb[108].mxu1 }
 0x3c0   : > { %3540 = vst [vmem:[%s4975_s29 + $0x640] sm:$0xff] %v4117_v24  ;;  %v2049_v25 = vpop.f32.mrb[109].mxu1 }
 0x3c1   : > { %3534 = vst [vmem:[%s4975_s29 + $0x610] sm:$0xff] %v2049_v25  ;;  %v4118_v26 = vpop.f32.mrb[110].mxu1 }
 0x3c2   : > { %3543 = vst [vmem:[%s4975_s29 + $0x658] sm:$0xff] %v4118_v26  ;;  %v2052_v27 = vpop.f32.mrb[111].mxu1 }
 0x3c3   : > { %3537 = vst [vmem:[%s4975_s29 + $0x628] sm:$0xff] %v2052_v27 }
 0x3c7   : > { %v4121_v28 = vpop.f32.mrb[112].mxu1 }
 0x3c8   : > { %3552 = vst [vmem:[%s4975_s29 + $0x6a0] sm:$0xff] %v4121_v28  ;;  %v2065_v29 = vpop.f32.mrb[113].mxu1 }
 0x3c9   : > { %3546 = vst [vmem:[%s4975_s29 + $0x670] sm:$0xff] %v2065_v29  ;;  %v4122_v30 = vpop.f32.mrb[114].mxu1 }
 0x3ca   : > { %3555 = vst [vmem:[%s4975_s29 + $0x6b8] sm:$0xff] %v4122_v30  ;;  %v2068_v31 = vpop.f32.mrb[115].mxu1 }
 0x3cb   : > { %3549 = vst [vmem:[%s4975_s29 + $0x688] sm:$0xff] %v2068_v31 }
 0x3cf   : > { %v4125_v32 = vpop.f32.mrb[116].mxu1 }
 0x3d0   : > { %3564 = vst [vmem:[%s4975_s29 + $0x700] sm:$0xff] %v4125_v32  ;;  %v2081_v41 = vpop.f32.mrb[117].mxu1  ;;  %v1712_v32 = vpop.f32.mrb[124].mxu0 }
 0x3d1   : > { %3558 = vst [vmem:[%s4975_s29 + $0x6d0] sm:$0xff] %v2081_v41  ;;  %v4126_v33 = vpop.f32.mrb[118].mxu1  ;;  %3484 = vst [vmem:[%s4975_s29 + $0x480] sm:$0xff] %v1712_v32 }
 0x3d2   : > { %3567 = vst [vmem:[%s4975_s29 + $0x718] sm:$0xff] %v4126_v33  ;;  %v2084_v46 = vpop.f32.mrb[119].mxu1 }
 0x3d3   : > { %3561 = vst [vmem:[%s4975_s29 + $0x6e8] sm:$0xff] %v2084_v46  ;;  %v1714_v46 = vpop.f32.mrb[125].mxu0 }
 0x3d4   : > { %3485 = vst [vmem:[%s4975_s29 + $0x488] sm:$0xff] %v1714_v46 }
 0x3d7   : > { %v4129_v47 = vpop.f32.mrb[120].mxu1 }
 0x3d8   : > { %3576 = vst [vmem:[%s4975_s29 + $0x760] sm:$0xff] %v4129_v47  ;;  %v2097_v0 = vpop.f32.mrb[121].mxu1 }
 0x3d9   : > { %3570 = vst [vmem:[%s4975_s29 + $0x730] sm:$0xff] %v2097_v0  ;;  %v4130_v1 = vpop.f32.mrb[122].mxu1  ;;  %v1716_v0 = vpop.f32.mrb[126].mxu0 }
 0x3da   : > { %3579 = vst [vmem:[%s4975_s29 + $0x778] sm:$0xff] %v4130_v1  ;;  %v2100_v10 = vpop.f32.mrb[123].mxu1  ;;  %3487 = vst [vmem:[%s4975_s29 + $0x498] sm:$0xff] %v1716_v0  ;;  %v1718_v1 = vpop.f32.mrb[127].mxu0 }
 0x3db   : > { %3573 = vst [vmem:[%s4975_s29 + $0x748] sm:$0xff] %v2100_v10  ;;  %3488 = vst [vmem:[%s4975_s29 + $0x4a0] sm:$0xff] %v1718_v1 }
 0x3df   : > { %v4133_v12 = vpop.f32.mrb[124].mxu1 }
 0x3e0   : > { %3588 = vst [vmem:[%s4975_s29 + $0x7c0] sm:$0xff] %v4133_v12  ;;  %v2113_v42 = vpop.f32.mrb[125].mxu1 }
 0x3e1   : > { %3582 = vst [vmem:[%s4975_s29 + $0x790] sm:$0xff] %v2113_v42  ;;  %v4134_v14 = vpop.f32.mrb[126].mxu1 }
 0x3e2   : > { %3591 = vst [vmem:[%s4975_s29 + $0x7d8] sm:$0xff] %v4134_v14  ;;  %v2116_v17 = vpop.f32.mrb[127].mxu1  ;;  %v1722_v14 = vpop.f32.mrb[128].mxu0 }
 0x3e3   : > { %3585 = vst [vmem:[%s4975_s29 + $0x7a8] sm:$0xff] %v2116_v17  ;;  %3490 = vst [vmem:[%s4975_s29 + $0x4b0] sm:$0xff] %v1722_v14 }
 0x3e7   : > { %v4137_v18 = vpop.f32.mrb[128].mxu1 }
 0x3e8   : > { %3600 = vst [vmem:[%s4975_s29 + $0x820] sm:$0xff] %v4137_v18  ;;  %v2129_v19 = vpop.f32.mrb[129].mxu1 }
 0x3e9   : > { %3594 = vst [vmem:[%s4975_s29 + $0x7f0] sm:$0xff] %v2129_v19  ;;  %v4138_v48 = vpop.f32.mrb[130].mxu1  ;;  %v1724_v19 = vpop.f32.mrb[129].mxu0 }
 0x3ea   : > { %3603 = vst [vmem:[%s4975_s29 + $0x838] sm:$0xff] %v4138_v48  ;;  %v2132_v49 = vpop.f32.mrb[131].mxu1  ;;  %3491 = vst [vmem:[%s4975_s29 + $0x4b8] sm:$0xff] %v1724_v19 }
 0x3eb   : > { %3597 = vst [vmem:[%s4975_s29 + $0x808] sm:$0xff] %v2132_v49  ;;  %v1726_v49 = vpop.f32.mrb[130].mxu0 }
 0x3ec   : > { %3493 = vst [vmem:[%s4975_s29 + $0x4c8] sm:$0xff] %v1726_v49 }
 0x3ef   : > { %v4141_v4 = vpop.f32.mrb[132].mxu1 }
 0x3f0   : > { %3612 = vst [vmem:[%s4975_s29 + $0x880] sm:$0xff] %v4141_v4  ;;  %v2145_v5 = vpop.f32.mrb[133].mxu1  ;;  %v1728_v4 = vpop.f32.mrb[131].mxu0 }
 0x3f1   : > { %3606 = vst [vmem:[%s4975_s29 + $0x850] sm:$0xff] %v2145_v5  ;;  %v4142_v6 = vpop.f32.mrb[134].mxu1  ;;  %3494 = vst [vmem:[%s4975_s29 + $0x4d0] sm:$0xff] %v1728_v4 }
 0x3f2   : > { %3615 = vst [vmem:[%s4975_s29 + $0x898] sm:$0xff] %v4142_v6  ;;  %v2148_v7 = vpop.f32.mrb[135].mxu1 }
 0x3f3   : > { %3609 = vst [vmem:[%s4975_s29 + $0x868] sm:$0xff] %v2148_v7 }
 0x3f7   : > { %v4145_v11 = vpop.f32.mrb[136].mxu1 }
 0x3f8   : > { %3624 = vst [vmem:[%s4975_s29 + $0x8e0] sm:$0xff] %v4145_v11  ;;  %v2161_v13 = vpop.f32.mrb[137].mxu1  ;;  %v1732_v11 = vpop.f32.mrb[132].mxu0 }
 0x3f9   : > { %3618 = vst [vmem:[%s4975_s29 + $0x8b0] sm:$0xff] %v2161_v13  ;;  %v4146_v16 = vpop.f32.mrb[138].mxu1  ;;  %3496 = vst [vmem:[%s4975_s29 + $0x4e0] sm:$0xff] %v1732_v11 }
 0x3fa   : > { %3627 = vst [vmem:[%s4975_s29 + $0x8f8] sm:$0xff] %v4146_v16  ;;  %v2164_v43 = vpop.f32.mrb[139].mxu1 }
 0x3fb   : > { %3621 = vst [vmem:[%s4975_s29 + $0x8c8] sm:$0xff] %v2164_v43  ;;  %v1734_v43 = vpop.f32.mrb[133].mxu0 }
 0x3fc   : > { %3497 = vst [vmem:[%s4975_s29 + $0x4e8] sm:$0xff] %v1734_v43 }
 0x3ff   : > { %v2416_v44 = vpop.f32.mrb[140].mxu1 }
 0x400   : > { %v2418_v52 = vpop.f32.mrb[141].mxu1 }
 0x401   : > { %v2420_v38 = vpop.f32.mrb[142].mxu1 }
 0x402   : > { %v2556_v58 = vpack.c.bf16 %v2420_v38, %v2416_v44  ;;  %v2422_v40 = vpop.f32.mrb[143].mxu1 }
 0x403   : > { %v2557_v35 = vpack.c.bf16 %v2422_v40, %v2418_v52  ;;  %v1736_v52 = vpop.f32.mrb[134].mxu0 }
 0x404   : > { %3499 = vst [vmem:[%s4975_s29 + $0x4f8] sm:$0xff] %v1736_v52  ;;  %v1738_v38 = vpop.f32.mrb[135].mxu0 }
 0x405   : > { %2574 = vmatprep.subr.bf16.mxu1 %v2557_v35  ;;  %3500 = vst [vmem:[%s4975_s29 + $0x500] sm:$0xff] %v1738_v38  ;;  %v4384_v35 = vld [vmem:[%s5853_s1 + $0x8] sm:$0xff]  }
 0x406   : > { %2575 = vmatpush1.bf16.msra.mxu1 %v2556_v58 }
 0x407   : > { %v2426_v59 = vpop.f32.mrb[144].mxu1 }
 0x408   : > { %v2428_v60 = vpop.f32.mrb[145].mxu1 }
 0x409   : > { %v2430_v61 = vpop.f32.mrb[146].mxu1 }
 0x40a   : > { %v2559_v62 = vpack.c.bf16 %v2430_v61, %v2426_v59  ;;  %v2432_v63 = vpop.f32.mrb[147].mxu1  ;;  %v1742_v59 = vpop.f32.mrb[136].mxu0 }
 0x40b   : > { %v2560_v37 = vpack.c.bf16 %v2432_v63, %v2428_v60  ;;  %3502 = vst [vmem:[%s4975_s29 + $0x510] sm:$0xff] %v1742_v59 }
 0x40d   : > { %2576 = vmatprep.subr.bf16.mxu1 %v2560_v37 }
 0x40e   : > { %2577 = vmatpush1.bf16.msra.mxu1 %v2559_v62  ;;  %v1744_v62 = vpop.f32.mrb[137].mxu0 }
 0x40f   : > { %v2436_v8 = vpop.f32.mrb[148].mxu1  ;;  %3503 = vst [vmem:[%s4975_s29 + $0x518] sm:$0xff] %v1744_v62  ;;  %v1746_v37 = vpop.f32.mrb[138].mxu0  ;;  %v4394_v62 = vld [vmem:[%s5853_s1 + $0x70] sm:$0xff]  }
 0x410   : > { %v2438_v20 = vpop.f32.mrb[149].mxu1  ;;  %3505 = vst [vmem:[%s4975_s29 + $0x528] sm:$0xff] %v1746_v37 }
 0x411   : > { %v2440_v21 = vpop.f32.mrb[150].mxu1 }
 0x412   : > { %v2562_v22 = vpack.c.bf16 %v2440_v21, %v2436_v8  ;;  %v2442_v23 = vpop.f32.mrb[151].mxu1  ;;  %v1748_v8 = vpop.f32.mrb[139].mxu0 }
 0x413   : > { %v2563_v39 = vpack.c.bf16 %v2442_v23, %v2438_v20  ;;  %3506 = vst [vmem:[%s4975_s29 + $0x530] sm:$0xff] %v1748_v8  ;;  %v4395_v8 = vld [vmem:[%s5853_s1 + $0x78] sm:$0xff]  }
 0x415   : > { %2578 = vmatprep.subr.bf16.mxu1 %v2563_v39  ;;  %v1752_v39 = vpop.f32.mrb[140].mxu0 }
 0x416   : > { %2579 = vmatpush1.bf16.msra.mxu1 %v2562_v22  ;;  %v4385_v22 = vld [vmem:[%s5853_s1 + $0x10] sm:$0xff]   ;;  %3508 = vst [vmem:[%s4975_s29 + $0x540] sm:$0xff] %v1752_v39 }
 0x417   : > { %v2446_v34 = vpop.f32.mrb[152].mxu1 }
 0x418   : > { %v2448_v24 = vpop.f32.mrb[153].mxu1 }
 0x419   : > { %v2450_v25 = vpop.f32.mrb[154].mxu1 }
 0x41a   : > { %v2565_v26 = vpack.c.bf16 %v2450_v25, %v2446_v34  ;;  %v2452_v27 = vpop.f32.mrb[155].mxu1  ;;  %v1754_v25 = vpop.f32.mrb[141].mxu0 }
 0x41b   : > { %v2566_v28 = vpack.c.bf16 %v2452_v27, %v2448_v24  ;;  %3509 = vst [vmem:[%s4975_s29 + $0x548] sm:$0xff] %v1754_v25  ;;  %v1756_v27 = vpop.f32.mrb[142].mxu0 }
 0x41c   : > { %3511 = vst [vmem:[%s4975_s29 + $0x558] sm:$0xff] %v1756_v27 }
 0x41d   : > { %2580 = vmatprep.subr.bf16.mxu1 %v2566_v28  ;;  %v1758_v28 = vpop.f32.mrb[143].mxu0 }
 0x41e   : > { %2581 = vmatpush1.bf16.msra.mxu1 %v2565_v26  ;;  %3512 = vst [vmem:[%s4975_s29 + $0x560] sm:$0xff] %v1758_v28 }
 0x41f   : > { %v2456_v29 = vpop.f32.mrb[156].mxu1 }
 0x420   : > { %v2458_v30 = vpop.f32.mrb[157].mxu1 }
 0x421   : > { %v2460_v31 = vpop.f32.mrb[158].mxu1 }
 0x422   : > { %v2568_v41 = vpack.c.bf16 %v2460_v31, %v2456_v29  ;;  %v2462_v33 = vpop.f32.mrb[159].mxu1  ;;  %v4386_v29 = vld [vmem:[%s5853_s1 + $0x18] sm:$0xff]  }
 0x423   : > { %v2569_v47 = vpack.c.bf16 %v2462_v33, %v2458_v30  ;;  %v1762_v30 = vpop.f32.mrb[144].mxu0  ;;  %v4387_v33 = vld [vmem:[%s5853_s1 + $0x20] sm:$0xff]  }
 0x424   : > { %3514 = vst [vmem:[%s4975_s29 + $0x570] sm:$0xff] %v1762_v30  ;;  %v1764_v31 = vpop.f32.mrb[145].mxu0 }
 0x425   : > { %2582 = vmatprep.subr.bf16.mxu1 %v2569_v47  ;;  %3515 = vst [vmem:[%s4975_s29 + $0x578] sm:$0xff] %v1764_v31  ;;  %v1766_v32 = vpop.f32.mrb[146].mxu0 }
 0x426   : > { %2583 = vmatpush1.bf16.msra.mxu1 %v2568_v41  ;;  %3517 = vst [vmem:[%s4975_s29 + $0x588] sm:$0xff] %v1766_v32  ;;  %v1768_v41 = vpop.f32.mrb[147].mxu0 }
 0x427   : > { %v2466_v10 = vpop.f32.mrb[160].mxu1  ;;  %3518 = vst [vmem:[%s4975_s29 + $0x590] sm:$0xff] %v1768_v41  ;;  %v1772_v46 = vpop.f32.mrb[148].mxu0 }
 0x428   : > { %v2468_v12 = vpop.f32.mrb[161].mxu1  ;;  %3520 = vst [vmem:[%s4975_s29 + $0x5a0] sm:$0xff] %v1772_v46  ;;  %v1774_v47 = vpop.f32.mrb[149].mxu0 }
 0x429   : > { %v2470_v42 = vpop.f32.mrb[162].mxu1  ;;  %3521 = vst [vmem:[%s4975_s29 + $0x5a8] sm:$0xff] %v1774_v47  ;;  %v1776_v0 = vpop.f32.mrb[150].mxu0 }
 0x42a   : > { %v2571_v17 = vpack.c.bf16 %v2470_v42, %v2466_v10  ;;  %v2472_v18 = vpop.f32.mrb[163].mxu1  ;;  %3523 = vst [vmem:[%s4975_s29 + $0x5b8] sm:$0xff] %v1776_v0  ;;  %v1778_v1 = vpop.f32.mrb[151].mxu0  ;;  %v4388_v10 = vld [vmem:[%s5853_s1 + $0x28] sm:$0xff]  }
 0x42b   : > { %v2572_v48 = vpack.c.bf16 %v2472_v18, %v2468_v12  ;;  %3524 = vst [vmem:[%s4975_s29 + $0x5c0] sm:$0xff] %v1778_v1  ;;  %v1782_v12 = vpop.f32.mrb[152].mxu0  ;;  %v4389_v18 = vld [vmem:[%s5853_s1 + $0x30] sm:$0xff]  }
 0x42c   : > { %3526 = vst [vmem:[%s4975_s29 + $0x5d0] sm:$0xff] %v1782_v12  ;;  %v1784_v42 = vpop.f32.mrb[153].mxu0 }
 0x42d   : > { %2584 = vmatprep.subr.bf16.mxu1 %v2572_v48  ;;  %3527 = vst [vmem:[%s4975_s29 + $0x5d8] sm:$0xff] %v1784_v42  ;;  %v1786_v14 = vpop.f32.mrb[154].mxu0 }
 0x42e   : > { %2585 = vmatpush1.bf16.msra.mxu1 %v2571_v17  ;;  %3529 = vst [vmem:[%s4975_s29 + $0x5e8] sm:$0xff] %v1786_v14  ;;  %v1788_v17 = vpop.f32.mrb[155].mxu0 }
 0x42f   : > { %v4161_v5 = vpop.f32.mrb[164].mxu1  ;;  %3530 = vst [vmem:[%s4975_s29 + $0x5f0] sm:$0xff] %v1788_v17  ;;  %v1792_v19 = vpop.f32.mrb[156].mxu0 }
 0x430   : > { %v2509_v6 = vpop.f32.mrb[165].mxu1  ;;  %3532 = vst [vmem:[%s4975_s29 + $0x600] sm:$0xff] %v1792_v19  ;;  %v1794_v48 = vpop.f32.mrb[157].mxu0 }
 0x431   : > { %v4162_v7 = vpop.f32.mrb[166].mxu1  ;;  %3658 = vmatmul.mubr.msk.bf16.vlgmr.msra.gmra.mrb[176].mxu1 %vm380_vm0, %v5377_v57  ;;  %3533 = vst [vmem:[%s4975_s29 + $0x608] sm:$0xff] %v1794_v48  ;;  %v1796_v49 = vpop.f32.mrb[158].mxu0 }
 0x432   : > { %v2561_v13 = vpack.c.bf16 %v4162_v7, %v4161_v5  ;;  %v2512_v16 = vpop.f32.mrb[167].mxu1  ;;  %2616 = vmatprep.mubr.bf16.mxu1 %v4460_v2  ;;  %3535 = vst [vmem:[%s4975_s29 + $0x618] sm:$0xff] %v1796_v49  ;;  %v1798_v4 = vpop.f32.mrb[159].mxu0  ;;  %v4390_v5 = vld [vmem:[%s5853_s1 + $0x38] sm:$0xff]  }
 0x433   : > { %v2558_v44 = vpack.c.bf16 %v2512_v16, %v2509_v6  ;;  %3536 = vst [vmem:[%s4975_s29 + $0x620] sm:$0xff] %v1798_v4  ;;  %v4391_v6 = vld [vmem:[%s5853_s1 + $0x40] sm:$0xff]   ;;  %v1802_v7 = vpop.f32.mrb[160].mxu0 }
 0x434   : > { %3538 = vst [vmem:[%s4975_s29 + $0x630] sm:$0xff] %v1802_v7  ;;  %v1804_v11 = vpop.f32.mrb[161].mxu0 }
 0x435   : > { %4171 = vmatprep.subr.bf16.mxu0 %v2558_v44  ;;  %3539 = vst [vmem:[%s4975_s29 + $0x638] sm:$0xff] %v1804_v11 }
 0x436   : > { %4172 = vmatpush3.bf16.msra.mxu0 %v2558_v44 }
 0x437   : > { %4173 = vmatprep.subr.bf16.mxu0 %v2561_v13  ;;  %v4165_v57 = vpop.f32.mrb[168].mxu1 }
 0x438   : > { %v2525_v58 = vpop.f32.mrb[169].mxu1 }
 0x439   : > { %v4166_v40 = vpop.f32.mrb[170].mxu1  ;;  %3659 = vmatmul.mubr.msk.bf16.gmra.mrb[180].mxu1 %vm380_vm0, %v4384_v35 }
 0x43a   : > { %4174 = vmatpush3.bf16.msra.mxu0 %v2561_v13  ;;  %v2567_v60 = vpack.c.bf16 %v4166_v40, %v4165_v57  ;;  %v2528_v61 = vpop.f32.mrb[171].mxu1  ;;  %2626 = vmatprep.mubr.bf16.mxu1 %v4460_v2  ;;  %v1806_v13 = vpop.f32.mrb[162].mxu0 }
 0x43b   : > { %v2564_v63 = vpack.c.bf16 %v2528_v61, %v2525_v58  ;;  %3541 = vst [vmem:[%s4975_s29 + $0x648] sm:$0xff] %v1806_v13  ;;  %v1808_v16 = vpop.f32.mrb[163].mxu0  ;;  %v4393_v61 = vld [vmem:[%s5853_s1 + $0x68] sm:$0xff]  }
 0x43c   : > { %3542 = vst [vmem:[%s4975_s29 + $0x650] sm:$0xff] %v1808_v16  ;;  %v1812_v43 = vpop.f32.mrb[164].mxu0 }
 0x43d   : > { %4175 = vmatprep.subr.bf16.mxu0 %v2564_v63  ;;  %3544 = vst [vmem:[%s4975_s29 + $0x660] sm:$0xff] %v1812_v43  ;;  %v1814_v44 = vpop.f32.mrb[165].mxu0 }
 0x43e   : > { %4176 = vmatpush3.bf16.msra.mxu0 %v2564_v63  ;;  %3545 = vst [vmem:[%s4975_s29 + $0x668] sm:$0xff] %v1814_v44  ;;  %v1816_v52 = vpop.f32.mrb[166].mxu0 }
 0x43f   : > { %4177 = vmatprep.subr.bf16.mxu0 %v2567_v60  ;;  %v4169_v20 = vpop.f32.mrb[172].mxu1  ;;  %3547 = vst [vmem:[%s4975_s29 + $0x678] sm:$0xff] %v1816_v52  ;;  %v1818_v38 = vpop.f32.mrb[167].mxu0 }
 0x440   : > { %v2541_v21 = vpop.f32.mrb[173].mxu1  ;;  %3548 = vst [vmem:[%s4975_s29 + $0x680] sm:$0xff] %v1818_v38  ;;  %v1822_v57 = vpop.f32.mrb[168].mxu0 }
 0x441   : > { %3660 = vmatmul.mubr.msk.bf16.gmra.mrb[184].mxu1 %vm380_vm0, %v4385_v22  ;;  %v4170_v23 = vpop.f32.mrb[174].mxu1  ;;  %3550 = vst [vmem:[%s4975_s29 + $0x690] sm:$0xff] %v1822_v57  ;;  %v1824_v58 = vpop.f32.mrb[169].mxu0 }
 0x442   : > { %4178 = vmatpush3.bf16.msra.mxu0 %v2567_v60  ;;  %v2573_v34 = vpack.c.bf16 %v4170_v23, %v4169_v20  ;;  %v2544_v24 = vpop.f32.mrb[175].mxu1  ;;  %2636 = vmatprep.mubr.bf16.mxu1 %v4460_v2  ;;  %3551 = vst [vmem:[%s4975_s29 + $0x698] sm:$0xff] %v1824_v58  ;;  %v1826_v40 = vpop.f32.mrb[170].mxu0  ;;  %v4392_v60 = vld [vmem:[%s5853_s1 + $0x60] sm:$0xff]  }
 0x443   : > { %v2570_v26 = vpack.c.bf16 %v2544_v24, %v2541_v21  ;;  %3553 = vst [vmem:[%s4975_s29 + $0x6a8] sm:$0xff] %v1826_v40 }
 0x445   : > { %4179 = vmatprep.subr.bf16.mxu0 %v2570_v26 }
 0x446   : > { %4180 = vmatpush3.bf16.msra.mxu0 %v2570_v26 }
 0x447   : > { %4181 = vmatprep.subr.bf16.mxu0 %v2573_v34 }
 0x449   : > { %3661 = vmatmul.mubr.msk.bf16.gmra.mrb[188].mxu1 %vm380_vm0, %v4386_v29 }
 0x44a   : > { %2646 = vmatprep.mubr.bf16.mxu1 %v4460_v2  ;;  %4182 = vmatpush3.bf16.msra.mxu0 %v2573_v34 }
 0x44d   : > { %4184 = vmatmul.mubr.msk.bf16.vlgmr.msra.gmra.mrb[220].mxu0 %vm380_vm0, %v4384_v35  ;;  %v1828_v35 = vpop.f32.mrb[171].mxu0 }
 0x44e   : > { %4187 = vmatprep.mubr.msk.bf16.mxu0 %vm380_vm0, %v4385_v22  ;;  %3554 = vst [vmem:[%s4975_s29 + $0x6b0] sm:$0xff] %v1828_v35  ;;  %v1832_v59 = vpop.f32.mrb[172].mxu0 }
 0x44f   : > { %3556 = vst [vmem:[%s4975_s29 + $0x6c0] sm:$0xff] %v1832_v59 }
 0x451   : > { %3662 = vmatmul.mubr.msk.bf16.gmra.mrb[192].mxu1 %vm380_vm0, %v4387_v33 }
 0x452   : > { %2656 = vmatprep.mubr.bf16.mxu1 %v4460_v2 }
 0x455   : > { %4188 = vmatmul.mubr.msk.bf16.gmra.mrb[224].mxu0 %vm380_vm0, %v4386_v29 }
 0x456   : > { %4191 = vmatprep.mubr.msk.bf16.mxu0 %vm380_vm0, %v4387_v33 }
 0x459   : > { %3663 = vmatmul.mubr.msk.bf16.gmra.mrb[196].mxu1 %vm380_vm0, %v4388_v10 }
 0x45a   : > { %2666 = vmatprep.mubr.bf16.mxu1 %v4460_v2 }
 0x45d   : > { %4192 = vmatmul.mubr.msk.bf16.gmra.mrb[228].mxu0 %vm380_vm0, %v4388_v10 }
 0x45e   : > { %4195 = vmatprep.mubr.msk.bf16.mxu0 %vm380_vm0, %v4389_v18 }
 0x461   : > { %3664 = vmatmul.mubr.msk.bf16.gmra.mrb[200].mxu1 %vm380_vm0, %v4389_v18 }
 0x462   : > { %2676 = vmatprep.mubr.bf16.mxu1 %v4460_v2 }
 0x465   : > { %4196 = vmatmul.mubr.msk.bf16.gmra.mrb[232].mxu0 %vm380_vm0, %v4390_v5 }
 0x466   : > { %4199 = vmatprep.mubr.msk.bf16.mxu0 %vm380_vm0, %v4391_v6 }
 0x469   : > { %3665 = vmatmul.mubr.msk.bf16.gmra.mrb[204].mxu1 %vm380_vm0, %v4390_v5 }
 0x46a   : > { %2686 = vmatprep.mubr.bf16.mxu1 %v4460_v2 }
 0x46d   : > { %4200 = vmatmul.mubr.msk.bf16.gmra.mrb[236].mxu0 %vm380_vm0, %v5213_v3 }
 0x46e   : > { %4203 = vmatprep.mubr.msk.bf16.mxu0 %vm380_vm0, %v5229_v50 }
 0x471   : > { %3666 = vmatmul.mubr.msk.bf16.gmra.mrb[208].mxu1 %vm380_vm0, %v4391_v6 }
 0x472   : > { %2696 = vmatprep.mubr.bf16.mxu1 %v4460_v2 }
 0x475   : > { %4204 = vmatmul.mubr.msk.bf16.gmra.mrb[240].mxu0 %vm380_vm0, %v5241_v51 }
 0x476   : > { %4207 = vmatprep.mubr.msk.bf16.mxu0 %vm380_vm0, %v4392_v60 }
 0x479   : > { %3667 = vmatmul.mubr.msk.bf16.gmra.mrb[212].mxu1 %vm380_vm0, %v5213_v3  ;;  %v1834_v3 = vpop.f32.mrb[173].mxu0 }
 0x47a   : > { %2706 = vmatprep.mubr.bf16.mxu1 %v4460_v2  ;;  %3557 = vst [vmem:[%s4975_s29 + $0x6c8] sm:$0xff] %v1834_v3  ;;  %v1836_v63 = vpop.f32.mrb[174].mxu0 }
 0x47b   : > { %3559 = vst [vmem:[%s4975_s29 + $0x6d8] sm:$0xff] %v1836_v63  ;;  %v1838_v37 = vpop.f32.mrb[175].mxu0 }
 0x47c   : > { %3560 = vst [vmem:[%s4975_s29 + $0x6e0] sm:$0xff] %v1838_v37 }
 0x47d   : > { %4208 = vmatmul.mubr.msk.bf16.gmra.mrb[244].mxu0 %vm380_vm0, %v4393_v61 }
 0x47e   : > { %4211 = vmatprep.mubr.msk.bf16.mxu0 %vm380_vm0, %v4394_v62 }
 0x481   : > { %3668 = vmatmul.mubr.msk.bf16.gmra.mrb[216].mxu1 %vm380_vm0, %v5229_v50  ;;  %v1842_v50 = vpop.f32.mrb[176].mxu0 }
 0x482   : > { %2716 = vmatprep.mubr.bf16.mxu1 %v4460_v2  ;;  %3562 = vst [vmem:[%s4975_s29 + $0x6f0] sm:$0xff] %v1842_v50  ;;  %v1844_v20 = vpop.f32.mrb[177].mxu0 }
 0x483   : > { %3563 = vst [vmem:[%s4975_s29 + $0x6f8] sm:$0xff] %v1844_v20  ;;  %v1846_v21 = vpop.f32.mrb[178].mxu0 }
 0x484   : > { %3565 = vst [vmem:[%s4975_s29 + $0x708] sm:$0xff] %v1846_v21  ;;  %v1848_v22 = vpop.f32.mrb[179].mxu0 }
 0x485   : > { %4212 = vmatmul.mubr.msk.bf16.gmra.mrb[248].mxu0 %vm380_vm0, %v4395_v8  ;;  %3566 = vst [vmem:[%s4975_s29 + $0x710] sm:$0xff] %v1848_v22 }
 0x486   : > { %4215 = vmatprep.mubr.msk.bf16.mxu0 %vm380_vm0, %v5284_v9 }
 0x489   : > { %3669 = vmatmul.mubr.msk.bf16.gmra.mrb[220].mxu1 %vm380_vm0, %v5241_v51  ;;  %v1852_v51 = vpop.f32.mrb[180].mxu0 }
 0x48a   : > { %2726 = vmatprep.mubr.bf16.mxu1 %v4460_v2  ;;  %3568 = vst [vmem:[%s4975_s29 + $0x720] sm:$0xff] %v1852_v51  ;;  %v1854_v23 = vpop.f32.mrb[181].mxu0 }
 0x48b   : > { %3569 = vst [vmem:[%s4975_s29 + $0x728] sm:$0xff] %v1854_v23  ;;  %v1856_v39 = vpop.f32.mrb[182].mxu0 }
 0x48c   : > { %3571 = vst [vmem:[%s4975_s29 + $0x738] sm:$0xff] %v1856_v39  ;;  %v1858_v34 = vpop.f32.mrb[183].mxu0 }
 0x48d   : > { %4216 = vmatmul.mubr.msk.bf16.gmra.mrb[252].mxu0 %vm380_vm0, %v5301_v15  ;;  %3572 = vst [vmem:[%s4975_s29 + $0x740] sm:$0xff] %v1858_v34  ;;  %v1862_v24 = vpop.f32.mrb[184].mxu0 }
 0x48e   : > { %4219 = vmatprep.mubr.msk.bf16.mxu0 %vm380_vm0, %v5318_v45  ;;  %3574 = vst [vmem:[%s4975_s29 + $0x750] sm:$0xff] %v1862_v24  ;;  %v1864_v25 = vpop.f32.mrb[185].mxu0 }
 0x48f   : > { %3575 = vst [vmem:[%s4975_s29 + $0x758] sm:$0xff] %v1864_v25  ;;  %v1866_v26 = vpop.f32.mrb[186].mxu0 }
 0x490   : > { %3577 = vst [vmem:[%s4975_s29 + $0x768] sm:$0xff] %v1866_v26  ;;  %v1868_v27 = vpop.f32.mrb[187].mxu0 }
 0x491   : > { %3670 = vmatmul.mubr.msk.bf16.gmra.mrb[224].mxu1 %vm380_vm0, %v4392_v60  ;;  %3578 = vst [vmem:[%s4975_s29 + $0x770] sm:$0xff] %v1868_v27  ;;  %v1872_v28 = vpop.f32.mrb[188].mxu0 }
 0x492   : > { %2736 = vmatprep.mubr.bf16.mxu1 %v4460_v2  ;;  %3580 = vst [vmem:[%s4975_s29 + $0x780] sm:$0xff] %v1872_v28  ;;  %v1874_v29 = vpop.f32.mrb[189].mxu0 }
 0x493   : > { %3581 = vst [vmem:[%s4975_s29 + $0x788] sm:$0xff] %v1874_v29  ;;  %v1876_v30 = vpop.f32.mrb[190].mxu0 }
 0x494   : > { %3583 = vst [vmem:[%s4975_s29 + $0x798] sm:$0xff] %v1876_v30  ;;  %v1878_v31 = vpop.f32.mrb[191].mxu0 }
 0x495   : > { %4220 = vmatmul.mubr.msk.bf16.gmra.mrb[0].mxu0 %vm380_vm0, %v5329_v36  ;;  %3584 = vst [vmem:[%s4975_s29 + $0x7a0] sm:$0xff] %v1878_v31  ;;  %v1882_v32 = vpop.f32.mrb[192].mxu0 }
 0x496   : > { %4223 = vmatprep.mubr.msk.bf16.mxu0 %vm380_vm0, %v5340_v53  ;;  %3586 = vst [vmem:[%s4975_s29 + $0x7b0] sm:$0xff] %v1882_v32  ;;  %v1884_v41 = vpop.f32.mrb[193].mxu0 }
 0x497   : > { %3587 = vst [vmem:[%s4975_s29 + $0x7b8] sm:$0xff] %v1884_v41  ;;  %v1886_v33 = vpop.f32.mrb[194].mxu0 }
 0x498   : > { %3589 = vst [vmem:[%s4975_s29 + $0x7c8] sm:$0xff] %v1886_v33  ;;  %v1888_v46 = vpop.f32.mrb[195].mxu0 }
 0x499   : > { %3671 = vmatmul.mubr.msk.bf16.gmra.mrb[228].mxu1 %vm380_vm0, %v4393_v61  ;;  %3590 = vst [vmem:[%s4975_s29 + $0x7d0] sm:$0xff] %v1888_v46  ;;  %v1892_v47 = vpop.f32.mrb[196].mxu0 }
 0x49a   : > { %2746 = vmatprep.mubr.bf16.mxu1 %v4460_v2  ;;  %3592 = vst [vmem:[%s4975_s29 + $0x7e0] sm:$0xff] %v1892_v47  ;;  %v1894_v0 = vpop.f32.mrb[197].mxu0 }
 0x49b   : > { %3593 = vst [vmem:[%s4975_s29 + $0x7e8] sm:$0xff] %v1894_v0  ;;  %v1896_v1 = vpop.f32.mrb[198].mxu0 }
 0x49c   : > { %3595 = vst [vmem:[%s4975_s29 + $0x7f8] sm:$0xff] %v1896_v1  ;;  %v1898_v10 = vpop.f32.mrb[199].mxu0 }
 0x49d   : > { %4224 = vmatmul.mubr.msk.bf16.gmra.mrb[4].mxu0 %vm380_vm0, %v5350_v54  ;;  %3596 = vst [vmem:[%s4975_s29 + $0x800] sm:$0xff] %v1898_v10  ;;  %v1902_v12 = vpop.f32.mrb[200].mxu0 }
 0x49e   : > { %4227 = vmatprep.mubr.msk.bf16.mxu0 %vm380_vm0, %v5360_v55  ;;  %3598 = vst [vmem:[%s4975_s29 + $0x810] sm:$0xff] %v1902_v12 }
 0x4a1   : > { %3672 = vmatmul.mubr.msk.bf16.gmra.mrb[232].mxu1 %vm380_vm0, %v4394_v62 }
 0x4a2   : > { %2756 = vmatprep.mubr.bf16.mxu1 %v4460_v2 }
 0x4a5   : > { %4228 = vmatmul.mubr.msk.bf16.gmra.mrb[8].mxu0 %vm380_vm0, %v5370_v56 }
 0x4a9   : > { %3673 = vmatmul.mubr.msk.bf16.gmra.mrb[236].mxu1 %vm380_vm0, %v4395_v8 }
 0x4aa   : > { %2766 = vmatprep.mubr.bf16.mxu1 %v4460_v2 }
 0x4b1   : > { %3674 = vmatmul.mubr.msk.bf16.gmra.mrb[240].mxu1 %vm380_vm0, %v5284_v9  ;;  %v1904_v9 = vpop.f32.mrb[201].mxu0 }
 0x4b2   : > { %2776 = vmatprep.mubr.bf16.mxu1 %v4460_v2  ;;  %3599 = vst [vmem:[%s4975_s29 + $0x818] sm:$0xff] %v1904_v9  ;;  %v1906_v42 = vpop.f32.mrb[202].mxu0 }
 0x4b3   : > { %3601 = vst [vmem:[%s4975_s29 + $0x828] sm:$0xff] %v1906_v42  ;;  %v1908_v14 = vpop.f32.mrb[203].mxu0 }
 0x4b4   : > { %3602 = vst [vmem:[%s4975_s29 + $0x830] sm:$0xff] %v1908_v14  ;;  %v1912_v17 = vpop.f32.mrb[204].mxu0 }
 0x4b5   : > { %3604 = vst [vmem:[%s4975_s29 + $0x840] sm:$0xff] %v1912_v17 }
 0x4b9   : > { %3675 = vmatmul.mubr.msk.bf16.gmra.mrb[244].mxu1 %vm380_vm0, %v5301_v15  ;;  %v1914_v15 = vpop.f32.mrb[205].mxu0 }
 0x4ba   : > { %2786 = vmatprep.mubr.bf16.mxu1 %v4460_v2  ;;  %3605 = vst [vmem:[%s4975_s29 + $0x848] sm:$0xff] %v1914_v15  ;;  %v1916_v18 = vpop.f32.mrb[206].mxu0 }
 0x4bb   : > { %3607 = vst [vmem:[%s4975_s29 + $0x858] sm:$0xff] %v1916_v18  ;;  %v1918_v19 = vpop.f32.mrb[207].mxu0 }
 0x4bc   : > { %3608 = vst [vmem:[%s4975_s29 + $0x860] sm:$0xff] %v1918_v19  ;;  %v1922_v48 = vpop.f32.mrb[208].mxu0 }
 0x4bd   : > { %3610 = vst [vmem:[%s4975_s29 + $0x870] sm:$0xff] %v1922_v48 }
 0x4c1   : > { %3676 = vmatmul.mubr.msk.bf16.gmra.mrb[248].mxu1 %vm380_vm0, %v5318_v45  ;;  %v1924_v45 = vpop.f32.mrb[209].mxu0 }
 0x4c2   : > { %2796 = vmatprep.mubr.bf16.mxu1 %v4460_v2  ;;  %3611 = vst [vmem:[%s4975_s29 + $0x878] sm:$0xff] %v1924_v45  ;;  %v1926_v49 = vpop.f32.mrb[210].mxu0 }
 0x4c3   : > { %3613 = vst [vmem:[%s4975_s29 + $0x888] sm:$0xff] %v1926_v49  ;;  %v1928_v4 = vpop.f32.mrb[211].mxu0 }
 0x4c4   : > { %3614 = vst [vmem:[%s4975_s29 + $0x890] sm:$0xff] %v1928_v4  ;;  %v1932_v5 = vpop.f32.mrb[212].mxu0 }
 0x4c5   : > { %3616 = vst [vmem:[%s4975_s29 + $0x8a0] sm:$0xff] %v1932_v5 }
 0x4c9   : > { %3677 = vmatmul.mubr.msk.bf16.gmra.mrb[252].mxu1 %vm380_vm0, %v5329_v36  ;;  %v1934_v36 = vpop.f32.mrb[213].mxu0 }
 0x4ca   : > { %2806 = vmatprep.mubr.bf16.mxu1 %v4460_v2  ;;  %3617 = vst [vmem:[%s4975_s29 + $0x8a8] sm:$0xff] %v1934_v36  ;;  %v1936_v6 = vpop.f32.mrb[214].mxu0 }
 0x4cb   : > { %3619 = vst [vmem:[%s4975_s29 + $0x8b8] sm:$0xff] %v1936_v6  ;;  %v1938_v7 = vpop.f32.mrb[215].mxu0 }
 0x4cc   : > { %3620 = vst [vmem:[%s4975_s29 + $0x8c0] sm:$0xff] %v1938_v7  ;;  %v1942_v11 = vpop.f32.mrb[216].mxu0 }
 0x4cd   : > { %3622 = vst [vmem:[%s4975_s29 + $0x8d0] sm:$0xff] %v1942_v11 }
 0x4d1   : > { %3678 = vmatmul.mubr.msk.bf16.gmra.mrb[0].mxu1 %vm380_vm0, %v5340_v53  ;;  %v1944_v53 = vpop.f32.mrb[217].mxu0 }
 0x4d2   : > { %2816 = vmatprep.mubr.bf16.mxu1 %v4460_v2  ;;  %3623 = vst [vmem:[%s4975_s29 + $0x8d8] sm:$0xff] %v1944_v53  ;;  %v1946_v13 = vpop.f32.mrb[218].mxu0 }
 0x4d3   : > { %3625 = vst [vmem:[%s4975_s29 + $0x8e8] sm:$0xff] %v1946_v13  ;;  %v1948_v16 = vpop.f32.mrb[219].mxu0 }
 0x4d4   : > { %3626 = vst [vmem:[%s4975_s29 + $0x8f0] sm:$0xff] %v1948_v16 }
 0x4d9   : > { %3679 = vmatmul.mubr.msk.bf16.gmra.mrb[4].mxu1 %vm380_vm0, %v5350_v54 }
 0x4da   : > { %2826 = vmatprep.mubr.bf16.mxu1 %v4460_v2 }
 0x4e1   : > { %3680 = vmatmul.mubr.msk.bf16.gmra.mrb[8].mxu1 %vm380_vm0, %v5360_v55 }
 0x4e2   : > { %2836 = vmatprep.mubr.bf16.mxu1 %v4460_v2 }
 0x4e9   : > { %3681 = vmatmul.mubr.msk.bf16.gmra.mrb[12].mxu1 %vm380_vm0, %v5370_v56 }
 0x504   : > { %v2608_v54 = vpop.f32.mrb[176].mxu1 }
 0x505   : > { %3706 = vst [vmem:[%s4975_s29 + $0x900] sm:$0xff] %v2608_v54  ;;  %v2610_v43 = vpop.f32.mrb[177].mxu1 }
 0x506   : > { %3707 = vst [vmem:[%s4975_s29 + $0x908] sm:$0xff] %v2610_v43  ;;  %v2612_v44 = vpop.f32.mrb[178].mxu1 }
 0x507   : > { %3709 = vst [vmem:[%s4975_s29 + $0x918] sm:$0xff] %v2612_v44  ;;  %v2614_v52 = vpop.f32.mrb[179].mxu1 }
 0x508   : > { %3710 = vst [vmem:[%s4975_s29 + $0x920] sm:$0xff] %v2614_v52 }
 0x50c   : > { %v2618_v55 = vpop.f32.mrb[180].mxu1 }
 0x50d   : > { %3712 = vst [vmem:[%s4975_s29 + $0x930] sm:$0xff] %v2618_v55  ;;  %v2620_v2 = vpop.f32.mrb[181].mxu1 }
 0x50e   : > { %3713 = vst [vmem:[%s4975_s29 + $0x938] sm:$0xff] %v2620_v2  ;;  %v2622_v56 = vpop.f32.mrb[182].mxu1 }
 0x50f   : > { %3715 = vst [vmem:[%s4975_s29 + $0x948] sm:$0xff] %v2622_v56  ;;  %v2624_v38 = vpop.f32.mrb[183].mxu1 }
 0x510   : > { %3716 = vst [vmem:[%s4975_s29 + $0x950] sm:$0xff] %v2624_v38 }
 0x514   : > { %v2628_v57 = vpop.f32.mrb[184].mxu1 }
 0x515   : > { %3718 = vst [vmem:[%s4975_s29 + $0x960] sm:$0xff] %v2628_v57  ;;  %v2630_v58 = vpop.f32.mrb[185].mxu1 }
 0x516   : > { %3719 = vst [vmem:[%s4975_s29 + $0x968] sm:$0xff] %v2630_v58  ;;  %v2632_v40 = vpop.f32.mrb[186].mxu1 }
 0x517   : > { %3721 = vst [vmem:[%s4975_s29 + $0x978] sm:$0xff] %v2632_v40  ;;  %v2634_v35 = vpop.f32.mrb[187].mxu1 }
 0x518   : > { %3722 = vst [vmem:[%s4975_s29 + $0x980] sm:$0xff] %v2634_v35 }
 0x51c   : > { %v2638_v59 = vpop.f32.mrb[188].mxu1 }
 0x51d   : > { %3724 = vst [vmem:[%s4975_s29 + $0x990] sm:$0xff] %v2638_v59  ;;  %v2640_v60 = vpop.f32.mrb[189].mxu1 }
 0x51e   : > { %3725 = vst [vmem:[%s4975_s29 + $0x998] sm:$0xff] %v2640_v60  ;;  %v2642_v61 = vpop.f32.mrb[190].mxu1 }
 0x51f   : > { %3727 = vst [vmem:[%s4975_s29 + $0x9a8] sm:$0xff] %v2642_v61  ;;  %v2644_v62 = vpop.f32.mrb[191].mxu1 }
 0x520   : > { %3728 = vst [vmem:[%s4975_s29 + $0x9b0] sm:$0xff] %v2644_v62  ;;  %v4185_v3 = vpop.f32.mrb[220].mxu0 }
 0x521   : > { %3714 = vst [vmem:[%s4975_s29 + $0x940] sm:$0xff] %v4185_v3  ;;  %v2881_v63 = vpop.f32.mrb[221].mxu0 }
 0x522   : > { %3708 = vst [vmem:[%s4975_s29 + $0x910] sm:$0xff] %v2881_v63  ;;  %v4186_v37 = vpop.f32.mrb[222].mxu0 }
 0x523   : > { %3717 = vst [vmem:[%s4975_s29 + $0x958] sm:$0xff] %v4186_v37  ;;  %v2884_v8 = vpop.f32.mrb[223].mxu0 }
 0x524   : > { %v2648_v50 = vpop.f32.mrb[192].mxu1  ;;  %3711 = vst [vmem:[%s4975_s29 + $0x928] sm:$0xff] %v2884_v8 }
 0x525   : > { %3730 = vst [vmem:[%s4975_s29 + $0x9c0] sm:$0xff] %v2648_v50  ;;  %v2650_v20 = vpop.f32.mrb[193].mxu1 }
 0x526   : > { %3731 = vst [vmem:[%s4975_s29 + $0x9c8] sm:$0xff] %v2650_v20  ;;  %v2652_v21 = vpop.f32.mrb[194].mxu1 }
 0x527   : > { %3733 = vst [vmem:[%s4975_s29 + $0x9d8] sm:$0xff] %v2652_v21  ;;  %v2654_v22 = vpop.f32.mrb[195].mxu1 }
 0x528   : > { %3734 = vst [vmem:[%s4975_s29 + $0x9e0] sm:$0xff] %v2654_v22  ;;  %v4189_v51 = vpop.f32.mrb[224].mxu0 }
 0x529   : > { %3726 = vst [vmem:[%s4975_s29 + $0x9a0] sm:$0xff] %v4189_v51  ;;  %v2897_v23 = vpop.f32.mrb[225].mxu0 }
 0x52a   : > { %3720 = vst [vmem:[%s4975_s29 + $0x970] sm:$0xff] %v2897_v23  ;;  %v4190_v39 = vpop.f32.mrb[226].mxu0 }
 0x52b   : > { %3729 = vst [vmem:[%s4975_s29 + $0x9b8] sm:$0xff] %v4190_v39  ;;  %v2900_v34 = vpop.f32.mrb[227].mxu0 }
 0x52c   : > { %v2658_v24 = vpop.f32.mrb[196].mxu1  ;;  %3723 = vst [vmem:[%s4975_s29 + $0x988] sm:$0xff] %v2900_v34 }
 0x52d   : > { %3736 = vst [vmem:[%s4975_s29 + $0x9f0] sm:$0xff] %v2658_v24  ;;  %v2660_v25 = vpop.f32.mrb[197].mxu1 }
 0x52e   : > { %3737 = vst [vmem:[%s4975_s29 + $0x9f8] sm:$0xff] %v2660_v25  ;;  %v2662_v26 = vpop.f32.mrb[198].mxu1 }
 0x52f   : > { %3739 = vst [vmem:[%s4975_s29 + $0xa08] sm:$0xff] %v2662_v26  ;;  %v2664_v27 = vpop.f32.mrb[199].mxu1 }
 0x530   : > { %3740 = vst [vmem:[%s4975_s29 + $0xa10] sm:$0xff] %v2664_v27  ;;  %v4193_v28 = vpop.f32.mrb[228].mxu0 }
 0x531   : > { %3738 = vst [vmem:[%s4975_s29 + $0xa00] sm:$0xff] %v4193_v28  ;;  %v2913_v29 = vpop.f32.mrb[229].mxu0 }
 0x532   : > { %3732 = vst [vmem:[%s4975_s29 + $0x9d0] sm:$0xff] %v2913_v29  ;;  %v4194_v30 = vpop.f32.mrb[230].mxu0 }
 0x533   : > { %3741 = vst [vmem:[%s4975_s29 + $0xa18] sm:$0xff] %v4194_v30  ;;  %v2916_v31 = vpop.f32.mrb[231].mxu0 }
 0x534   : > { %v2668_v32 = vpop.f32.mrb[200].mxu1  ;;  %3735 = vst [vmem:[%s4975_s29 + $0x9e8] sm:$0xff] %v2916_v31 }
 0x535   : > { %3742 = vst [vmem:[%s4975_s29 + $0xa20] sm:$0xff] %v2668_v32  ;;  %v2670_v41 = vpop.f32.mrb[201].mxu1 }
 0x536   : > { %3743 = vst [vmem:[%s4975_s29 + $0xa28] sm:$0xff] %v2670_v41  ;;  %v2672_v33 = vpop.f32.mrb[202].mxu1 }
 0x537   : > { %3745 = vst [vmem:[%s4975_s29 + $0xa38] sm:$0xff] %v2672_v33  ;;  %v2674_v46 = vpop.f32.mrb[203].mxu1 }
 0x538   : > { %3746 = vst [vmem:[%s4975_s29 + $0xa40] sm:$0xff] %v2674_v46  ;;  %v4197_v47 = vpop.f32.mrb[232].mxu0 }
 0x539   : > { %3750 = vst [vmem:[%s4975_s29 + $0xa60] sm:$0xff] %v4197_v47  ;;  %v2929_v0 = vpop.f32.mrb[233].mxu0 }
 0x53a   : > { %3744 = vst [vmem:[%s4975_s29 + $0xa30] sm:$0xff] %v2929_v0  ;;  %v4198_v1 = vpop.f32.mrb[234].mxu0 }
 0x53b   : > { %3753 = vst [vmem:[%s4975_s29 + $0xa78] sm:$0xff] %v4198_v1  ;;  %v2932_v10 = vpop.f32.mrb[235].mxu0 }
 0x53c   : > { %v2678_v12 = vpop.f32.mrb[204].mxu1  ;;  %3747 = vst [vmem:[%s4975_s29 + $0xa48] sm:$0xff] %v2932_v10 }
 0x53d   : > { %3748 = vst [vmem:[%s4975_s29 + $0xa50] sm:$0xff] %v2678_v12  ;;  %v2680_v9 = vpop.f32.mrb[205].mxu1 }
 0x53e   : > { %3749 = vst [vmem:[%s4975_s29 + $0xa58] sm:$0xff] %v2680_v9  ;;  %v2682_v42 = vpop.f32.mrb[206].mxu1 }
 0x53f   : > { %3751 = vst [vmem:[%s4975_s29 + $0xa68] sm:$0xff] %v2682_v42  ;;  %v2684_v14 = vpop.f32.mrb[207].mxu1 }
 0x540   : > { %3752 = vst [vmem:[%s4975_s29 + $0xa70] sm:$0xff] %v2684_v14  ;;  %v4201_v17 = vpop.f32.mrb[236].mxu0 }
 0x541   : > { %3762 = vst [vmem:[%s4975_s29 + $0xac0] sm:$0xff] %v4201_v17  ;;  %v2945_v15 = vpop.f32.mrb[237].mxu0 }
 0x542   : > { %3756 = vst [vmem:[%s4975_s29 + $0xa90] sm:$0xff] %v2945_v15  ;;  %v4202_v18 = vpop.f32.mrb[238].mxu0 }
 0x543   : > { %3765 = vst [vmem:[%s4975_s29 + $0xad8] sm:$0xff] %v4202_v18  ;;  %v2948_v19 = vpop.f32.mrb[239].mxu0 }
 0x544   : > { %v2688_v48 = vpop.f32.mrb[208].mxu1  ;;  %3759 = vst [vmem:[%s4975_s29 + $0xaa8] sm:$0xff] %v2948_v19 }
 0x545   : > { %3754 = vst [vmem:[%s4975_s29 + $0xa80] sm:$0xff] %v2688_v48  ;;  %v2690_v45 = vpop.f32.mrb[209].mxu1 }
 0x546   : > { %3755 = vst [vmem:[%s4975_s29 + $0xa88] sm:$0xff] %v2690_v45  ;;  %v2692_v49 = vpop.f32.mrb[210].mxu1 }
 0x547   : > { %3757 = vst [vmem:[%s4975_s29 + $0xa98] sm:$0xff] %v2692_v49  ;;  %v2694_v4 = vpop.f32.mrb[211].mxu1 }
 0x548   : > { %3758 = vst [vmem:[%s4975_s29 + $0xaa0] sm:$0xff] %v2694_v4  ;;  %v4205_v5 = vpop.f32.mrb[240].mxu0 }
 0x549   : > { %3774 = vst [vmem:[%s4975_s29 + $0xb20] sm:$0xff] %v4205_v5  ;;  %v2961_v36 = vpop.f32.mrb[241].mxu0 }
 0x54a   : > { %3768 = vst [vmem:[%s4975_s29 + $0xaf0] sm:$0xff] %v2961_v36  ;;  %v4206_v6 = vpop.f32.mrb[242].mxu0 }
 0x54b   : > { %3777 = vst [vmem:[%s4975_s29 + $0xb38] sm:$0xff] %v4206_v6  ;;  %v2964_v7 = vpop.f32.mrb[243].mxu0 }
 0x54c   : > { %v2698_v11 = vpop.f32.mrb[212].mxu1  ;;  %3771 = vst [vmem:[%s4975_s29 + $0xb08] sm:$0xff] %v2964_v7 }
 0x54d   : > { %3760 = vst [vmem:[%s4975_s29 + $0xab0] sm:$0xff] %v2698_v11  ;;  %v2700_v53 = vpop.f32.mrb[213].mxu1 }
 0x54e   : > { %3761 = vst [vmem:[%s4975_s29 + $0xab8] sm:$0xff] %v2700_v53  ;;  %v2702_v13 = vpop.f32.mrb[214].mxu1 }
 0x54f   : > { %3763 = vst [vmem:[%s4975_s29 + $0xac8] sm:$0xff] %v2702_v13  ;;  %v2704_v16 = vpop.f32.mrb[215].mxu1 }
 0x550   : > { %3764 = vst [vmem:[%s4975_s29 + $0xad0] sm:$0xff] %v2704_v16  ;;  %v4209_v54 = vpop.f32.mrb[244].mxu0 }
 0x551   : > { %3786 = vst [vmem:[%s4975_s29 + $0xb80] sm:$0xff] %v4209_v54  ;;  %v2977_v43 = vpop.f32.mrb[245].mxu0 }
 0x552   : > { %3780 = vst [vmem:[%s4975_s29 + $0xb50] sm:$0xff] %v2977_v43  ;;  %v4210_v44 = vpop.f32.mrb[246].mxu0 }
 0x553   : > { %3789 = vst [vmem:[%s4975_s29 + $0xb98] sm:$0xff] %v4210_v44  ;;  %v2980_v52 = vpop.f32.mrb[247].mxu0 }
 0x554   : > { %v2708_v55 = vpop.f32.mrb[216].mxu1  ;;  %3783 = vst [vmem:[%s4975_s29 + $0xb68] sm:$0xff] %v2980_v52 }
 0x555   : > { %3766 = vst [vmem:[%s4975_s29 + $0xae0] sm:$0xff] %v2708_v55  ;;  %v2710_v2 = vpop.f32.mrb[217].mxu1 }
 0x556   : > { %3767 = vst [vmem:[%s4975_s29 + $0xae8] sm:$0xff] %v2710_v2  ;;  %v2712_v56 = vpop.f32.mrb[218].mxu1 }
 0x557   : > { %3769 = vst [vmem:[%s4975_s29 + $0xaf8] sm:$0xff] %v2712_v56  ;;  %v2714_v38 = vpop.f32.mrb[219].mxu1 }
 0x558   : > { %3770 = vst [vmem:[%s4975_s29 + $0xb00] sm:$0xff] %v2714_v38  ;;  %v4213_v57 = vpop.f32.mrb[248].mxu0 }
 0x559   : > { %3798 = vst [vmem:[%s4975_s29 + $0xbe0] sm:$0xff] %v4213_v57  ;;  %v2993_v58 = vpop.f32.mrb[249].mxu0 }
 0x55a   : > { %3792 = vst [vmem:[%s4975_s29 + $0xbb0] sm:$0xff] %v2993_v58  ;;  %v4214_v40 = vpop.f32.mrb[250].mxu0 }
 0x55b   : > { %3801 = vst [vmem:[%s4975_s29 + $0xbf8] sm:$0xff] %v4214_v40  ;;  %v2996_v35 = vpop.f32.mrb[251].mxu0 }
 0x55c   : > { %v2718_v59 = vpop.f32.mrb[220].mxu1  ;;  %3795 = vst [vmem:[%s4975_s29 + $0xbc8] sm:$0xff] %v2996_v35 }
 0x55d   : > { %3772 = vst [vmem:[%s4975_s29 + $0xb10] sm:$0xff] %v2718_v59  ;;  %v2720_v60 = vpop.f32.mrb[221].mxu1 }
 0x55e   : > { %3773 = vst [vmem:[%s4975_s29 + $0xb18] sm:$0xff] %v2720_v60  ;;  %v2722_v61 = vpop.f32.mrb[222].mxu1 }
 0x55f   : > { %3775 = vst [vmem:[%s4975_s29 + $0xb28] sm:$0xff] %v2722_v61  ;;  %v2724_v62 = vpop.f32.mrb[223].mxu1 }
 0x560   : > { %3776 = vst [vmem:[%s4975_s29 + $0xb30] sm:$0xff] %v2724_v62  ;;  %v4217_v3 = vpop.f32.mrb[252].mxu0 }
 0x561   : > { %3810 = vst [vmem:[%s4975_s29 + $0xc40] sm:$0xff] %v4217_v3  ;;  %v3009_v63 = vpop.f32.mrb[253].mxu0 }
 0x562   : > { %3804 = vst [vmem:[%s4975_s29 + $0xc10] sm:$0xff] %v3009_v63  ;;  %v4218_v37 = vpop.f32.mrb[254].mxu0 }
 0x563   : > { %3813 = vst [vmem:[%s4975_s29 + $0xc58] sm:$0xff] %v4218_v37  ;;  %v3012_v8 = vpop.f32.mrb[255].mxu0 }
 0x564   : > { %v2728_v50 = vpop.f32.mrb[224].mxu1  ;;  %3807 = vst [vmem:[%s4975_s29 + $0xc28] sm:$0xff] %v3012_v8 }
 0x565   : > { %3778 = vst [vmem:[%s4975_s29 + $0xb40] sm:$0xff] %v2728_v50  ;;  %v2730_v20 = vpop.f32.mrb[225].mxu1 }
 0x566   : > { %3779 = vst [vmem:[%s4975_s29 + $0xb48] sm:$0xff] %v2730_v20  ;;  %v2732_v21 = vpop.f32.mrb[226].mxu1 }
 0x567   : > { %3781 = vst [vmem:[%s4975_s29 + $0xb58] sm:$0xff] %v2732_v21  ;;  %v2734_v22 = vpop.f32.mrb[227].mxu1 }
 0x568   : > { %3782 = vst [vmem:[%s4975_s29 + $0xb60] sm:$0xff] %v2734_v22  ;;  %v4221_v51 = vpop.f32.mrb[0].mxu0 }
 0x569   : > { %3822 = vst [vmem:[%s4975_s29 + $0xca0] sm:$0xff] %v4221_v51  ;;  %v3025_v23 = vpop.f32.mrb[1].mxu0 }
 0x56a   : > { %3816 = vst [vmem:[%s4975_s29 + $0xc70] sm:$0xff] %v3025_v23  ;;  %v4222_v39 = vpop.f32.mrb[2].mxu0 }
 0x56b   : > { %3825 = vst [vmem:[%s4975_s29 + $0xcb8] sm:$0xff] %v4222_v39  ;;  %v3028_v34 = vpop.f32.mrb[3].mxu0 }
 0x56c   : > { %v2738_v24 = vpop.f32.mrb[228].mxu1  ;;  %3819 = vst [vmem:[%s4975_s29 + $0xc88] sm:$0xff] %v3028_v34 }
 0x56d   : > { %3784 = vst [vmem:[%s4975_s29 + $0xb70] sm:$0xff] %v2738_v24  ;;  %v2740_v25 = vpop.f32.mrb[229].mxu1 }
 0x56e   : > { %3785 = vst [vmem:[%s4975_s29 + $0xb78] sm:$0xff] %v2740_v25  ;;  %v2742_v26 = vpop.f32.mrb[230].mxu1 }
 0x56f   : > { %3787 = vst [vmem:[%s4975_s29 + $0xb88] sm:$0xff] %v2742_v26  ;;  %v2744_v27 = vpop.f32.mrb[231].mxu1 }
 0x570   : > { %3788 = vst [vmem:[%s4975_s29 + $0xb90] sm:$0xff] %v2744_v27  ;;  %v4225_v28 = vpop.f32.mrb[4].mxu0 }
 0x571   : > { %3834 = vst [vmem:[%s4975_s29 + $0xd00] sm:$0xff] %v4225_v28  ;;  %v3041_v29 = vpop.f32.mrb[5].mxu0 }
 0x572   : > { %3828 = vst [vmem:[%s4975_s29 + $0xcd0] sm:$0xff] %v3041_v29  ;;  %v4226_v30 = vpop.f32.mrb[6].mxu0 }
 0x573   : > { %3837 = vst [vmem:[%s4975_s29 + $0xd18] sm:$0xff] %v4226_v30  ;;  %v3044_v31 = vpop.f32.mrb[7].mxu0 }
 0x574   : > { %v2748_v32 = vpop.f32.mrb[232].mxu1  ;;  %3831 = vst [vmem:[%s4975_s29 + $0xce8] sm:$0xff] %v3044_v31 }
 0x575   : > { %3790 = vst [vmem:[%s4975_s29 + $0xba0] sm:$0xff] %v2748_v32  ;;  %v2750_v41 = vpop.f32.mrb[233].mxu1 }
 0x576   : > { %3791 = vst [vmem:[%s4975_s29 + $0xba8] sm:$0xff] %v2750_v41  ;;  %v2752_v33 = vpop.f32.mrb[234].mxu1 }
 0x577   : > { %3793 = vst [vmem:[%s4975_s29 + $0xbb8] sm:$0xff] %v2752_v33  ;;  %v2754_v46 = vpop.f32.mrb[235].mxu1 }
 0x578   : > { %3794 = vst [vmem:[%s4975_s29 + $0xbc0] sm:$0xff] %v2754_v46  ;;  %v4229_v47 = vpop.f32.mrb[8].mxu0 }
 0x579   : > { %3846 = vst [vmem:[%s4975_s29 + $0xd60] sm:$0xff] %v4229_v47  ;;  %v3057_v0 = vpop.f32.mrb[9].mxu0 }
 0x57a   : > { %3840 = vst [vmem:[%s4975_s29 + $0xd30] sm:$0xff] %v3057_v0  ;;  %v4230_v1 = vpop.f32.mrb[10].mxu0 }
 0x57b   : > { %3849 = vst [vmem:[%s4975_s29 + $0xd78] sm:$0xff] %v4230_v1  ;;  %v3060_v10 = vpop.f32.mrb[11].mxu0 }
 0x57c   : > { %v2758_v12 = vpop.f32.mrb[236].mxu1  ;;  %3843 = vst [vmem:[%s4975_s29 + $0xd48] sm:$0xff] %v3060_v10 }
 0x57d   : > { %3796 = vst [vmem:[%s4975_s29 + $0xbd0] sm:$0xff] %v2758_v12  ;;  %v2760_v9 = vpop.f32.mrb[237].mxu1 }
 0x57e   : > { %3797 = vst [vmem:[%s4975_s29 + $0xbd8] sm:$0xff] %v2760_v9  ;;  %v2762_v42 = vpop.f32.mrb[238].mxu1 }
 0x57f   : > { %3799 = vst [vmem:[%s4975_s29 + $0xbe8] sm:$0xff] %v2762_v42  ;;  %v2764_v14 = vpop.f32.mrb[239].mxu1 }
 0x580   : > { %3800 = vst [vmem:[%s4975_s29 + $0xbf0] sm:$0xff] %v2764_v14 }
 0x584   : > { %v2768_v17 = vpop.f32.mrb[240].mxu1 }
 0x585   : > { %3802 = vst [vmem:[%s4975_s29 + $0xc00] sm:$0xff] %v2768_v17  ;;  %v2770_v15 = vpop.f32.mrb[241].mxu1 }
 0x586   : > { %3803 = vst [vmem:[%s4975_s29 + $0xc08] sm:$0xff] %v2770_v15  ;;  %v2772_v18 = vpop.f32.mrb[242].mxu1 }
 0x587   : > { %3805 = vst [vmem:[%s4975_s29 + $0xc18] sm:$0xff] %v2772_v18  ;;  %v2774_v19 = vpop.f32.mrb[243].mxu1 }
 0x588   : > { %3806 = vst [vmem:[%s4975_s29 + $0xc20] sm:$0xff] %v2774_v19 }
 0x58c   : > { %v2778_v48 = vpop.f32.mrb[244].mxu1 }
 0x58d   : > { %3808 = vst [vmem:[%s4975_s29 + $0xc30] sm:$0xff] %v2778_v48  ;;  %v2780_v45 = vpop.f32.mrb[245].mxu1 }
 0x58e   : > { %3809 = vst [vmem:[%s4975_s29 + $0xc38] sm:$0xff] %v2780_v45  ;;  %v2782_v49 = vpop.f32.mrb[246].mxu1 }
 0x58f   : > { %3811 = vst [vmem:[%s4975_s29 + $0xc48] sm:$0xff] %v2782_v49  ;;  %v2784_v4 = vpop.f32.mrb[247].mxu1 }
 0x590   : > { %3812 = vst [vmem:[%s4975_s29 + $0xc50] sm:$0xff] %v2784_v4 }
 0x594   : > { %v2788_v5 = vpop.f32.mrb[248].mxu1 }
 0x595   : > { %3814 = vst [vmem:[%s4975_s29 + $0xc60] sm:$0xff] %v2788_v5  ;;  %v2790_v36 = vpop.f32.mrb[249].mxu1 }
 0x596   : > { %3815 = vst [vmem:[%s4975_s29 + $0xc68] sm:$0xff] %v2790_v36  ;;  %v2792_v6 = vpop.f32.mrb[250].mxu1 }
 0x597   : > { %3817 = vst [vmem:[%s4975_s29 + $0xc78] sm:$0xff] %v2792_v6  ;;  %v2794_v7 = vpop.f32.mrb[251].mxu1 }
 0x598   : > { %3818 = vst [vmem:[%s4975_s29 + $0xc80] sm:$0xff] %v2794_v7 }
 0x59c   : > { %v2798_v11 = vpop.f32.mrb[252].mxu1 }
 0x59d   : > { %3820 = vst [vmem:[%s4975_s29 + $0xc90] sm:$0xff] %v2798_v11  ;;  %v2800_v53 = vpop.f32.mrb[253].mxu1 }
 0x59e   : > { %3821 = vst [vmem:[%s4975_s29 + $0xc98] sm:$0xff] %v2800_v53  ;;  %v2802_v13 = vpop.f32.mrb[254].mxu1 }
 0x59f   : > { %3823 = vst [vmem:[%s4975_s29 + $0xca8] sm:$0xff] %v2802_v13  ;;  %v2804_v16 = vpop.f32.mrb[255].mxu1 }
 0x5a0   : > { %3824 = vst [vmem:[%s4975_s29 + $0xcb0] sm:$0xff] %v2804_v16 }
 0x5a4   : > { %v2808_v54 = vpop.f32.mrb[0].mxu1 }
 0x5a5   : > { %3826 = vst [vmem:[%s4975_s29 + $0xcc0] sm:$0xff] %v2808_v54  ;;  %v2810_v43 = vpop.f32.mrb[1].mxu1 }
 0x5a6   : > { %3827 = vst [vmem:[%s4975_s29 + $0xcc8] sm:$0xff] %v2810_v43  ;;  %v2812_v44 = vpop.f32.mrb[2].mxu1 }
 0x5a7   : > { %3829 = vst [vmem:[%s4975_s29 + $0xcd8] sm:$0xff] %v2812_v44  ;;  %v2814_v52 = vpop.f32.mrb[3].mxu1 }
 0x5a8   : > { %3830 = vst [vmem:[%s4975_s29 + $0xce0] sm:$0xff] %v2814_v52 }
 0x5ac   : > { %v2818_v55 = vpop.f32.mrb[4].mxu1 }
 0x5ad   : > { %3832 = vst [vmem:[%s4975_s29 + $0xcf0] sm:$0xff] %v2818_v55  ;;  %v2820_v2 = vpop.f32.mrb[5].mxu1 }
 0x5ae   : > { %3833 = vst [vmem:[%s4975_s29 + $0xcf8] sm:$0xff] %v2820_v2  ;;  %v2822_v56 = vpop.f32.mrb[6].mxu1 }
 0x5af   : > { %3835 = vst [vmem:[%s4975_s29 + $0xd08] sm:$0xff] %v2822_v56  ;;  %v2824_v38 = vpop.f32.mrb[7].mxu1 }
 0x5b0   : > { %3836 = vst [vmem:[%s4975_s29 + $0xd10] sm:$0xff] %v2824_v38 }
 0x5b4   : > { %v2828_v57 = vpop.f32.mrb[8].mxu1 }
 0x5b5   : > { %3838 = vst [vmem:[%s4975_s29 + $0xd20] sm:$0xff] %v2828_v57  ;;  %v2830_v58 = vpop.f32.mrb[9].mxu1 }
 0x5b6   : > { %3839 = vst [vmem:[%s4975_s29 + $0xd28] sm:$0xff] %v2830_v58  ;;  %v2832_v40 = vpop.f32.mrb[10].mxu1 }
 0x5b7   : > { %3841 = vst [vmem:[%s4975_s29 + $0xd38] sm:$0xff] %v2832_v40  ;;  %v2834_v35 = vpop.f32.mrb[11].mxu1 }
 0x5b8   : > { %3842 = vst [vmem:[%s4975_s29 + $0xd40] sm:$0xff] %v2834_v35 }
 0x5bc   : > { %v2838_v59 = vpop.f32.mrb[12].mxu1 }
 0x5bd   : > { %3844 = vst [vmem:[%s4975_s29 + $0xd50] sm:$0xff] %v2838_v59  ;;  %v2840_v60 = vpop.f32.mrb[13].mxu1 }
 0x5be   : > { %3845 = vst [vmem:[%s4975_s29 + $0xd58] sm:$0xff] %v2840_v60  ;;  %v2842_v61 = vpop.f32.mrb[14].mxu1 }
 0x5bf   : > { %3847 = vst [vmem:[%s4975_s29 + $0xd68] sm:$0xff] %v2842_v61  ;;  %v2844_v62 = vpop.f32.mrb[15].mxu1 }
 0x5c0   : > { %3848 = vst [vmem:[%s4975_s29 + $0xd70] sm:$0xff] %v2844_v62 }
 0x5c1   : > { %4409 = shalt.err (!%p4406_p3)
}
 0x5c2   : > { %s4410_s27 = scalar_lea.hbm %s5802_s20, 55296  ;;  %s4414_s4 = scalar_lea.hbm %s5855_s3, 110592 }
 0x5c3   : > { %p4411_p4 = scmp.ne.s32.totalorder %s5802_s20, %s4410_s27  ;;  %p4415_p9 = scmp.lt.u32.totalorder %s5802_s20, %s5855_s3 }
 0x5c4   : > { %p4416_p10 = scmp.lt.u32.totalorder %s4414_s4, %s4410_s27  ;;  %p4418_p12 = scmp.lt.u32.totalorder %s4410_s27, %s5802_s20 }
 0x5c5   : > { %p4412_p7 = pnand %p4411_p4, %p4522_p5 }
 0x5c6   : > { %p4417_p11 = por %p4416_p10, %p4415_p9 }
 0x5c7   : > { %p4413_p8 = pneg %p4412_p7 }
 0x5c8   : > { %p4419_p13 = por %p4418_p12, %p4417_p11 }
 0x5ca   : > { %p4420_p0 = pnand %p4419_p13, %p4413_p8 }
 0x5cc   : > { %4423 = shalt.err (!%p4420_p0)
}
 0x5cd   : > { %s4462_s7 = smov 384   ;;  %s4463_s8 = smov 24  }
 0x5ce   : > { %4246 = dma.vmem_to_hbm [thread:$0]  (%p4522_p5), %s5804_s17, 55296, %s5802_s20, %s5811_s16, %s4462_s7, %s4462_s7, %s4463_s8  }
 0x5cf PF: > { %p4252_p1 = scmp.ge.s32.totalorder %s4458_s15, 2  ;;  %s3246_s9 = sand.u32 1, %s4446_s12  }
 0x5d0   : > { %s3247_s10 = scalar_lea.sflag [#allocation3], %s3246_s9 }
 0x5d1   : > { %p4249_p2 = pnand %p4252_p1, %p4526_p6 }
 0x5d3   : > { %4441 = dma.done.wait (!%p4249_p2), %s3247_s10, 55296  }
 0x5d4   : > { %4443 = vsyncadd (!%p4249_p2), %s3247_s10, 4294912000  ;;  %p13_p3 = scmp.ge.s32.totalorder %s4509_s18, 4   ;;  %s5858_s12 = smov %s4450_s13 }
 0x5d5   : > { %s5859_s13 = smov %s4454_s14  ;;  %s5860_s14 = smov %s4520_s21 }
 0x5d6   : > { %s5861_s15 = smov %s4509_s18  ;;  %15 = sbr.rel (!%p13_p3) target bundleno = 3 (0x3), region = 71 }
 0x5dd   :  { %3252 = vsyncpa [#allocation3], 1 }
 0x5de   :  { %3254 = vsyncpa [#allocation3 + $0x1], 1 }

</bundles_post_ra>
